<compile_context>
chip_gen: v7x
topology: tpu7x:2x2x1
jax: 0.10.0
libtpu: 0.0.40
codegen_flags: <defaults>
</compile_context>

<pallas_src>
import functools
import numpy as np

import jax
import jax.numpy as jnp
from jax.experimental import pallas as pl
from jax.experimental.pallas import tpu as pltpu

EMB_DIM = 32                  # emb_dim (PyTorch default was 64; small demo)
LANES = 128                   # vreg / MXU lane width
MATMUL_DTYPE = jnp.bfloat16   # MXU operand dtype (f32 accumulation)
BN_SCALE = float(1.0 / np.sqrt(1.0 + 1e-5))  # eval BatchNorm1d, default stats
EPS = 1e-10


# ----------------------------------------------------------------------------
# In-kernel helpers (pure functions on VMEM values).
# ----------------------------------------------------------------------------
def _leaky(x):  # nn.LeakyReLU(0.2)
    return jnp.where(x > 0.0, x, 0.2 * x)


def _att_aggregate(logits3, mask3, feats3):
    # torch: w = exp(l)*m ; w /= (sum_s w + eps) ; out = sum_s w * f
    # (normalisation applied after the weighted sum -- mathematically equal;
    #  the (G,S,1) denominator avoids the E-times-redundant broadcast reduce).
    # NOTE: exp() has no max-subtraction, matching the PyTorch reference.
    w = jnp.exp(logits3) * mask3                        # (G, S, 1)
    numer = jnp.sum(w * feats3, axis=1)                 # (G, E)
    denom = jnp.sum(w, axis=1) + EPS                    # (G, 1)
    return numer * pl.reciprocal(denom, approx=False)   # exact 1/x


# ----------------------------------------------------------------------------
# The single fused Pallas kernel (one grid step = one batch tile).
# ----------------------------------------------------------------------------
def _graphrec_kernel(widx, bidx, dims,
                     qa_er_ref, mask_u_ref, p_u_ref,
                     qas_ref, mask_s_ref, p_f_ref, mask_su_ref,
                     pt_er_ref, mask_i_ref, q_i_ref,
                     w_ref, b_ref, o_ref):
    BT, Si, Su, Si2, Sui, E = dims
    E2 = 2 * E
    n1, n2, n3 = BT * Si, BT * Su * Si2, BT * Sui

    def W(name):                       # static slice of the packed weight slab
        off, k, n = widx[name]
        return w_ref[off:off + k, :n]

    def Bv(name):                      # static slice of the packed bias slab
        row, n = bidx[name]
        return b_ref[row:row + 1, :n]

    def dot(x, wname, bname=None):     # bf16 MXU operands, f32 accumulation
        y = jnp.dot(x.astype(MATMUL_DTYPE), W(wname),
                    preferred_element_type=jnp.float32)
        return y if bname is None else y + Bv(bname)

    def logits(att_h, vname, cname):   # E->1 attention head as a lane reduce
        return jnp.sum(att_h * Bv(vname), axis=-1, keepdims=True) + Bv(cname)

    def combine(prefix, a, b, c):
        # Linear(3E,2E)+BN+ReLU -> Linear(2E,E)+BN+ReLU -> Linear(E,E)
        # (eval BN scale pre-folded; Dropout is identity in eval mode)
        x = jnp.concatenate([a, b, c], axis=-1)
        y = jnp.maximum(dot(x, prefix + "_1", prefix + "_1"), 0.0)
        y = jnp.maximum(dot(y, prefix + "_2", prefix + "_2"), 0.0)
        return dot(y, prefix + "_3", prefix + "_3")

    # -------- shared gathered activations --------
    qa_er = qa_er_ref[...].reshape(n1, E2)                 # bf16 (q_a || er_u)
    mask_u = mask_u_ref[...]                               # (BT, Si, 1) f32
    p_i = (mask_u * p_u_ref[...]).reshape(n1, E)           # (n1, E) f32

    # ===== user's consumed items: user-model & item-model g_v branches fused
    # along the lane axis (shared LHS) =====
    hid_ui = _leaky(dot(qa_er, "g1_ui", "g1_ui"))          # (n1, 2E)
    big_ui = dot(hid_ui, "big_ui", "big_ui")               # (n1, 4E):
    #   [:, :E]   = x_ia   (user g_v)     [:, E:2E] = x_ia (item g_v)
    #   [:, 2E:]  = attention x-parts with the shared w1 projections pre-folded
    att_ui = _leaky(big_ui[:, E2:] + dot(p_i, "p_att_ui"))  # (n1, 2E)
    lg_u = logits(att_ui[:, :E], "v_att1_u", "c_att1_u")
    lg_i = logits(att_ui[:, E:], "v_att1_i", "c_att1_i")
    agg_u = _att_aggregate(lg_u.reshape(BT, Si, 1), mask_u,
                           big_ui[:, :E].reshape(BT, Si, E))
    agg_i = _att_aggregate(lg_i.reshape(BT, Si, 1), mask_u,
                           big_ui[:, E:E2].reshape(BT, Si, E))
    hii = jnp.maximum(dot(jnp.concatenate([agg_u, agg_i], axis=-1),
                          "agg_ui", "agg_ui"), 0.0)        # (BT, 2E)
    h_iI, h_iI_item = hii[:, :E], hii[:, E:]

    # ===== user model: friends' consumed-items branch =====
    qas = qas_ref[...].reshape(n2, E2)                     # bf16 (q_a_s||er_s)
    mask_s = mask_s_ref[...]                               # (BT, Su*Si2, 1)
    p_i_s = (mask_s.reshape(BT, Su, Si2, 1)
             * p_f_ref[...][:, :, None, :]).reshape(n2, E)
    hid_s = _leaky(dot(qas, "g1_s", "g1_s"))               # (n2, E)
    big_s = dot(hid_s, "big_s", "big_s")                   # (n2, 2E)
    att_s = _leaky(big_s[:, E:] + dot(p_i_s, "p_att_s"))
    lg_s = logits(att_s, "v_att2", "c_att2")
    h_oI = jnp.maximum(
        dot(_att_aggregate(lg_s.reshape(BT * Su, Si2, 1),
                           mask_s.reshape(BT * Su, Si2, 1),
                           big_s[:, :E].reshape(BT * Su, Si2, E)),
            "agg_s", "agg_s"), 0.0)                        # (BT*Su, E)

    # ===== user model: social (user-user) aggregation (requires Su == Si) ===
    att_so = _leaky(dot(h_oI, "x_att3", "x_att3") + dot(p_i, "p_att3"))
    lg_so = logits(att_so, "v_att3", "c_att3")
    h_iS = jnp.maximum(
        dot(_att_aggregate(lg_so.reshape(BT, Su, 1), mask_su_ref[...],
                           h_oI.reshape(BT, Su, E)),
            "agg_so", "agg_so"), 0.0)                      # (BT, E)

    h = combine("comb_u", h_iI * h_iS, h_iI, h_iS)         # (BT, E)

    # ===== item model: users who rated the item =====
    pt_er = pt_er_ref[...].reshape(n3, E2)                 # bf16 (p_t || er_i)
    mask_i = mask_i_ref[...]                               # (BT, Sui, 1)
    q_j = (mask_i * q_i_ref[...]).reshape(n3, E)
    hid_t = _leaky(dot(pt_er, "g1_gu", "g1_gu"))           # (n3, E)
    w1f = dot(hid_t, "w1f", "w1f")                         # (n3, E) = w1(f_jt)
    att_iu = _leaky(dot(pt_er[:, :E], "x_att_iu", "x_att_iu")
                    + dot(q_j, "p_att_iu"))
    lg_iu = logits(att_iu, "v_att_iu", "c_att_iu")
    z_j = jnp.maximum(
        dot(_att_aggregate(lg_iu.reshape(BT, Sui, 1), mask_i,
                           w1f.reshape(BT, Sui, E)),
            "agg_iu", "agg_iu"), 0.0)                      # (BT, E)

    z = combine("comb_i", z_j * h_iI_item, z_j, h_iI_item)  # (BT, E)

    # ===== rating prediction =====
    y = jnp.maximum(dot(jnp.concatenate([h, z, h * z], axis=-1),
                        "rate_1", "rate_1"), 0.0)
    y = jnp.maximum(dot(y, "rate_2", "rate_2"), 0.0)
    rating = logits(y, "v_rate", "c_rate")                 # (BT, 1)
    o_ref[...] = rating.reshape(BT, 1, 1)


# ----------------------------------------------------------------------------
# Forward wrapper: embedding gathers / K-concat in plain JAX, then ONE
# pallas_call over a parallel batch grid for all dense math and attention.
# ----------------------------------------------------------------------------
def graphrec_forward(params, uids, iids, u_item_pad, u_user_pad,
                     u_user_item_pad, i_user_pad, *, w_index, b_index,
                     batch_tile=None):
    ue, ie, rte = params["user_emb"], params["item_emb"], params["rate_emb"]
    w_slab, b_slab = params["w_slab"], params["b_slab"]
    e = ue.shape[1]
    B, Si, _ = u_item_pad.shape
    Su = u_user_pad.shape[1]
    Si2 = u_user_item_pad.shape[2]
    Sui = i_user_pad.shape[1]
    assert Su == Si, "reference model requires Su == Si (w5(p_i) vs h_oI)"
    bt = batch_tile or (2 if B % 2 == 0 else 1)
    assert B % bt == 0
    f32, mmdt = jnp.float32, MATMUL_DTYPE

    # --- embedding gathers + lane-axis K-concat of the MLP input pairs ---
    qa_er = jnp.concatenate([ie[u_item_pad[:, :, 0]],
                             rte[u_item_pad[:, :, 1]]], axis=-1).astype(mmdt)
    mask_u = (u_item_pad[:, :, 0] > 0).astype(f32)[..., None]      # (B,Si,1)
    p_u = ue[uids][:, None, :]                                     # (B,1,E)
    qas_ers = jnp.concatenate([ie[u_user_item_pad[..., 0]],
                               rte[u_user_item_pad[..., 1]]], axis=-1
                              ).reshape(B, Su * Si2, 2 * e).astype(mmdt)
    mask_s = (u_user_item_pad[..., 0] > 0).astype(f32).reshape(B, Su * Si2, 1)
    p_f = ue[u_user_pad]                                           # (B,Su,E)
    mask_su = (u_user_pad > 0).astype(f32)[..., None]              # (B,Su,1)
    pt_er = jnp.concatenate([ue[i_user_pad[:, :, 0]],
                             rte[i_user_pad[:, :, 1]]], axis=-1).astype(mmdt)
    mask_i = (i_user_pad[:, :, 0] > 0).astype(f32)[..., None]      # (B,Sui,1)
    q_i = ie[iids][:, None, :]                                     # (B,1,E)

    act = lambda *s: pl.BlockSpec((bt,) + s, lambda i: (i, 0, 0))
    full = lambda a: pl.BlockSpec(a.shape, lambda i: (0, 0))

    kernel = functools.partial(_graphrec_kernel, w_index, b_index,
                               (bt, Si, Su, Si2, Sui, e))
    out = pl.pallas_call(
        kernel,
        grid=(B // bt,),
        out_shape=jax.ShapeDtypeStruct((B, 1, 1), jnp.float32),
        in_specs=[
            act(Si, 2 * e), act(Si, 1), act(1, e),
            act(Su * Si2, 2 * e), act(Su * Si2, 1), act(Su, e), act(Su, 1),
            act(Sui, 2 * e), act(Sui, 1), act(1, e),
            full(w_slab), full(b_slab),
        ],
        out_specs=pl.BlockSpec((bt, 1, 1), lambda i: (i, 0, 0)),
        compiler_params=pltpu.CompilerParams(
            dimension_semantics=("parallel",)),
    )(qa_er, mask_u, p_u, qas_ers, mask_s, p_f, mask_su,
      pt_er, mask_i, q_i, w_slab, b_slab)
    return out.reshape(B, 1)


# ----------------------------------------------------------------------------
# Parameter construction: raw nn.Module parameters (synthetic, deterministic),
# exact linear-map composition / lane fusion / eval-BN folding, then packing
# into one weight slab (bf16) and one bias slab (f32).
# ----------------------------------------------------------------------------
class _Packer:
    """Packs many small (K, N) matrices into one (sum K, 128) slab."""

    def __init__(self):
        self._bufs, self.index, self._off = [], {}, 0

    def add(self, name, w):
        w = np.asarray(w, np.float32)
        k, n = w.shape
        assert k % 8 == 0 and n <= LANES, (name, w.shape)
        buf = np.zeros((k, LANES), np.float32)
        buf[:, :n] = w
        self._bufs.append(buf)
        self.index[name] = (self._off, k, n)
        self._off += k

    def slab(self, dtype):
        return jnp.asarray(np.concatenate(self._bufs, axis=0), dtype)


class _RowPacker:
    """Packs bias / row vectors into one (num_rows, 128) f32 slab."""

    def __init__(self):
        self._rows, self.index = [], {}

    def add(self, name, v):
        v = np.asarray(v, np.float32).reshape(-1)
        n = v.shape[0]
        assert n <= LANES, (name, n)
        row = np.zeros((LANES,), np.float32)
        row[:n] = v
        self.index[name] = (len(self._rows), n)
        self._rows.append(row)

    def slab(self):
        rows = np.stack(self._rows, axis=0)
        pad = (-rows.shape[0]) % 8
        if pad:
            rows = np.concatenate([rows, np.zeros((pad, LANES), np.float32)], 0)
        return jnp.asarray(rows)


def build_params(seed, num_users, num_items, num_rate, e):
    rng = np.random.default_rng(seed)
    E = e

    def lin(din, dout):
        w = (rng.standard_normal((din, dout)) / np.sqrt(din)).astype(np.float32)
        b = (rng.standard_normal((dout,)) * 0.01).astype(np.float32)
        return w, b

    def emb(n):
        t = (rng.standard_normal((n, E)) * 0.1).astype(np.float32)
        t[0] = 0.0  # padding_idx = 0
        return jnp.asarray(t)

    def blkdiag(a, b):
        out = np.zeros((a.shape[0] + b.shape[0], a.shape[1] + b.shape[1]),
                       np.float32)
        out[:a.shape[0], :a.shape[1]] = a
        out[a.shape[0]:, a.shape[1]:] = b
        return out

    # ---- raw parameters mirroring the PyTorch module (weights as (in,out)) --
    # user model
    W1, b1 = lin(E, E)                      # U.w1
    W4, b4 = lin(E, E)                      # U.w4
    W5, b5 = lin(E, E)                      # U.w5
    Wg1, bg1 = lin(2 * E, E)                # U.g_v layer 1
    Wg2, bg2 = lin(E, E)                    # U.g_v layer 2
    A1, a1b = lin(2 * E, E); v1, c1 = lin(E, 1)   # user_items_att
    Wq1, q1b = lin(E, E)                    # aggre_items
    A2, a2b = lin(2 * E, E); v2, c2 = lin(E, 1)   # user_items_att_s1
    Wq2, q2b = lin(E, E)                    # aggre_items_s1
    A3, a3b = lin(2 * E, E); v3, c3 = lin(E, 1)   # user_users_att_s2
    Wq3, q3b = lin(E, E)                    # aggre_neigbors_s2
    C1, c1b = lin(3 * E, 2 * E); C2, c2b = lin(2 * E, E); C3, c3b = lin(E, E)
    # item model
    W1i, b1i = lin(E, E)                    # I.w1
    G1, g1b = lin(2 * E, E); G2, g2b = lin(E, E)  # I.g_u
    H1, h1b = lin(2 * E, E); H2, h2b = lin(E, E)  # I.g_v
    AA, aab = lin(2 * E, E); vA, cA = lin(E, 1)   # item_users_att_i
    WqA, qAb = lin(E, E)                    # aggre_users_i
    AB, abb = lin(2 * E, E); vB, cB = lin(E, 1)   # user_items_att (item model)
    WqB, qBb = lin(E, E)                    # aggre_items (item model)
    D1, d1b = lin(3 * E, 2 * E); D2, d2b = lin(2 * E, E); D3, d3b = lin(E, E)
    # rate_pred
    R1, r1b = lin(3 * E, E); R2, r2b = lin(E, E // 4); R3, r3b = lin(E // 4, 1)

    # ---- exact composition: fold shared w1/w4/w5 into attention 1st layers --
    A1a, A1b = A1[:E], A1[E:]
    A2a, A2b = A2[:E], A2[E:]
    A3a, A3b = A3[:E], A3[E:]
    AAa, AAb = AA[:E], AA[E:]
    ABa, ABb = AB[:E], AB[E:]
    M1a, M1b = W1 @ A1a, W1 @ A1b
    MBa, MBb = W1i @ ABa, W1i @ ABb
    M2a, M2b = W4 @ A2a, W4 @ A2b
    M3a, M3b = W5 @ A3a, W5 @ A3b
    MAa, MAb = W1i @ AAa, W1i @ AAb
    b_att1_u = b1 @ A1a + b1 @ A1b + a1b
    b_att1_i = b1i @ ABa + b1i @ ABb + abb
    b_att2 = b4 @ A2a + b4 @ A2b + a2b
    b_att3 = b5 @ A3a + b5 @ A3b + a3b
    b_attA = b1i @ AAa + b1i @ AAb + aab

    Z = np.zeros((E, E), np.float32)
    # lane-fused second stage of the shared consumed-items branch:
    # [x_ia(user) | x_ia(item) | att_x(user) | att_x(item)]  -> (2E, 4E)
    big_ui = np.concatenate([
        np.concatenate([Wg2, Z, Wg2 @ M1a, Z], axis=1),
        np.concatenate([Z, H2, Z, H2 @ MBa], axis=1)], axis=0)
    b_big_ui = np.concatenate([bg2, h2b,
                               bg2 @ M1a + b_att1_u,
                               h2b @ MBa + b_att1_i])
    # friends branch: [x_ia_s | att_x] -> (E, 2E)
    big_s = np.concatenate([Wg2, Wg2 @ M2a], axis=1)
    b_big_s = np.concatenate([bg2, bg2 @ M2a + b_att2])

    wp, bp = _Packer(), _RowPacker()

    def add(name, w, b=None):
        wp.add(name, w)
        if b is not None:
            bp.add(name, b)

    # user's consumed items (user- & item-model branches lane-fused)
    add("g1_ui", np.concatenate([Wg1, H1], axis=1), np.concatenate([bg1, h1b]))
    add("big_ui", big_ui, b_big_ui)
    add("p_att_ui", np.concatenate([M1b, MBb], axis=1))
    add("agg_ui", blkdiag(Wq1, WqB), np.concatenate([q1b, qBb]))
    bp.add("v_att1_u", v1); bp.add("c_att1_u", c1)
    bp.add("v_att1_i", vB); bp.add("c_att1_i", cB)
    # friends' consumed items
    add("g1_s", Wg1, bg1)
    add("big_s", big_s, b_big_s)
    add("p_att_s", M2b)
    add("agg_s", Wq2, q2b)
    bp.add("v_att2", v2); bp.add("c_att2", c2)
    # social aggregation
    add("x_att3", M3a, b_att3)
    add("p_att3", M3b)
    add("agg_so", Wq3, q3b)
    bp.add("v_att3", v3); bp.add("c_att3", c3)
    # users who rated the item
    add("g1_gu", G1, g1b)
    add("w1f", G2 @ W1i, g2b @ W1i + b1i)
    add("x_att_iu", MAa, b_attA)
    add("p_att_iu", MAb)
    add("agg_iu", WqA, qAb)
    bp.add("v_att_iu", vA); bp.add("c_att_iu", cA)
    # combine MLPs (eval BatchNorm folded) and rating head
    add("comb_u_1", C1 * BN_SCALE, c1b * BN_SCALE)
    add("comb_u_2", C2 * BN_SCALE, c2b * BN_SCALE)
    add("comb_u_3", C3, c3b)
    add("comb_i_1", D1 * BN_SCALE, d1b * BN_SCALE)
    add("comb_i_2", D2 * BN_SCALE, d2b * BN_SCALE)
    add("comb_i_3", D3, d3b)
    add("rate_1", R1 * BN_SCALE, r1b * BN_SCALE)
    add("rate_2", R2 * BN_SCALE, r2b * BN_SCALE)
    bp.add("v_rate", R3); bp.add("c_rate", r3b)

    params = {"user_emb": emb(num_users), "item_emb": emb(num_items),
              "rate_emb": emb(num_rate),
              "w_slab": wp.slab(MATMUL_DTYPE), "b_slab": bp.slab()}
    return params, wp.index, bp.index


# ----------------------------------------------------------------------------
if __name__ == "__main__":
    key = jax.random.PRNGKey(0)
    num_users, num_items, num_rate = 20, 24, 6
    B, Si, Su, Si2, Sui = 4, 8, 8, 8, 8   # model requires Su == Si

    params, w_index, b_index = build_params(0, num_users, num_items,
                                            num_rate, EMB_DIM)

    ku, ki, k1, k2, k3, k4, k5, k6, k7 = jax.random.split(key, 9)
    uids = jax.random.randint(ku, (B,), 1, num_users)
    iids = jax.random.randint(ki, (B,), 1, num_items)
    u_item_pad = jnp.stack(
        [jax.random.randint(k1, (B, Si), 0, num_items),
         jax.random.randint(k2, (B, Si), 1, num_rate)], axis=-1)
    u_user_pad = jax.random.randint(k3, (B, Su), 0, num_users)
    u_user_item_pad = jnp.stack(
        [jax.random.randint(k4, (B, Su, Si2), 0, num_items),
         jax.random.randint(k5, (B, Su, Si2), 1, num_rate)], axis=-1)
    i_user_pad = jnp.stack(
        [jax.random.randint(k6, (B, Sui), 0, num_users),
         jax.random.randint(k7, (B, Sui), 1, num_rate)], axis=-1)

    fwd = jax.jit(functools.partial(graphrec_forward,
                                    w_index=w_index, b_index=b_index))
    out = fwd(params, uids, iids, u_item_pad, u_user_pad,
              u_user_item_pad, i_user_pad)
    out = jax.block_until_ready(out)

    assert out.shape == (B, 1), out.shape
    assert bool(jnp.all(jnp.isfinite(out)))
    print("KERNEL_OK")
</pallas_src>

<mosaic_0001>
module attributes {stable_mosaic.version = 11 : i64} {
  func.func @_graphrec_kernel(%arg0: i32, %arg1: memref<2x8x64xbf16, #tpu.memory_space<vmem>>, %arg2: memref<2x8x1xf32, #tpu.memory_space<vmem>>, %arg3: memref<2x1x32xf32, #tpu.memory_space<vmem>>, %arg4: memref<2x64x64xbf16, #tpu.memory_space<vmem>>, %arg5: memref<2x64x1xf32, #tpu.memory_space<vmem>>, %arg6: memref<2x8x32xf32, #tpu.memory_space<vmem>>, %arg7: memref<2x8x1xf32, #tpu.memory_space<vmem>>, %arg8: memref<2x8x64xbf16, #tpu.memory_space<vmem>>, %arg9: memref<2x8x1xf32, #tpu.memory_space<vmem>>, %arg10: memref<2x1x32xf32, #tpu.memory_space<vmem>>, %arg11: memref<1184x128xbf16, #tpu.memory_space<vmem>>, %arg12: memref<32x128xf32, #tpu.memory_space<vmem>>, %arg13: memref<2x1x1xf32, #tpu.memory_space<vmem>>) attributes {dimension_semantics = [#tpu.dimension_semantics<parallel>], iteration_bounds = array<i64: 2>, scalar_prefetch = 0 : i64, scratch_operands = 0 : i64, tpu.core_type = #tpu.core_type<tc>, window_params = [{transform_indices = @transform_0, window_bounds = array<i64: 2, 8, 64>}, {transform_indices = @transform_1, window_bounds = array<i64: 2, 8, 1>}, {transform_indices = @transform_2, window_bounds = array<i64: 2, 1, 32>}, {transform_indices = @transform_3, window_bounds = array<i64: 2, 64, 64>}, {transform_indices = @transform_4, window_bounds = array<i64: 2, 64, 1>}, {transform_indices = @transform_5, window_bounds = array<i64: 2, 8, 32>}, {transform_indices = @transform_6, window_bounds = array<i64: 2, 8, 1>}, {transform_indices = @transform_7, window_bounds = array<i64: 2, 8, 64>}, {transform_indices = @transform_8, window_bounds = array<i64: 2, 8, 1>}, {transform_indices = @transform_9, window_bounds = array<i64: 2, 1, 32>}, {pipeline_mode = #tpu.pipeline_mode<synchronous>, transform_indices = @transform_10, window_bounds = array<i64: 1184, 128>}, {pipeline_mode = #tpu.pipeline_mode<synchronous>, transform_indices = @transform_11, window_bounds = array<i64: 32, 128>}, {transform_indices = @transform_12, window_bounds = array<i64: 2, 1, 1>}]} {
    %c0 = arith.constant 0 : index
    %c0_0 = arith.constant 0 : index
    %c0_1 = arith.constant 0 : index
    %0 = vector.load %arg1[%c0, %c0_0, %c0_1] : memref<2x8x64xbf16, #tpu.memory_space<vmem>>, vector<2x8x64xbf16>
    %1 = vector.shape_cast %0 : vector<2x8x64xbf16> to vector<16x64xbf16>
    %c0_2 = arith.constant 0 : index
    %c0_3 = arith.constant 0 : index
    %c0_4 = arith.constant 0 : index
    %2 = vector.load %arg2[%c0_2, %c0_3, %c0_4] : memref<2x8x1xf32, #tpu.memory_space<vmem>>, vector<2x8x1xf32>
    %c0_5 = arith.constant 0 : index
    %c0_6 = arith.constant 0 : index
    %c0_7 = arith.constant 0 : index
    %3 = vector.load %arg3[%c0_5, %c0_6, %c0_7] : memref<2x1x32xf32, #tpu.memory_space<vmem>>, vector<2x1x32xf32>
    %4 = vector.broadcast %2 : vector<2x8x1xf32> to vector<2x8x32xf32>
    %5 = vector.broadcast %3 : vector<2x1x32xf32> to vector<2x8x32xf32>
    %6 = arith.mulf %4, %5 : vector<2x8x32xf32>
    %7 = vector.shape_cast %6 : vector<2x8x32xf32> to vector<16x32xf32>
    %c0_8 = arith.constant 0 : index
    %c0_9 = arith.constant 0 : index
    %8 = vector.load %arg11[%c0_8, %c0_9] : memref<1184x128xbf16, #tpu.memory_space<vmem>>, vector<64x64xbf16>
    %cst = arith.constant dense<0.000000e+00> : vector<16x64xf32>
    %9 = tpu.matmul %1, %8, %cst {dimension_numbers = #tpu.dot_dimension_numbers<[1], [0], [0], [1], [0, 0, 1, 1], [], []>} : vector<16x64xbf16>, vector<64x64xbf16>, vector<16x64xf32> -> vector<16x64xf32>
    %c0_10 = arith.constant 0 : index
    %c0_11 = arith.constant 0 : index
    %10 = vector.load %arg12[%c0_10, %c0_11] : memref<32x128xf32, #tpu.memory_space<vmem>>, vector<1x64xf32>
    %11 = vector.broadcast %10 : vector<1x64xf32> to vector<16x64xf32>
    %12 = arith.addf %9, %11 : vector<16x64xf32>
    %cst_12 = arith.constant 0.000000e+00 : f32
    %13 = vector.broadcast %cst_12 : f32 to vector<16x64xf32>
    %14 = arith.cmpf ogt, %12, %13 : vector<16x64xf32>
    %cst_13 = arith.constant 2.000000e-01 : f32
    %15 = vector.broadcast %cst_13 : f32 to vector<16x64xf32>
    %16 = arith.mulf %15, %12 : vector<16x64xf32>
    %17 = arith.select %14, %12, %16 : vector<16x64xi1>, vector<16x64xf32>
    %18 = arith.truncf %17 : vector<16x64xf32> to vector<16x64xbf16>
    %c64 = arith.constant 64 : index
    %c0_14 = arith.constant 0 : index
    %19 = vector.load %arg11[%c64, %c0_14] : memref<1184x128xbf16, #tpu.memory_space<vmem>>, vector<64x128xbf16>
    %cst_15 = arith.constant dense<0.000000e+00> : vector<16x128xf32>
    %20 = tpu.matmul %18, %19, %cst_15 {dimension_numbers = #tpu.dot_dimension_numbers<[1], [0], [0], [1], [0, 0, 1, 1], [], []>} : vector<16x64xbf16>, vector<64x128xbf16>, vector<16x128xf32> -> vector<16x128xf32>
    %c1 = arith.constant 1 : index
    %c0_16 = arith.constant 0 : index
    %21 = vector.load %arg12[%c1, %c0_16] : memref<32x128xf32, #tpu.memory_space<vmem>>, vector<1x128xf32>
    %22 = vector.broadcast %21 : vector<1x128xf32> to vector<16x128xf32>
    %23 = arith.addf %20, %22 : vector<16x128xf32>
    %24 = vector.extract_strided_slice %23 {offsets = [0, 64], sizes = [16, 64], strides = [1, 1]} : vector<16x128xf32> to vector<16x64xf32>
    %25 = arith.truncf %7 : vector<16x32xf32> to vector<16x32xbf16>
    %c128 = arith.constant 128 : index
    %c0_17 = arith.constant 0 : index
    %26 = vector.load %arg11[%c128, %c0_17] : memref<1184x128xbf16, #tpu.memory_space<vmem>>, vector<32x64xbf16>
    %cst_18 = arith.constant dense<0.000000e+00> : vector<16x64xf32>
    %27 = tpu.matmul %25, %26, %cst_18 {dimension_numbers = #tpu.dot_dimension_numbers<[1], [0], [0], [1], [0, 0, 1, 1], [], []>} : vector<16x32xbf16>, vector<32x64xbf16>, vector<16x64xf32> -> vector<16x64xf32>
    %28 = arith.addf %24, %27 : vector<16x64xf32>
    %cst_19 = arith.constant 0.000000e+00 : f32
    %29 = vector.broadcast %cst_19 : f32 to vector<16x64xf32>
    %30 = arith.cmpf ogt, %28, %29 : vector<16x64xf32>
    %cst_20 = arith.constant 2.000000e-01 : f32
    %31 = vector.broadcast %cst_20 : f32 to vector<16x64xf32>
    %32 = arith.mulf %31, %28 : vector<16x64xf32>
    %33 = arith.select %30, %28, %32 : vector<16x64xi1>, vector<16x64xf32>
    %34 = vector.extract_strided_slice %33 {offsets = [0, 0], sizes = [16, 32], strides = [1, 1]} : vector<16x64xf32> to vector<16x32xf32>
    %c3 = arith.constant 3 : index
    %c0_21 = arith.constant 0 : index
    %35 = vector.load %arg12[%c3, %c0_21] : memref<32x128xf32, #tpu.memory_space<vmem>>, vector<1x32xf32>
    %36 = vector.broadcast %35 : vector<1x32xf32> to vector<16x32xf32>
    %37 = arith.mulf %34, %36 : vector<16x32xf32>
    %cst_22 = arith.constant dense<0.000000e+00> : vector<16xf32>
    %38 = vector.multi_reduction <add>, %37, %cst_22 [1] : vector<16x32xf32> to vector<16xf32>
    %39 = vector.shape_cast %38 : vector<16xf32> to vector<16x1xf32>
    %c4 = arith.constant 4 : index
    %c0_23 = arith.constant 0 : index
    %40 = vector.load %arg12[%c4, %c0_23] : memref<32x128xf32, #tpu.memory_space<vmem>>, vector<1x1xf32>
    %41 = vector.broadcast %40 : vector<1x1xf32> to vector<16x1xf32>
    %42 = arith.addf %39, %41 : vector<16x1xf32>
    %43 = vector.extract_strided_slice %33 {offsets = [0, 32], sizes = [16, 32], strides = [1, 1]} : vector<16x64xf32> to vector<16x32xf32>
    %c5 = arith.constant 5 : index
    %c0_24 = arith.constant 0 : index
    %44 = vector.load %arg12[%c5, %c0_24] : memref<32x128xf32, #tpu.memory_space<vmem>>, vector<1x32xf32>
    %45 = vector.broadcast %44 : vector<1x32xf32> to vector<16x32xf32>
    %46 = arith.mulf %43, %45 : vector<16x32xf32>
    %cst_25 = arith.constant dense<0.000000e+00> : vector<16xf32>
    %47 = vector.multi_reduction <add>, %46, %cst_25 [1] : vector<16x32xf32> to vector<16xf32>
    %48 = vector.shape_cast %47 : vector<16xf32> to vector<16x1xf32>
    %c6 = arith.constant 6 : index
    %c0_26 = arith.constant 0 : index
    %49 = vector.load %arg12[%c6, %c0_26] : memref<32x128xf32, #tpu.memory_space<vmem>>, vector<1x1xf32>
    %50 = vector.broadcast %49 : vector<1x1xf32> to vector<16x1xf32>
    %51 = arith.addf %48, %50 : vector<16x1xf32>
    %52 = vector.shape_cast %42 : vector<16x1xf32> to vector<2x8x1xf32>
    %53 = vector.extract_strided_slice %23 {offsets = [0, 0], sizes = [16, 32], strides = [1, 1]} : vector<16x128xf32> to vector<16x32xf32>
    %54 = vector.shape_cast %53 : vector<16x32xf32> to vector<2x8x32xf32>
    %55 = math.exp %52 : vector<2x8x1xf32>
    %56 = arith.mulf %55, %2 : vector<2x8x1xf32>
    %57 = vector.broadcast %56 : vector<2x8x1xf32> to vector<2x8x32xf32>
    %58 = arith.mulf %57, %54 : vector<2x8x32xf32>
    %cst_27 = arith.constant dense<0.000000e+00> : vector<2x32xf32>
    %59 = vector.multi_reduction <add>, %58, %cst_27 [1] : vector<2x8x32xf32> to vector<2x32xf32>
    %cst_28 = arith.constant dense<0.000000e+00> : vector<2x1xf32>
    %60 = vector.multi_reduction <add>, %56, %cst_28 [1] : vector<2x8x1xf32> to vector<2x1xf32>
    %cst_29 = arith.constant 1.000000e-10 : f32
    %61 = vector.broadcast %cst_29 : f32 to vector<2x1xf32>
    %62 = arith.addf %60, %61 : vector<2x1xf32>
    %63 = tpu.reciprocal %62 : vector<2x1xf32> -> vector<2x1xf32>
    %64 = vector.broadcast %63 : vector<2x1xf32> to vector<2x32xf32>
    %65 = arith.mulf %59, %64 : vector<2x32xf32>
    %66 = vector.shape_cast %51 : vector<16x1xf32> to vector<2x8x1xf32>
    %67 = vector.extract_strided_slice %23 {offsets = [0, 32], sizes = [16, 32], strides = [1, 1]} : vector<16x128xf32> to vector<16x32xf32>
    %68 = vector.shape_cast %67 : vector<16x32xf32> to vector<2x8x32xf32>
    %69 = math.exp %66 : vector<2x8x1xf32>
    %70 = arith.mulf %69, %2 : vector<2x8x1xf32>
    %71 = vector.broadcast %70 : vector<2x8x1xf32> to vector<2x8x32xf32>
    %72 = arith.mulf %71, %68 : vector<2x8x32xf32>
    %cst_30 = arith.constant dense<0.000000e+00> : vector<2x32xf32>
    %73 = vector.multi_reduction <add>, %72, %cst_30 [1] : vector<2x8x32xf32> to vector<2x32xf32>
    %cst_31 = arith.constant dense<0.000000e+00> : vector<2x1xf32>
    %74 = vector.multi_reduction <add>, %70, %cst_31 [1] : vector<2x8x1xf32> to vector<2x1xf32>
    %cst_32 = arith.constant 1.000000e-10 : f32
    %75 = vector.broadcast %cst_32 : f32 to vector<2x1xf32>
    %76 = arith.addf %74, %75 : vector<2x1xf32>
    %77 = tpu.reciprocal %76 : vector<2x1xf32> -> vector<2x1xf32>
    %78 = vector.broadcast %77 : vector<2x1xf32> to vector<2x32xf32>
    %79 = arith.mulf %73, %78 : vector<2x32xf32>
    %80 = tpu.concatenate %65, %79 in 1 : vector<2x32xf32>, vector<2x32xf32> -> vector<2x64xf32>
    %81 = arith.truncf %80 : vector<2x64xf32> to vector<2x64xbf16>
    %c160 = arith.constant 160 : index
    %c0_33 = arith.constant 0 : index
    %82 = vector.load %arg11[%c160, %c0_33] : memref<1184x128xbf16, #tpu.memory_space<vmem>>, vector<64x64xbf16>
    %cst_34 = arith.constant dense<0.000000e+00> : vector<2x64xf32>
    %83 = tpu.matmul %81, %82, %cst_34 {dimension_numbers = #tpu.dot_dimension_numbers<[1], [0], [0], [1], [0, 0, 1, 1], [], []>} : vector<2x64xbf16>, vector<64x64xbf16>, vector<2x64xf32> -> vector<2x64xf32>
    %c2 = arith.constant 2 : index
    %c0_35 = arith.constant 0 : index
    %84 = vector.load %arg12[%c2, %c0_35] : memref<32x128xf32, #tpu.memory_space<vmem>>, vector<1x64xf32>
    %85 = vector.broadcast %84 : vector<1x64xf32> to vector<2x64xf32>
    %86 = arith.addf %83, %85 : vector<2x64xf32>
    %cst_36 = arith.constant 0.000000e+00 : f32
    %87 = vector.broadcast %cst_36 : f32 to vector<2x64xf32>
    %88 = arith.maximumf %86, %87 : vector<2x64xf32>
    %89 = vector.extract_strided_slice %88 {offsets = [0, 0], sizes = [2, 32], strides = [1, 1]} : vector<2x64xf32> to vector<2x32xf32>
    %90 = vector.extract_strided_slice %88 {offsets = [0, 32], sizes = [2, 32], strides = [1, 1]} : vector<2x64xf32> to vector<2x32xf32>
    %c0_37 = arith.constant 0 : index
    %c0_38 = arith.constant 0 : index
    %c0_39 = arith.constant 0 : index
    %91 = vector.load %arg4[%c0_37, %c0_38, %c0_39] : memref<2x64x64xbf16, #tpu.memory_space<vmem>>, vector<2x64x64xbf16>
    %92 = vector.shape_cast %91 : vector<2x64x64xbf16> to vector<128x64xbf16>
    %c0_40 = arith.constant 0 : index
    %c0_41 = arith.constant 0 : index
    %c0_42 = arith.constant 0 : index
    %93 = vector.load %arg5[%c0_40, %c0_41, %c0_42] : memref<2x64x1xf32, #tpu.memory_space<vmem>>, vector<2x64x1xf32>
    %94 = vector.shape_cast %93 : vector<2x64x1xf32> to vector<2x8x8x1xf32>
    %c0_43 = arith.constant 0 : index
    %c0_44 = arith.constant 0 : index
    %c0_45 = arith.constant 0 : index
    %95 = vector.load %arg6[%c0_43, %c0_44, %c0_45] : memref<2x8x32xf32, #tpu.memory_space<vmem>>, vector<2x8x32xf32>
    %96 = vector.shape_cast %95 : vector<2x8x32xf32> to vector<2x8x1x32xf32>
    %97 = vector.broadcast %94 : vector<2x8x8x1xf32> to vector<2x8x8x32xf32>
    %98 = vector.broadcast %96 : vector<2x8x1x32xf32> to vector<2x8x8x32xf32>
    %99 = arith.mulf %97, %98 : vector<2x8x8x32xf32>
    %100 = vector.shape_cast %99 : vector<2x8x8x32xf32> to vector<128x32xf32>
    %c224 = arith.constant 224 : index
    %c0_46 = arith.constant 0 : index
    %101 = vector.load %arg11[%c224, %c0_46] : memref<1184x128xbf16, #tpu.memory_space<vmem>>, vector<64x32xbf16>
    %cst_47 = arith.constant dense<0.000000e+00> : vector<128x32xf32>
    %102 = tpu.matmul %92, %101, %cst_47 {dimension_numbers = #tpu.dot_dimension_numbers<[1], [0], [0], [1], [0, 0, 1, 1], [], []>} : vector<128x64xbf16>, vector<64x32xbf16>, vector<128x32xf32> -> vector<128x32xf32>
    %c7 = arith.constant 7 : index
    %c0_48 = arith.constant 0 : index
    %103 = vector.load %arg12[%c7, %c0_48] : memref<32x128xf32, #tpu.memory_space<vmem>>, vector<1x32xf32>
    %104 = vector.broadcast %103 : vector<1x32xf32> to vector<128x32xf32>
    %105 = arith.addf %102, %104 : vector<128x32xf32>
    %cst_49 = arith.constant 0.000000e+00 : f32
    %106 = vector.broadcast %cst_49 : f32 to vector<128x32xf32>
    %107 = arith.cmpf ogt, %105, %106 : vector<128x32xf32>
    %cst_50 = arith.constant 2.000000e-01 : f32
    %108 = vector.broadcast %cst_50 : f32 to vector<128x32xf32>
    %109 = arith.mulf %108, %105 : vector<128x32xf32>
    %110 = arith.select %107, %105, %109 : vector<128x32xi1>, vector<128x32xf32>
    %111 = arith.truncf %110 : vector<128x32xf32> to vector<128x32xbf16>
    %c288 = arith.constant 288 : index
    %c0_51 = arith.constant 0 : index
    %112 = vector.load %arg11[%c288, %c0_51] : memref<1184x128xbf16, #tpu.memory_space<vmem>>, vector<32x64xbf16>
    %cst_52 = arith.constant dense<0.000000e+00> : vector<128x64xf32>
    %113 = tpu.matmul %111, %112, %cst_52 {dimension_numbers = #tpu.dot_dimension_numbers<[1], [0], [0], [1], [0, 0, 1, 1], [], []>} : vector<128x32xbf16>, vector<32x64xbf16>, vector<128x64xf32> -> vector<128x64xf32>
    %c8 = arith.constant 8 : index
    %c0_53 = arith.constant 0 : index
    %114 = vector.load %arg12[%c8, %c0_53] : memref<32x128xf32, #tpu.memory_space<vmem>>, vector<1x64xf32>
    %115 = vector.broadcast %114 : vector<1x64xf32> to vector<128x64xf32>
    %116 = arith.addf %113, %115 : vector<128x64xf32>
    %117 = vector.extract_strided_slice %116 {offsets = [0, 32], sizes = [128, 32], strides = [1, 1]} : vector<128x64xf32> to vector<128x32xf32>
    %118 = arith.truncf %100 : vector<128x32xf32> to vector<128x32xbf16>
    %c320 = arith.constant 320 : index
    %c0_54 = arith.constant 0 : index
    %119 = vector.load %arg11[%c320, %c0_54] : memref<1184x128xbf16, #tpu.memory_space<vmem>>, vector<32x32xbf16>
    %cst_55 = arith.constant dense<0.000000e+00> : vector<128x32xf32>
    %120 = tpu.matmul %118, %119, %cst_55 {dimension_numbers = #tpu.dot_dimension_numbers<[1], [0], [0], [1], [0, 0, 1, 1], [], []>} : vector<128x32xbf16>, vector<32x32xbf16>, vector<128x32xf32> -> vector<128x32xf32>
    %121 = arith.addf %117, %120 : vector<128x32xf32>
    %cst_56 = arith.constant 0.000000e+00 : f32
    %122 = vector.broadcast %cst_56 : f32 to vector<128x32xf32>
    %123 = arith.cmpf ogt, %121, %122 : vector<128x32xf32>
    %cst_57 = arith.constant 2.000000e-01 : f32
    %124 = vector.broadcast %cst_57 : f32 to vector<128x32xf32>
    %125 = arith.mulf %124, %121 : vector<128x32xf32>
    %126 = arith.select %123, %121, %125 : vector<128x32xi1>, vector<128x32xf32>
    %c10 = arith.constant 10 : index
    %c0_58 = arith.constant 0 : index
    %127 = vector.load %arg12[%c10, %c0_58] : memref<32x128xf32, #tpu.memory_space<vmem>>, vector<1x32xf32>
    %128 = vector.broadcast %127 : vector<1x32xf32> to vector<128x32xf32>
    %129 = arith.mulf %126, %128 : vector<128x32xf32>
    %cst_59 = arith.constant dense<0.000000e+00> : vector<128xf32>
    %130 = vector.multi_reduction <add>, %129, %cst_59 [1] : vector<128x32xf32> to vector<128xf32>
    %131 = vector.shape_cast %130 : vector<128xf32> to vector<128x1xf32>
    %c11 = arith.constant 11 : index
    %c0_60 = arith.constant 0 : index
    %132 = vector.load %arg12[%c11, %c0_60] : memref<32x128xf32, #tpu.memory_space<vmem>>, vector<1x1xf32>
    %133 = vector.broadcast %132 : vector<1x1xf32> to vector<128x1xf32>
    %134 = arith.addf %131, %133 : vector<128x1xf32>
    %135 = vector.shape_cast %134 : vector<128x1xf32> to vector<16x8x1xf32>
    %136 = vector.shape_cast %93 : vector<2x64x1xf32> to vector<16x8x1xf32>
    %137 = vector.extract_strided_slice %116 {offsets = [0, 0], sizes = [128, 32], strides = [1, 1]} : vector<128x64xf32> to vector<128x32xf32>
    %138 = vector.shape_cast %137 : vector<128x32xf32> to vector<16x8x32xf32>
    %139 = math.exp %135 : vector<16x8x1xf32>
    %140 = arith.mulf %139, %136 : vector<16x8x1xf32>
    %141 = vector.broadcast %140 : vector<16x8x1xf32> to vector<16x8x32xf32>
    %142 = arith.mulf %141, %138 : vector<16x8x32xf32>
    %cst_61 = arith.constant dense<0.000000e+00> : vector<16x32xf32>
    %143 = vector.multi_reduction <add>, %142, %cst_61 [1] : vector<16x8x32xf32> to vector<16x32xf32>
    %cst_62 = arith.constant dense<0.000000e+00> : vector<16x1xf32>
    %144 = vector.multi_reduction <add>, %140, %cst_62 [1] : vector<16x8x1xf32> to vector<16x1xf32>
    %cst_63 = arith.constant 1.000000e-10 : f32
    %145 = vector.broadcast %cst_63 : f32 to vector<16x1xf32>
    %146 = arith.addf %144, %145 : vector<16x1xf32>
    %147 = tpu.reciprocal %146 : vector<16x1xf32> -> vector<16x1xf32>
    %148 = vector.broadcast %147 : vector<16x1xf32> to vector<16x32xf32>
    %149 = arith.mulf %143, %148 : vector<16x32xf32>
    %150 = arith.truncf %149 : vector<16x32xf32> to vector<16x32xbf16>
    %c352 = arith.constant 352 : index
    %c0_64 = arith.constant 0 : index
    %151 = vector.load %arg11[%c352, %c0_64] : memref<1184x128xbf16, #tpu.memory_space<vmem>>, vector<32x32xbf16>
    %cst_65 = arith.constant dense<0.000000e+00> : vector<16x32xf32>
    %152 = tpu.matmul %150, %151, %cst_65 {dimension_numbers = #tpu.dot_dimension_numbers<[1], [0], [0], [1], [0, 0, 1, 1], [], []>} : vector<16x32xbf16>, vector<32x32xbf16>, vector<16x32xf32> -> vector<16x32xf32>
    %c9 = arith.constant 9 : index
    %c0_66 = arith.constant 0 : index
    %153 = vector.load %arg12[%c9, %c0_66] : memref<32x128xf32, #tpu.memory_space<vmem>>, vector<1x32xf32>
    %154 = vector.broadcast %153 : vector<1x32xf32> to vector<16x32xf32>
    %155 = arith.addf %152, %154 : vector<16x32xf32>
    %cst_67 = arith.constant 0.000000e+00 : f32
    %156 = vector.broadcast %cst_67 : f32 to vector<16x32xf32>
    %157 = arith.maximumf %155, %156 : vector<16x32xf32>
    %158 = arith.truncf %157 : vector<16x32xf32> to vector<16x32xbf16>
    %c384 = arith.constant 384 : index
    %c0_68 = arith.constant 0 : index
    %159 = vector.load %arg11[%c384, %c0_68] : memref<1184x128xbf16, #tpu.memory_space<vmem>>, vector<32x32xbf16>
    %cst_69 = arith.constant dense<0.000000e+00> : vector<16x32xf32>
    %160 = tpu.matmul %158, %159, %cst_69 {dimension_numbers = #tpu.dot_dimension_numbers<[1], [0], [0], [1], [0, 0, 1, 1], [], []>} : vector<16x32xbf16>, vector<32x32xbf16>, vector<16x32xf32> -> vector<16x32xf32>
    %c12 = arith.constant 12 : index
    %c0_70 = arith.constant 0 : index
    %161 = vector.load %arg12[%c12, %c0_70] : memref<32x128xf32, #tpu.memory_space<vmem>>, vector<1x32xf32>
    %162 = vector.broadcast %161 : vector<1x32xf32> to vector<16x32xf32>
    %163 = arith.addf %160, %162 : vector<16x32xf32>
    %164 = arith.truncf %7 : vector<16x32xf32> to vector<16x32xbf16>
    %c416 = arith.constant 416 : index
    %c0_71 = arith.constant 0 : index
    %165 = vector.load %arg11[%c416, %c0_71] : memref<1184x128xbf16, #tpu.memory_space<vmem>>, vector<32x32xbf16>
    %cst_72 = arith.constant dense<0.000000e+00> : vector<16x32xf32>
    %166 = tpu.matmul %164, %165, %cst_72 {dimension_numbers = #tpu.dot_dimension_numbers<[1], [0], [0], [1], [0, 0, 1, 1], [], []>} : vector<16x32xbf16>, vector<32x32xbf16>, vector<16x32xf32> -> vector<16x32xf32>
    %167 = arith.addf %163, %166 : vector<16x32xf32>
    %cst_73 = arith.constant 0.000000e+00 : f32
    %168 = vector.broadcast %cst_73 : f32 to vector<16x32xf32>
    %169 = arith.cmpf ogt, %167, %168 : vector<16x32xf32>
    %cst_74 = arith.constant 2.000000e-01 : f32
    %170 = vector.broadcast %cst_74 : f32 to vector<16x32xf32>
    %171 = arith.mulf %170, %167 : vector<16x32xf32>
    %172 = arith.select %169, %167, %171 : vector<16x32xi1>, vector<16x32xf32>
    %c14 = arith.constant 14 : index
    %c0_75 = arith.constant 0 : index
    %173 = vector.load %arg12[%c14, %c0_75] : memref<32x128xf32, #tpu.memory_space<vmem>>, vector<1x32xf32>
    %174 = vector.broadcast %173 : vector<1x32xf32> to vector<16x32xf32>
    %175 = arith.mulf %172, %174 : vector<16x32xf32>
    %cst_76 = arith.constant dense<0.000000e+00> : vector<16xf32>
    %176 = vector.multi_reduction <add>, %175, %cst_76 [1] : vector<16x32xf32> to vector<16xf32>
    %177 = vector.shape_cast %176 : vector<16xf32> to vector<16x1xf32>
    %c15 = arith.constant 15 : index
    %c0_77 = arith.constant 0 : index
    %178 = vector.load %arg12[%c15, %c0_77] : memref<32x128xf32, #tpu.memory_space<vmem>>, vector<1x1xf32>
    %179 = vector.broadcast %178 : vector<1x1xf32> to vector<16x1xf32>
    %180 = arith.addf %177, %179 : vector<16x1xf32>
    %181 = vector.shape_cast %180 : vector<16x1xf32> to vector<2x8x1xf32>
    %c0_78 = arith.constant 0 : index
    %c0_79 = arith.constant 0 : index
    %c0_80 = arith.constant 0 : index
    %182 = vector.load %arg7[%c0_78, %c0_79, %c0_80] : memref<2x8x1xf32, #tpu.memory_space<vmem>>, vector<2x8x1xf32>
    %183 = vector.shape_cast %157 : vector<16x32xf32> to vector<2x8x32xf32>
    %184 = math.exp %181 : vector<2x8x1xf32>
    %185 = arith.mulf %184, %182 : vector<2x8x1xf32>
    %186 = vector.broadcast %185 : vector<2x8x1xf32> to vector<2x8x32xf32>
    %187 = arith.mulf %186, %183 : vector<2x8x32xf32>
    %cst_81 = arith.constant dense<0.000000e+00> : vector<2x32xf32>
    %188 = vector.multi_reduction <add>, %187, %cst_81 [1] : vector<2x8x32xf32> to vector<2x32xf32>
    %cst_82 = arith.constant dense<0.000000e+00> : vector<2x1xf32>
    %189 = vector.multi_reduction <add>, %185, %cst_82 [1] : vector<2x8x1xf32> to vector<2x1xf32>
    %cst_83 = arith.constant 1.000000e-10 : f32
    %190 = vector.broadcast %cst_83 : f32 to vector<2x1xf32>
    %191 = arith.addf %189, %190 : vector<2x1xf32>
    %192 = tpu.reciprocal %191 : vector<2x1xf32> -> vector<2x1xf32>
    %193 = vector.broadcast %192 : vector<2x1xf32> to vector<2x32xf32>
    %194 = arith.mulf %188, %193 : vector<2x32xf32>
    %195 = arith.truncf %194 : vector<2x32xf32> to vector<2x32xbf16>
    %c448 = arith.constant 448 : index
    %c0_84 = arith.constant 0 : index
    %196 = vector.load %arg11[%c448, %c0_84] : memref<1184x128xbf16, #tpu.memory_space<vmem>>, vector<32x32xbf16>
    %cst_85 = arith.constant dense<0.000000e+00> : vector<2x32xf32>
    %197 = tpu.matmul %195, %196, %cst_85 {dimension_numbers = #tpu.dot_dimension_numbers<[1], [0], [0], [1], [0, 0, 1, 1], [], []>} : vector<2x32xbf16>, vector<32x32xbf16>, vector<2x32xf32> -> vector<2x32xf32>
    %c13 = arith.constant 13 : index
    %c0_86 = arith.constant 0 : index
    %198 = vector.load %arg12[%c13, %c0_86] : memref<32x128xf32, #tpu.memory_space<vmem>>, vector<1x32xf32>
    %199 = vector.broadcast %198 : vector<1x32xf32> to vector<2x32xf32>
    %200 = arith.addf %197, %199 : vector<2x32xf32>
    %cst_87 = arith.constant 0.000000e+00 : f32
    %201 = vector.broadcast %cst_87 : f32 to vector<2x32xf32>
    %202 = arith.maximumf %200, %201 : vector<2x32xf32>
    %203 = arith.mulf %89, %202 : vector<2x32xf32>
    %204 = tpu.concatenate %203, %89, %202 in 1 : vector<2x32xf32>, vector<2x32xf32>, vector<2x32xf32> -> vector<2x96xf32>
    %205 = arith.truncf %204 : vector<2x96xf32> to vector<2x96xbf16>
    %c672 = arith.constant 672 : index
    %c0_88 = arith.constant 0 : index
    %206 = vector.load %arg11[%c672, %c0_88] : memref<1184x128xbf16, #tpu.memory_space<vmem>>, vector<96x64xbf16>
    %cst_89 = arith.constant dense<0.000000e+00> : vector<2x64xf32>
    %207 = tpu.matmul %205, %206, %cst_89 {dimension_numbers = #tpu.dot_dimension_numbers<[1], [0], [0], [1], [0, 0, 1, 1], [], []>} : vector<2x96xbf16>, vector<96x64xbf16>, vector<2x64xf32> -> vector<2x64xf32>
    %c22 = arith.constant 22 : index
    %c0_90 = arith.constant 0 : index
    %208 = vector.load %arg12[%c22, %c0_90] : memref<32x128xf32, #tpu.memory_space<vmem>>, vector<1x64xf32>
    %209 = vector.broadcast %208 : vector<1x64xf32> to vector<2x64xf32>
    %210 = arith.addf %207, %209 : vector<2x64xf32>
    %cst_91 = arith.constant 0.000000e+00 : f32
    %211 = vector.broadcast %cst_91 : f32 to vector<2x64xf32>
    %212 = arith.maximumf %210, %211 : vector<2x64xf32>
    %213 = arith.truncf %212 : vector<2x64xf32> to vector<2x64xbf16>
    %c768 = arith.constant 768 : index
    %c0_92 = arith.constant 0 : index
    %214 = vector.load %arg11[%c768, %c0_92] : memref<1184x128xbf16, #tpu.memory_space<vmem>>, vector<64x32xbf16>
    %cst_93 = arith.constant dense<0.000000e+00> : vector<2x32xf32>
    %215 = tpu.matmul %213, %214, %cst_93 {dimension_numbers = #tpu.dot_dimension_numbers<[1], [0], [0], [1], [0, 0, 1, 1], [], []>} : vector<2x64xbf16>, vector<64x32xbf16>, vector<2x32xf32> -> vector<2x32xf32>
    %c23 = arith.constant 23 : index
    %c0_94 = arith.constant 0 : index
    %216 = vector.load %arg12[%c23, %c0_94] : memref<32x128xf32, #tpu.memory_space<vmem>>, vector<1x32xf32>
    %217 = vector.broadcast %216 : vector<1x32xf32> to vector<2x32xf32>
    %218 = arith.addf %215, %217 : vector<2x32xf32>
    %cst_95 = arith.constant 0.000000e+00 : f32
    %219 = vector.broadcast %cst_95 : f32 to vector<2x32xf32>
    %220 = arith.maximumf %218, %219 : vector<2x32xf32>
    %221 = arith.truncf %220 : vector<2x32xf32> to vector<2x32xbf16>
    %c832 = arith.constant 832 : index
    %c0_96 = arith.constant 0 : index
    %222 = vector.load %arg11[%c832, %c0_96] : memref<1184x128xbf16, #tpu.memory_space<vmem>>, vector<32x32xbf16>
    %cst_97 = arith.constant dense<0.000000e+00> : vector<2x32xf32>
    %223 = tpu.matmul %221, %222, %cst_97 {dimension_numbers = #tpu.dot_dimension_numbers<[1], [0], [0], [1], [0, 0, 1, 1], [], []>} : vector<2x32xbf16>, vector<32x32xbf16>, vector<2x32xf32> -> vector<2x32xf32>
    %c24 = arith.constant 24 : index
    %c0_98 = arith.constant 0 : index
    %224 = vector.load %arg12[%c24, %c0_98] : memref<32x128xf32, #tpu.memory_space<vmem>>, vector<1x32xf32>
    %225 = vector.broadcast %224 : vector<1x32xf32> to vector<2x32xf32>
    %226 = arith.addf %223, %225 : vector<2x32xf32>
    %c0_99 = arith.constant 0 : index
    %c0_100 = arith.constant 0 : index
    %c0_101 = arith.constant 0 : index
    %227 = vector.load %arg8[%c0_99, %c0_100, %c0_101] : memref<2x8x64xbf16, #tpu.memory_space<vmem>>, vector<2x8x64xbf16>
    %228 = vector.shape_cast %227 : vector<2x8x64xbf16> to vector<16x64xbf16>
    %c0_102 = arith.constant 0 : index
    %c0_103 = arith.constant 0 : index
    %c0_104 = arith.constant 0 : index
    %229 = vector.load %arg9[%c0_102, %c0_103, %c0_104] : memref<2x8x1xf32, #tpu.memory_space<vmem>>, vector<2x8x1xf32>
    %c0_105 = arith.constant 0 : index
    %c0_106 = arith.constant 0 : index
    %c0_107 = arith.constant 0 : index
    %230 = vector.load %arg10[%c0_105, %c0_106, %c0_107] : memref<2x1x32xf32, #tpu.memory_space<vmem>>, vector<2x1x32xf32>
    %231 = vector.broadcast %229 : vector<2x8x1xf32> to vector<2x8x32xf32>
    %232 = vector.broadcast %230 : vector<2x1x32xf32> to vector<2x8x32xf32>
    %233 = arith.mulf %231, %232 : vector<2x8x32xf32>
    %234 = vector.shape_cast %233 : vector<2x8x32xf32> to vector<16x32xf32>
    %c480 = arith.constant 480 : index
    %c0_108 = arith.constant 0 : index
    %235 = vector.load %arg11[%c480, %c0_108] : memref<1184x128xbf16, #tpu.memory_space<vmem>>, vector<64x32xbf16>
    %cst_109 = arith.constant dense<0.000000e+00> : vector<16x32xf32>
    %236 = tpu.matmul %228, %235, %cst_109 {dimension_numbers = #tpu.dot_dimension_numbers<[1], [0], [0], [1], [0, 0, 1, 1], [], []>} : vector<16x64xbf16>, vector<64x32xbf16>, vector<16x32xf32> -> vector<16x32xf32>
    %c16 = arith.constant 16 : index
    %c0_110 = arith.constant 0 : index
    %237 = vector.load %arg12[%c16, %c0_110] : memref<32x128xf32, #tpu.memory_space<vmem>>, vector<1x32xf32>
    %238 = vector.broadcast %237 : vector<1x32xf32> to vector<16x32xf32>
    %239 = arith.addf %236, %238 : vector<16x32xf32>
    %cst_111 = arith.constant 0.000000e+00 : f32
    %240 = vector.broadcast %cst_111 : f32 to vector<16x32xf32>
    %241 = arith.cmpf ogt, %239, %240 : vector<16x32xf32>
    %cst_112 = arith.constant 2.000000e-01 : f32
    %242 = vector.broadcast %cst_112 : f32 to vector<16x32xf32>
    %243 = arith.mulf %242, %239 : vector<16x32xf32>
    %244 = arith.select %241, %239, %243 : vector<16x32xi1>, vector<16x32xf32>
    %245 = arith.truncf %244 : vector<16x32xf32> to vector<16x32xbf16>
    %c544 = arith.constant 544 : index
    %c0_113 = arith.constant 0 : index
    %246 = vector.load %arg11[%c544, %c0_113] : memref<1184x128xbf16, #tpu.memory_space<vmem>>, vector<32x32xbf16>
    %cst_114 = arith.constant dense<0.000000e+00> : vector<16x32xf32>
    %247 = tpu.matmul %245, %246, %cst_114 {dimension_numbers = #tpu.dot_dimension_numbers<[1], [0], [0], [1], [0, 0, 1, 1], [], []>} : vector<16x32xbf16>, vector<32x32xbf16>, vector<16x32xf32> -> vector<16x32xf32>
    %c17 = arith.constant 17 : index
    %c0_115 = arith.constant 0 : index
    %248 = vector.load %arg12[%c17, %c0_115] : memref<32x128xf32, #tpu.memory_space<vmem>>, vector<1x32xf32>
    %249 = vector.broadcast %248 : vector<1x32xf32> to vector<16x32xf32>
    %250 = arith.addf %247, %249 : vector<16x32xf32>
    %251 = vector.extract_strided_slice %228 {offsets = [0, 0], sizes = [16, 32], strides = [1, 1]} : vector<16x64xbf16> to vector<16x32xbf16>
    %c576 = arith.constant 576 : index
    %c0_116 = arith.constant 0 : index
    %252 = vector.load %arg11[%c576, %c0_116] : memref<1184x128xbf16, #tpu.memory_space<vmem>>, vector<32x32xbf16>
    %cst_117 = arith.constant dense<0.000000e+00> : vector<16x32xf32>
    %253 = tpu.matmul %251, %252, %cst_117 {dimension_numbers = #tpu.dot_dimension_numbers<[1], [0], [0], [1], [0, 0, 1, 1], [], []>} : vector<16x32xbf16>, vector<32x32xbf16>, vector<16x32xf32> -> vector<16x32xf32>
    %c18 = arith.constant 18 : index
    %c0_118 = arith.constant 0 : index
    %254 = vector.load %arg12[%c18, %c0_118] : memref<32x128xf32, #tpu.memory_space<vmem>>, vector<1x32xf32>
    %255 = vector.broadcast %254 : vector<1x32xf32> to vector<16x32xf32>
    %256 = arith.addf %253, %255 : vector<16x32xf32>
    %257 = arith.truncf %234 : vector<16x32xf32> to vector<16x32xbf16>
    %c608 = arith.constant 608 : index
    %c0_119 = arith.constant 0 : index
    %258 = vector.load %arg11[%c608, %c0_119] : memref<1184x128xbf16, #tpu.memory_space<vmem>>, vector<32x32xbf16>
    %cst_120 = arith.constant dense<0.000000e+00> : vector<16x32xf32>
    %259 = tpu.matmul %257, %258, %cst_120 {dimension_numbers = #tpu.dot_dimension_numbers<[1], [0], [0], [1], [0, 0, 1, 1], [], []>} : vector<16x32xbf16>, vector<32x32xbf16>, vector<16x32xf32> -> vector<16x32xf32>
    %260 = arith.addf %256, %259 : vector<16x32xf32>
    %cst_121 = arith.constant 0.000000e+00 : f32
    %261 = vector.broadcast %cst_121 : f32 to vector<16x32xf32>
    %262 = arith.cmpf ogt, %260, %261 : vector<16x32xf32>
    %cst_122 = arith.constant 2.000000e-01 : f32
    %263 = vector.broadcast %cst_122 : f32 to vector<16x32xf32>
    %264 = arith.mulf %263, %260 : vector<16x32xf32>
    %265 = arith.select %262, %260, %264 : vector<16x32xi1>, vector<16x32xf32>
    %c20 = arith.constant 20 : index
    %c0_123 = arith.constant 0 : index
    %266 = vector.load %arg12[%c20, %c0_123] : memref<32x128xf32, #tpu.memory_space<vmem>>, vector<1x32xf32>
    %267 = vector.broadcast %266 : vector<1x32xf32> to vector<16x32xf32>
    %268 = arith.mulf %265, %267 : vector<16x32xf32>
    %cst_124 = arith.constant dense<0.000000e+00> : vector<16xf32>
    %269 = vector.multi_reduction <add>, %268, %cst_124 [1] : vector<16x32xf32> to vector<16xf32>
    %270 = vector.shape_cast %269 : vector<16xf32> to vector<16x1xf32>
    %c21 = arith.constant 21 : index
    %c0_125 = arith.constant 0 : index
    %271 = vector.load %arg12[%c21, %c0_125] : memref<32x128xf32, #tpu.memory_space<vmem>>, vector<1x1xf32>
    %272 = vector.broadcast %271 : vector<1x1xf32> to vector<16x1xf32>
    %273 = arith.addf %270, %272 : vector<16x1xf32>
    %274 = vector.shape_cast %273 : vector<16x1xf32> to vector<2x8x1xf32>
    %275 = vector.shape_cast %250 : vector<16x32xf32> to vector<2x8x32xf32>
    %276 = math.exp %274 : vector<2x8x1xf32>
    %277 = arith.mulf %276, %229 : vector<2x8x1xf32>
    %278 = vector.broadcast %277 : vector<2x8x1xf32> to vector<2x8x32xf32>
    %279 = arith.mulf %278, %275 : vector<2x8x32xf32>
    %cst_126 = arith.constant dense<0.000000e+00> : vector<2x32xf32>
    %280 = vector.multi_reduction <add>, %279, %cst_126 [1] : vector<2x8x32xf32> to vector<2x32xf32>
    %cst_127 = arith.constant dense<0.000000e+00> : vector<2x1xf32>
    %281 = vector.multi_reduction <add>, %277, %cst_127 [1] : vector<2x8x1xf32> to vector<2x1xf32>
    %cst_128 = arith.constant 1.000000e-10 : f32
    %282 = vector.broadcast %cst_128 : f32 to vector<2x1xf32>
    %283 = arith.addf %281, %282 : vector<2x1xf32>
    %284 = tpu.reciprocal %283 : vector<2x1xf32> -> vector<2x1xf32>
    %285 = vector.broadcast %284 : vector<2x1xf32> to vector<2x32xf32>
    %286 = arith.mulf %280, %285 : vector<2x32xf32>
    %287 = arith.truncf %286 : vector<2x32xf32> to vector<2x32xbf16>
    %c640 = arith.constant 640 : index
    %c0_129 = arith.constant 0 : index
    %288 = vector.load %arg11[%c640, %c0_129] : memref<1184x128xbf16, #tpu.memory_space<vmem>>, vector<32x32xbf16>
    %cst_130 = arith.constant dense<0.000000e+00> : vector<2x32xf32>
    %289 = tpu.matmul %287, %288, %cst_130 {dimension_numbers = #tpu.dot_dimension_numbers<[1], [0], [0], [1], [0, 0, 1, 1], [], []>} : vector<2x32xbf16>, vector<32x32xbf16>, vector<2x32xf32> -> vector<2x32xf32>
    %c19 = arith.constant 19 : index
    %c0_131 = arith.constant 0 : index
    %290 = vector.load %arg12[%c19, %c0_131] : memref<32x128xf32, #tpu.memory_space<vmem>>, vector<1x32xf32>
    %291 = vector.broadcast %290 : vector<1x32xf32> to vector<2x32xf32>
    %292 = arith.addf %289, %291 : vector<2x32xf32>
    %cst_132 = arith.constant 0.000000e+00 : f32
    %293 = vector.broadcast %cst_132 : f32 to vector<2x32xf32>
    %294 = arith.maximumf %292, %293 : vector<2x32xf32>
    %295 = arith.mulf %294, %90 : vector<2x32xf32>
    %296 = tpu.concatenate %295, %294, %90 in 1 : vector<2x32xf32>, vector<2x32xf32>, vector<2x32xf32> -> vector<2x96xf32>
    %297 = arith.truncf %296 : vector<2x96xf32> to vector<2x96xbf16>
    %c864 = arith.constant 864 : index
    %c0_133 = arith.constant 0 : index
    %298 = vector.load %arg11[%c864, %c0_133] : memref<1184x128xbf16, #tpu.memory_space<vmem>>, vector<96x64xbf16>
    %cst_134 = arith.constant dense<0.000000e+00> : vector<2x64xf32>
    %299 = tpu.matmul %297, %298, %cst_134 {dimension_numbers = #tpu.dot_dimension_numbers<[1], [0], [0], [1], [0, 0, 1, 1], [], []>} : vector<2x96xbf16>, vector<96x64xbf16>, vector<2x64xf32> -> vector<2x64xf32>
    %c25 = arith.constant 25 : index
    %c0_135 = arith.constant 0 : index
    %300 = vector.load %arg12[%c25, %c0_135] : memref<32x128xf32, #tpu.memory_space<vmem>>, vector<1x64xf32>
    %301 = vector.broadcast %300 : vector<1x64xf32> to vector<2x64xf32>
    %302 = arith.addf %299, %301 : vector<2x64xf32>
    %cst_136 = arith.constant 0.000000e+00 : f32
    %303 = vector.broadcast %cst_136 : f32 to vector<2x64xf32>
    %304 = arith.maximumf %302, %303 : vector<2x64xf32>
    %305 = arith.truncf %304 : vector<2x64xf32> to vector<2x64xbf16>
    %c960 = arith.constant 960 : index
    %c0_137 = arith.constant 0 : index
    %306 = vector.load %arg11[%c960, %c0_137] : memref<1184x128xbf16, #tpu.memory_space<vmem>>, vector<64x32xbf16>
    %cst_138 = arith.constant dense<0.000000e+00> : vector<2x32xf32>
    %307 = tpu.matmul %305, %306, %cst_138 {dimension_numbers = #tpu.dot_dimension_numbers<[1], [0], [0], [1], [0, 0, 1, 1], [], []>} : vector<2x64xbf16>, vector<64x32xbf16>, vector<2x32xf32> -> vector<2x32xf32>
    %c26 = arith.constant 26 : index
    %c0_139 = arith.constant 0 : index
    %308 = vector.load %arg12[%c26, %c0_139] : memref<32x128xf32, #tpu.memory_space<vmem>>, vector<1x32xf32>
    %309 = vector.broadcast %308 : vector<1x32xf32> to vector<2x32xf32>
    %310 = arith.addf %307, %309 : vector<2x32xf32>
    %cst_140 = arith.constant 0.000000e+00 : f32
    %311 = vector.broadcast %cst_140 : f32 to vector<2x32xf32>
    %312 = arith.maximumf %310, %311 : vector<2x32xf32>
    %313 = arith.truncf %312 : vector<2x32xf32> to vector<2x32xbf16>
    %c1024 = arith.constant 1024 : index
    %c0_141 = arith.constant 0 : index
    %314 = vector.load %arg11[%c1024, %c0_141] : memref<1184x128xbf16, #tpu.memory_space<vmem>>, vector<32x32xbf16>
    %cst_142 = arith.constant dense<0.000000e+00> : vector<2x32xf32>
    %315 = tpu.matmul %313, %314, %cst_142 {dimension_numbers = #tpu.dot_dimension_numbers<[1], [0], [0], [1], [0, 0, 1, 1], [], []>} : vector<2x32xbf16>, vector<32x32xbf16>, vector<2x32xf32> -> vector<2x32xf32>
    %c27 = arith.constant 27 : index
    %c0_143 = arith.constant 0 : index
    %316 = vector.load %arg12[%c27, %c0_143] : memref<32x128xf32, #tpu.memory_space<vmem>>, vector<1x32xf32>
    %317 = vector.broadcast %316 : vector<1x32xf32> to vector<2x32xf32>
    %318 = arith.addf %315, %317 : vector<2x32xf32>
    %319 = arith.mulf %226, %318 : vector<2x32xf32>
    %320 = tpu.concatenate %226, %318, %319 in 1 : vector<2x32xf32>, vector<2x32xf32>, vector<2x32xf32> -> vector<2x96xf32>
    %321 = arith.truncf %320 : vector<2x96xf32> to vector<2x96xbf16>
    %c1056 = arith.constant 1056 : index
    %c0_144 = arith.constant 0 : index
    %322 = vector.load %arg11[%c1056, %c0_144] : memref<1184x128xbf16, #tpu.memory_space<vmem>>, vector<96x32xbf16>
    %cst_145 = arith.constant dense<0.000000e+00> : vector<2x32xf32>
    %323 = tpu.matmul %321, %322, %cst_145 {dimension_numbers = #tpu.dot_dimension_numbers<[1], [0], [0], [1], [0, 0, 1, 1], [], []>} : vector<2x96xbf16>, vector<96x32xbf16>, vector<2x32xf32> -> vector<2x32xf32>
    %c28 = arith.constant 28 : index
    %c0_146 = arith.constant 0 : index
    %324 = vector.load %arg12[%c28, %c0_146] : memref<32x128xf32, #tpu.memory_space<vmem>>, vector<1x32xf32>
    %325 = vector.broadcast %324 : vector<1x32xf32> to vector<2x32xf32>
    %326 = arith.addf %323, %325 : vector<2x32xf32>
    %cst_147 = arith.constant 0.000000e+00 : f32
    %327 = vector.broadcast %cst_147 : f32 to vector<2x32xf32>
    %328 = arith.maximumf %326, %327 : vector<2x32xf32>
    %329 = arith.truncf %328 : vector<2x32xf32> to vector<2x32xbf16>
    %c1152 = arith.constant 1152 : index
    %c0_148 = arith.constant 0 : index
    %330 = vector.load %arg11[%c1152, %c0_148] : memref<1184x128xbf16, #tpu.memory_space<vmem>>, vector<32x8xbf16>
    %cst_149 = arith.constant dense<0.000000e+00> : vector<2x8xf32>
    %331 = tpu.matmul %329, %330, %cst_149 {dimension_numbers = #tpu.dot_dimension_numbers<[1], [0], [0], [1], [0, 0, 1, 1], [], []>} : vector<2x32xbf16>, vector<32x8xbf16>, vector<2x8xf32> -> vector<2x8xf32>
    %c29 = arith.constant 29 : index
    %c0_150 = arith.constant 0 : index
    %332 = vector.load %arg12[%c29, %c0_150] : memref<32x128xf32, #tpu.memory_space<vmem>>, vector<1x8xf32>
    %333 = vector.broadcast %332 : vector<1x8xf32> to vector<2x8xf32>
    %334 = arith.addf %331, %333 : vector<2x8xf32>
    %cst_151 = arith.constant 0.000000e+00 : f32
    %335 = vector.broadcast %cst_151 : f32 to vector<2x8xf32>
    %336 = arith.maximumf %334, %335 : vector<2x8xf32>
    %c30 = arith.constant 30 : index
    %c0_152 = arith.constant 0 : index
    %337 = vector.load %arg12[%c30, %c0_152] : memref<32x128xf32, #tpu.memory_space<vmem>>, vector<1x8xf32>
    %338 = vector.broadcast %337 : vector<1x8xf32> to vector<2x8xf32>
    %339 = arith.mulf %336, %338 : vector<2x8xf32>
    %cst_153 = arith.constant dense<0.000000e+00> : vector<2xf32>
    %340 = vector.multi_reduction <add>, %339, %cst_153 [1] : vector<2x8xf32> to vector<2xf32>
    %341 = vector.shape_cast %340 : vector<2xf32> to vector<2x1xf32>
    %c31 = arith.constant 31 : index
    %c0_154 = arith.constant 0 : index
    %342 = vector.load %arg12[%c31, %c0_154] : memref<32x128xf32, #tpu.memory_space<vmem>>, vector<1x1xf32>
    %343 = vector.broadcast %342 : vector<1x1xf32> to vector<2x1xf32>
    %344 = arith.addf %341, %343 : vector<2x1xf32>
    %345 = vector.shape_cast %344 : vector<2x1xf32> to vector<2x1x1xf32>
    %c0_155 = arith.constant 0 : index
    %c0_156 = arith.constant 0 : index
    %c0_157 = arith.constant 0 : index
    %346 = vector.load %arg13[%c0_155, %c0_156, %c0_157] : memref<2x1x1xf32, #tpu.memory_space<vmem>>, vector<2x1x1xf32>
    tpu.vector_store %arg13[%c0_155, %c0_156, %c0_157], %345 {strides = array<i32>} : memref<2x1x1xf32, #tpu.memory_space<vmem>>, vector<2x1x1xf32>,
    return
  }
  func.func @transform_0(%arg0: i32) -> (i32, i32, i32) {
    %c0_i32 = arith.constant 0 : i32
    %c0_i32_0 = arith.constant 0 : i32
    %c0_i32_1 = arith.constant 0 : i32
    return %arg0, %c0_i32, %c0_i32_0 : i32, i32, i32
  }
  func.func @transform_1(%arg0: i32) -> (i32, i32, i32) {
    %c0_i32 = arith.constant 0 : i32
    %c0_i32_0 = arith.constant 0 : i32
    %c0_i32_1 = arith.constant 0 : i32
    return %arg0, %c0_i32, %c0_i32_0 : i32, i32, i32
  }
  func.func @transform_2(%arg0: i32) -> (i32, i32, i32) {
    %c0_i32 = arith.constant 0 : i32
    %c0_i32_0 = arith.constant 0 : i32
    %c0_i32_1 = arith.constant 0 : i32
    return %arg0, %c0_i32, %c0_i32_0 : i32, i32, i32
  }
  func.func @transform_3(%arg0: i32) -> (i32, i32, i32) {
    %c0_i32 = arith.constant 0 : i32
    %c0_i32_0 = arith.constant 0 : i32
    %c0_i32_1 = arith.constant 0 : i32
    return %arg0, %c0_i32, %c0_i32_0 : i32, i32, i32
  }
  func.func @transform_4(%arg0: i32) -> (i32, i32, i32) {
    %c0_i32 = arith.constant 0 : i32
    %c0_i32_0 = arith.constant 0 : i32
    %c0_i32_1 = arith.constant 0 : i32
    return %arg0, %c0_i32, %c0_i32_0 : i32, i32, i32
  }
  func.func @transform_5(%arg0: i32) -> (i32, i32, i32) {
    %c0_i32 = arith.constant 0 : i32
    %c0_i32_0 = arith.constant 0 : i32
    %c0_i32_1 = arith.constant 0 : i32
    return %arg0, %c0_i32, %c0_i32_0 : i32, i32, i32
  }
  func.func @transform_6(%arg0: i32) -> (i32, i32, i32) {
    %c0_i32 = arith.constant 0 : i32
    %c0_i32_0 = arith.constant 0 : i32
    %c0_i32_1 = arith.constant 0 : i32
    return %arg0, %c0_i32, %c0_i32_0 : i32, i32, i32
  }
  func.func @transform_7(%arg0: i32) -> (i32, i32, i32) {
    %c0_i32 = arith.constant 0 : i32
    %c0_i32_0 = arith.constant 0 : i32
    %c0_i32_1 = arith.constant 0 : i32
    return %arg0, %c0_i32, %c0_i32_0 : i32, i32, i32
  }
  func.func @transform_8(%arg0: i32) -> (i32, i32, i32) {
    %c0_i32 = arith.constant 0 : i32
    %c0_i32_0 = arith.constant 0 : i32
    %c0_i32_1 = arith.constant 0 : i32
    return %arg0, %c0_i32, %c0_i32_0 : i32, i32, i32
  }
  func.func @transform_9(%arg0: i32) -> (i32, i32, i32) {
    %c0_i32 = arith.constant 0 : i32
    %c0_i32_0 = arith.constant 0 : i32
    %c0_i32_1 = arith.constant 0 : i32
    return %arg0, %c0_i32, %c0_i32_0 : i32, i32, i32
  }
  func.func @transform_10(%arg0: i32) -> (i32, i32) {
    %c0_i32 = arith.constant 0 : i32
    %c0_i32_0 = arith.constant 0 : i32
    %c0_i32_1 = arith.constant 0 : i32
    return %c0_i32, %c0_i32_0 : i32, i32
  }
  func.func @transform_11(%arg0: i32) -> (i32, i32) {
    %c0_i32 = arith.constant 0 : i32
    %c0_i32_0 = arith.constant 0 : i32
    %c0_i32_1 = arith.constant 0 : i32
    return %c0_i32, %c0_i32_0 : i32, i32
  }
  func.func @transform_12(%arg0: i32) -> (i32, i32, i32) {
    %c0_i32 = arith.constant 0 : i32
    %c0_i32_0 = arith.constant 0 : i32
    %c0_i32_1 = arith.constant 0 : i32
    return %arg0, %c0_i32, %c0_i32_0 : i32, i32, i32
  }
}

</mosaic_0001>

<bundles_post_ra>
// kernel: graphrec_forward.1
= control target key start
LH: loop header
LB: loop body
LE: loop exit
PB: predicated region body
PF: predicated region fallthrough
CT: control target
= control target key end

     0   :  { %s5496_s21 = smov 0   ;;  %s6569_s0 = inlined_call_operand.vmem [shape: bf16[4,8,64], index: 0, kind: input, shape index: {}]   ;;  %s6570_s1 = inlined_call_operand.vmem [shape: f32[4,8,1], index: 1, kind: input, shape index: {}]   ;;  %s6571_s2 = inlined_call_operand.vmem [shape: f32[4,1,32], index: 2, kind: input, shape index: {}]   ;;  %s6572_s3 = inlined_call_operand.vmem [shape: bf16[4,64,64], index: 3, kind: input, shape index: {}]   ;;  %s6573_s4 = inlined_call_operand.vmem [shape: f32[4,64,1], index: 4, kind: input, shape index: {}]   ;;  %s6574_s5 = inlined_call_operand.vmem [shape: f32[4,8,32], index: 5, kind: input, shape index: {}]   ;;  %s6575_s6 = inlined_call_operand.vmem [shape: f32[4,8,1], index: 6, kind: input, shape index: {}]   ;;  %s6576_s7 = inlined_call_operand.vmem [shape: bf16[4,8,64], index: 7, kind: input, shape index: {}]   ;;  %s6577_s8 = inlined_call_operand.vmem [shape: f32[4,8,1], index: 8, kind: input, shape index: {}]   ;;  %s6578_s9 = inlined_call_operand.vmem [shape: f32[4,1,32], index: 9, kind: input, shape index: {}]   ;;  %s6579_s10 = inlined_call_operand.vmem [shape: bf16[1184,128], index: 10, kind: input, shape index: {}]   ;;  %s6580_s11 = inlined_call_operand.vmem [shape: f32[32,128], index: 11, kind: input, shape index: {}]   ;;  %s6581_s12 = inlined_call_operand.vmem [shape: f32[4,1,1], index: 12, kind: output, shape index: {}]  }
   0x1 LB: > { %s4595_s22 = sadd.s32 4294967295, %s5422_s21   ;;  %p4599_p0 = scmp.ge.s32.totalorder %s5422_s21, 1  ;;  %s5422_s21 = sphi %s5496_s21, %s22_s21  }
   0x2   : > { %p462_p1 = scmp.lt.s32.totalorder %s5422_s21, 3 }
   0x4   : > { %p463_p2 = pnand %p4599_p0, %p462_p1 }
   0x5   : > { %v5218_v0 = vld [vmem:[%s6579_s10] sm:$0xff] (!%p463_p2)   ;;  %v5424_v1 = vmov (!%p463_p2), 0.0   ;;  %v5219_v2 = vld [vmem:[%s6579_s10 + $0x8] sm:$0xff] (!%p463_p2)   ;;  %vm5425_vm0 = vmmov (!%p463_p2), 0   ;;  %s4600_s27 = sshll.u32 (!%p463_p2), %s4595_s22, 1  ;;  %v5426_v3 = vmov (!%p463_p2), 0  }
   0x6   : > { %466 = sbr.rel (%p463_p2) target bundleno = 5787 (0x169b), region = 68  ;;  %4909 = vmatprep.subr.bf16.mxu0 (!%p463_p2), %v5424_v1  ;;  %4921 = vmatprep.subr.bf16.mxu1 (!%p463_p2), %v5424_v1  ;;  %p549_p3 = scmp.lt.s32.totalorder (!%p463_p2), %s4600_s27, 3  ;;  %v5223_v4 = vld [vmem:[%s6579_s10 + $0x20] sm:$0xff] (!%p463_p2)   ;;  %v5220_v5 = vld [vmem:[%s6579_s10 + $0x10] sm:$0xff] (!%p463_p2)   ;;  %v5224_v6 = vld [vmem:[%s6579_s10 + $0x28] sm:$0xff] (!%p463_p2)   ;;  %vm686_vm1 = vcmask (!%p463_p2), 523264  }
   0x7   : > { %4910 = vmatpush3.bf16.msra.mxu0 (!%p463_p2), %v5218_v0  ;;  %4917 = vmatprep.mubr.msk.bf16.mxu0 (!%p463_p2), %vm5425_vm0, %v5424_v1  ;;  %v5221_v7 = vld [vmem:[%s6579_s10 + $0x18] sm:$0xff] (!%p463_p2)   ;;  %v5225_v11 = vld [vmem:[%s6579_s10 + $0x30] sm:$0xff] (!%p463_p2)   ;;  %v4623_v13 = vld [vmem:[%s6580_s11] ss:$0 sm:$0xff] (!%p463_p2)  ;;  %vm836_vm4 = vcmask (!%p463_p2), 261120   ;;  %s5428_s23 = smov (!%p463_p2), 96  }
   0x8   : > { %4911 = vmatprep.subr.bf16.mxu0 (!%p463_p2), %v5424_v1  ;;  %4929 = vmatprep.mubr.msk.bf16.mxu1 (!%p463_p2), %vm5425_vm0, %v5424_v1  ;;  %v5226_v12 = vld [vmem:[%s6579_s10 + $0x38] sm:$0xff] (!%p463_p2)   ;;  %v5227_v25 = vld [vmem:[%s6579_s10 + $0x40] sm:$0xff] (!%p463_p2)   ;;  %v5228_v30 = vld [vmem:[%s6579_s10 + $0x48] sm:$0xff] (!%p463_p2)   ;;  %vm993_vm7 = vcmask (!%p463_p2), 7168  }
   0x9   : > { %5216 = vset.pattern.permute.xlu0 (!%p463_p2), %v5426_v3  ;;  %5217 = vset.pattern.permute.xlu1 (!%p463_p2), %v5426_v3  ;;  %v4639_v34 = vld [vmem:[%s6580_s11 + $0x3] ss:$0 sm:$0xff] (!%p463_p2)  ;;  %v4641_v43 = vld [vmem:[%s6580_s11 + $0x5] ss:$0 sm:$0xff] (!%p463_p2)  ;;  %v4630_v44 = vld [vmem:[%s6580_s11 + $0x1] ss:$0 sm:$0xff] (!%p463_p2) }
   0xa   : > { %4922 = vmatpush3.bf16.msra.mxu1 (!%p463_p2), %v5223_v4  ;;  %v5229_v61 = vld [vmem:[%s6579_s10 + $0x70] sm:$0xff] (!%p463_p2)   ;;  %v5230_v62 = vld [vmem:[%s6579_s10 + $0x78] sm:$0xff] (!%p463_p2)   ;;  %v5231_v0 = vld [vmem:[%s6579_s10 + $0x80] sm:$0xff] (!%p463_p2)  }
   0xb   : > { %4912 = vmatpush3.bf16.msra.mxu0 (!%p463_p2), %v5219_v2  ;;  %4923 = vmatprep.subr.bf16.mxu1 (!%p463_p2), %v5424_v1  ;;  %v5232_v2 = vld [vmem:[%s6579_s10 + $0x88] sm:$0xff] (!%p463_p2)  }
   0xc   : > { %4913 = vmatprep.subr.bf16.mxu0 (!%p463_p2), %v5424_v1 }
   0xd   : > { %s6583_s27 = smov (!%p549_p3, %s4600_s27), 3 }
   0xe   : > { %s4601_s14 = sshll.u32 %s6583_s27, 2  ;;  %s4788_s26 = sshll.u32 %s6583_s27, 5  ;;  %4924 = vmatpush3.bf16.msra.mxu1 %v5224_v6 }
   0xf   : > { %s552_s19 = scalar_lea.vmem %s6569_s0, %s4601_s14  ;;  %s5540_s25 = scalar_lea.vmem %s6576_s7, %s4601_s14  ;;  %4914 = vmatpush3.bf16.msra.mxu0 %v5220_v5  ;;  %4925 = vmatprep.subr.bf16.mxu1 %v5424_v1 }
  0x10   : > { %s5544_s28 = sshll.u32 %s6583_s27, 3  ;;  %4915 = vmatprep.subr.bf16.mxu0 %v5424_v1  ;;  %v5222_v8 = vld [vmem:[%s552_s19] sm:$0xff]   ;;  %s5560_s16 = scalar_lea.vmem %s6572_s3, %s4788_s26 }
  0x11   : > { %s558_s13 = scalar_lea.vmem %s6570_s1, %s5544_s28  ;;  %s563_s29 = scalar_lea.vmem %s6571_s2, %s6583_s27  ;;  %v5233_v63 = vld [vmem:[%s5560_s16] sm:$0xff]   ;;  %v5234_v3 = vld [vmem:[%s5560_s16 + $0x8] sm:$0xff]   ;;  %v5235_v4 = vld [vmem:[%s5560_s16 + $0x10] sm:$0xff]  }
  0x12   : > { %v5551_v9 = vld [vmem:[%s558_s13] sm:$0xff]  ;;  %v5553_v10 = vld [vmem:[%s558_s13 + $0x8] sm:$0xff]  ;;  %4926 = vmatpush3.bf16.msra.mxu1 %v5225_v11  ;;  %s5427_s19 = smov 64   ;;  %v5236_v5 = vld [vmem:[%s5560_s16 + $0x18] sm:$0xff]   ;;  %s4789_s24 = sshll.u32 %s6583_s27, 6 }
  0x13   : > { %622 = vperm.xlu0 %5216, %v5551_v9   ;;  %4916 = vmatpush3.bf16.msra.mxu0 %v5221_v7  ;;  %v4621_v27 = vld [vmem:[%s563_s29] ss:$0 sm:$0xff]  ;;  %v4622_v28 = vld [vmem:[%s563_s29 + $0x1] ss:$0 sm:$0xff]  ;;  %s5429_s29 = smov 32   ;;  %v5238_v7 = vld [vmem:[%s5560_s16 + $0x28] sm:$0xff]   ;;  %s5655_s30 = scalar_lea.vmem %s6573_s4, %s4789_s24 }
  0x14   : > { %4927 = vmatprep.subr.bf16.mxu1 %v5424_v1  ;;  %4953 = vmatprep.subr.bf16.mxu0 %v5229_v61  ;;  %v5237_v6 = vld [vmem:[%s5560_s16 + $0x20] sm:$0xff]   ;;  %v5240_v11 = vld [vmem:[%s5560_s16 + $0x38] sm:$0xff]   ;;  %s583_s22 = scalar_lea.vmem %s6574_s5, %s5544_s28  ;;  %s6229_s20 = scalar_lea.vmem %s6577_s8, %s5544_s28 }
  0x15   : > { %s606_s18 = scalar_lea.vmem %s6578_s9, %s6583_s27 }
  0x16   : > { %4918 = vmatmul.mubr.msk.bf16.vlgmr.msra.gmra.mrb[0].mxu0 %vm686_vm1, %v5222_v8  ;;  %4928 = vmatpush3.bf16.msra.mxu1 %v5226_v12  ;;  %v5239_v8 = vld [vmem:[%s5560_s16 + $0x30] sm:$0xff]  }
  0x17   : > { %627 = vperm.xlu0 %5216, %v5553_v10   ;;  %4933 = vmatprep.subr.bf16.mxu1 %v5424_v1 }
  0x18   : > { %4954 = vmatpush3.bf16.msra.mxu0 %v5229_v61  ;;  %4961 = vmatprep.mubr.msk.bf16.mxu0 %vm686_vm1, %v5233_v63 }
  0x19   : > { %4955 = vmatprep.subr.bf16.mxu0 %v5230_v62 }
  0x1b   : > { %903 = vrot.lane.b32.xlu0 %v4639_v34, %s5427_s19  ;;  %v1205_v34 = vld [vmem:[%s5655_s30 + $0x50] sm:$0xff] }
  0x1c   : > { %4956 = vmatpush3.bf16.msra.mxu0 %v5230_v62 }
  0x1d   : > { %4957 = vmatprep.subr.bf16.mxu0 %v5231_v0 }
  0x20   : > { %4958 = vmatpush3.bf16.msra.mxu0 %v5231_v0 }
  0x21   : > { %4959 = vmatprep.subr.bf16.mxu0 %v5232_v2 }
  0x24   : > { %4960 = vmatpush3.bf16.msra.mxu0 %v5232_v2 }
  0x27   : > { %4962 = vmatmul.mubr.msk.bf16.vlgmr.msra.gmra.mrb[4].mxu0 %vm686_vm1, %v5234_v3 }
  0x28   : > { %4965 = vmatprep.mubr.msk.bf16.mxu0 %vm686_vm1, %v5235_v4  ;;  %v1212_v4 = vld [vmem:[%s583_s22 + $0x8] sm:$0xff] }
  0x2f   : > { %4966 = vmatmul.mubr.msk.bf16.gmra.mrb[8].mxu0 %vm686_vm1, %v5236_v5 }
  0x30   : > { %4969 = vmatprep.mubr.msk.bf16.mxu0 %vm686_vm1, %v5237_v6 }
  0x37   : > { %4970 = vmatmul.mubr.msk.bf16.gmra.mrb[12].mxu0 %vm686_vm1, %v5238_v7 }
  0x38   : > { %4973 = vmatprep.mubr.msk.bf16.mxu0 %vm686_vm1, %v5239_v8 }
  0x3f   : > { %4974 = vmatmul.mubr.msk.bf16.gmra.mrb[16].mxu0 %vm686_vm1, %v5240_v11 }
  0x92   : > { %v623_v21 = vpop.permute.xlu0 %622 }
  0x93   : > { %v642_v31 = vmul.f32 %v4621_v27, %v623_v21  ;;  %v1197_v21 = vld [vmem:[%s5655_s30 + $0x10] sm:$0xff]  ;;  %v1199_v27 = vld [vmem:[%s5655_s30 + $0x20] sm:$0xff] }
  0x96   : > { %v628_v29 = vpop.permute.xlu0 %627 }
  0x97   : > { %v643_v32 = vmul.f32 %v4622_v28, %v628_v29  ;;  %v1202_v28 = vld [vmem:[%s5655_s30 + $0x38] sm:$0xff]  ;;  %v1201_v29 = vld [vmem:[%s5655_s30 + $0x30] sm:$0xff] }
  0x99   : > { %v5589_v33 = vpack.c.bf16 %v643_v32, %v642_v31  ;;  %v1203_v31 = vld [vmem:[%s5655_s30 + $0x40] sm:$0xff]  ;;  %v1206_v32 = vld [vmem:[%s5655_s30 + $0x58] sm:$0xff] }
  0x9a   : > { %v904_v50 = vpop.permute.xlu0 %903 }
  0xe9   : > { %v724_v14 = vpop.f32.mrb[0].mxu0 }
  0xea   : > { %v725_v15 = vadd.f32 %v4623_v13, %v724_v14  ;;  %v4919_v16 = vpop.f32.mrb[1].mxu0 }
  0xeb   : > { %v727_v17 = vpop.f32.mrb[2].mxu0 }
  0xec   : > { %v733_v18 = vmul.f32 0.2, %v725_v15  ;;  %v728_v19 = vadd.f32 %v4623_v13, %v727_v17  ;;  %v4920_v20 = vpop.f32.mrb[3].mxu0  ;;  %vm731_vm2 = vcmp.gt.f32.partialorder %v725_v15, 0.0 }
  0xed   : > { %v1195_v20 = vld [vmem:[%s5655_s30] sm:$0xff] }
  0xee   : > { %vm732_vm3 = vcmp.gt.f32.partialorder %v728_v19, 0.0  ;;  %v734_v22 = vmul.f32 0.2, %v728_v19  ;;  %v735_v23 = vsel %vm731_vm2, %v725_v15, %v733_v18 }
  0xf0   : > { %v736_v24 = vsel %vm732_vm3, %v728_v19, %v734_v22  ;;  %v1198_v22 = vld [vmem:[%s5655_s30 + $0x18] sm:$0xff] }
  0xf1   : > { %v737_v26 = vpack.c.bf16 %v736_v24, %v735_v23  ;;  %v5241_v23 = vld [vmem:[%s6579_s10 + $0xa0] sm:$0xff]   ;;  %v1196_v24 = vld [vmem:[%s5655_s30 + $0x8] sm:$0xff] }
  0xf2   : > { %4997 = vmatprep.subr.bf16.mxu0 %v5241_v23 }
  0xf3   : > { %4930 = vmatmul.mubr.msk.bf16.vlgmr.msra.gmra.mrb[0].mxu1 %vm686_vm1, %v737_v26  ;;  %4998 = vmatpush3.bf16.msra.mxu0 %v5241_v23  ;;  %v5242_v26 = vld [vmem:[%s6579_s10 + $0xa8] sm:$0xff]  }
  0xf4   : > { %4934 = vmatpush3.bf16.msra.mxu1 %v5227_v25  ;;  %4937 = vmatprep.mubr.msk.bf16.mxu1 %vm5425_vm0, %v5424_v1  ;;  %v1200_v25 = vld [vmem:[%s5655_s30 + $0x28] sm:$0xff] }
  0xf5   : > { %4935 = vmatprep.subr.bf16.mxu1 %v5424_v1  ;;  %4999 = vmatprep.subr.bf16.mxu0 %v5242_v26 }
  0xf7   : > { %5000 = vmatpush3.bf16.msra.mxu0 %v5242_v26 }
  0xf8   : > { %4936 = vmatpush3.bf16.msra.mxu1 %v5228_v30  ;;  %5049 = vmatprep.subr.bf16.mxu0 %v5424_v1  ;;  %v1204_v30 = vld [vmem:[%s5655_s30 + $0x48] sm:$0xff] }
  0xf9   : > { %4941 = vmatprep.subr.bf16.mxu1 %v5424_v1 }
  0xfb   : > { %4938 = vmatmul.mubr.msk.bf16.vlgmr.msra.gmra.mrb[4].mxu1 %vm836_vm4, %v5589_v33 }
  0xfc   : > { %4949 = vmatprep.mubr.msk.bf16.mxu1 %vm5425_vm0, %v5424_v1 }
 0x1c6   : > { %v812_v35 = vpop.f32.mrb[0].mxu1 }
 0x1c7   : > { %v4931_v36 = vpop.f32.mrb[1].mxu1  ;;  %v5609_v45 = vadd.f32 %v4630_v44, %v812_v35  ;;  %v1208_v35 = vld [vmem:[%s5655_s30 + $0x68] sm:$0xff] }
 0x1c8   : > { %v815_v37 = vpop.f32.mrb[2].mxu1  ;;  %v1207_v36 = vld [vmem:[%s5655_s30 + $0x60] sm:$0xff] }
 0x1c9   : > { %v4932_v38 = vpop.f32.mrb[3].mxu1  ;;  %v5612_v48 = vadd.f32 %v4630_v44, %v815_v37  ;;  %v1210_v37 = vld [vmem:[%s5655_s30 + $0x78] sm:$0xff] }
 0x1ca   : > { %v1209_v38 = vld [vmem:[%s5655_s30 + $0x70] sm:$0xff] }
 0x1ce   : > { %v874_v39 = vpop.f32.mrb[4].mxu1 }
 0x1cf   : > { %883 = vrot.lane.b32.xlu1 %v874_v39, %s5427_s19  ;;  %v4939_v40 = vpop.f32.mrb[5].mxu1  ;;  %v5430_v39 = vmov 1966171168  }
 0x1d0   : > { %v877_v41 = vpop.f32.mrb[6].mxu1  ;;  %v1217_v40 = vunpack.c.l.s4 %v5430_v39 }
 0x1d1   : > { %v4940_v42 = vpop.f32.mrb[7].mxu1 }
 0x1d2   : > { %v1218_v42 = vunpack.c.0.s8 %v1217_v40 }
 0x1d3   : > { %885 = vrot.lane.b32.xlu1 %v877_v41, %s5427_s19  ;;  %v1219_v41 = vlaneseq }
 0x1d7   : > { %935 = vrot.lane.b32.xlu1 %v4641_v43, %s5428_s23  ;;  %v1220_v43 = vshrl.u32 %v1219_v41, 7 }
 0x1d9   : > { %v5684_v44 = vsub.s32 %v1218_v42, %v1220_v43  ;;  %v5696_v2 = vsub.s32 0, %v1220_v43 }
 0x241   : > { %v884_v46 = vpop.permute.xlu1 %883 }
 0x242   : > { %v889_v47 = vadd.f32 %v884_v46, %v5609_v45  ;;  %v1211_v46 = vld [vmem:[%s583_s22] sm:$0xff] }
 0x244   : > { %vm891_vm5 = vcmp.gt.f32.partialorder %v889_v47, 0.0  ;;  %v893_v49 = vmul.f32 0.2, %v889_v47 }
 0x245   : > { %v886_v51 = vpop.permute.xlu1 %885 }
 0x246   : > { %v890_v52 = vadd.f32 %v886_v51, %v5612_v48  ;;  %v895_v53 = vsel %vm891_vm5, %v889_v47, %v893_v49  ;;  %v1222_v47 = vrot.slane %v1211_v46, %v5684_v44  ;;  %v4640_v49 = vld [vmem:[%s6580_s11 + $0x4] ss:$0 sm:$0xff] }
 0x247   : > { %v906_v54 = vmul.f32 %v904_v50, %v895_v53 }
 0x248   : > { %vm892_vm6 = vcmp.gt.f32.partialorder %v890_v52, 0.0  ;;  %v894_v55 = vmul.f32 0.2, %v890_v52  ;;  %v1230_v51 = vcombine.high %v1222_v47, %v1222_v47 }
 0x249   : > { %910 = vrot.lane.b32.xlu0 %v906_v54, %s5427_s19  ;;  %v936_v56 = vpop.permute.xlu1 %935  ;;  %v4642_v54 = vld [vmem:[%s6580_s11 + $0x6] ss:$0 sm:$0xff] }
 0x24a   : > { %v896_v57 = vsel %vm892_vm6, %v890_v52, %v894_v55  ;;  %v938_v58 = vmul.f32 %v936_v56, %v895_v53  ;;  %v1215_v53 = vcombine.high %v1211_v46, %v1211_v46 }
 0x24b   : > { %v907_v59 = vmul.f32 %v904_v50, %v896_v57  ;;  %v939_v60 = vmul.f32 %v936_v56, %v896_v57  ;;  %v1238_v56 = vrot.slane %v1222_v47, %v5684_v44 }
 0x24c   : > { %v1229_v62 = vrot.slane %v1215_v53, %v5684_v44 }
 0x24d   : > { %912 = vrot.lane.b32.xlu1 %v907_v59, %s5427_s19  ;;  %942 = vrot.lane.b32.xlu0 %v938_v58, %s5429_s29  ;;  %v1252_v59 = vrot.slane %v1230_v51, %v5684_v44  ;;  %v1260_v3 = vcombine.high %v1238_v56, %v1238_v56 }
 0x24e   : > { %v1231_v11 = vcombine.high %v1229_v62, %v1229_v62 }
 0x24f   : > { %v1262_v8 = vcombine.high %v1252_v59, %v1252_v59 }
 0x251   : > { %944 = vrot.lane.b32.xlu1 %v939_v60, %s5429_s29 }
 0x2bb   : > { %v911_v12 = vpop.permute.xlu0 %910 }
 0x2bc   : > { %v916_v13 = vsel %vm836_vm4, %v911_v12, 0.0  ;;  %v1271_v12 = vrot.slane %v1212_v4, %v5684_v44 }
 0x2bd   : > { %917 = vadd.xlane.f32.xlu0 %v916_v13 }
 0x2bf   : > { %v943_v14 = vpop.permute.xlu0 %942  ;;  %v913_v15 = vpop.permute.xlu1 %912 }
 0x2c0   : > { %v948_v16 = vsel %vm836_vm4, %v943_v14, 0.0  ;;  %v919_v17 = vsel %vm836_vm4, %v913_v15, 0.0  ;;  %v1396_v14 = vrot.slane %v1238_v56, %v5696_v2  ;;  %v1404_v15 = vrot.slane %v1260_v3, %v5696_v2 }
 0x2c1   : > { %949 = vadd.xlane.f32.xlu0 %v948_v16  ;;  %920 = vadd.xlane.f32.xlu1 %v919_v17  ;;  %v1400_v17 = vrot.slane %v1252_v59, %v5696_v2 }
 0x2c3   : > { %v945_v18 = vpop.permute.xlu1 %944 }
 0x2c4   : > { %v951_v19 = vsel %vm836_vm4, %v945_v18, 0.0  ;;  %v1408_v18 = vrot.slane %v1262_v8, %v5696_v2 }
 0x2c5   : > { %952 = vadd.xlane.f32.xlu0 %v951_v19  ;;  %v1245_v19 = vrot.slane %v1229_v62, %v5684_v44 }
 0x2d2   : > { %1315 = vperm.xlu1 %5217, %v1195_v20   ;;  %v1259_v20 = vrot.slane %v1231_v11, %v5684_v44 }
 0x2d6   : > { %1325 = vperm.xlu1 %5217, %v1197_v21   ;;  %v1279_v21 = vcombine.high %v1271_v12, %v1271_v12 }
 0x2da   : > { %1330 = vperm.xlu1 %5217, %v1198_v22   ;;  %v1264_v22 = vcombine.high %v1212_v4, %v1212_v4 }
 0x2db   : > { %1320 = vperm.xlu0 %5216, %v1196_v24  }
 0x2dc   : > { %v1278_v39 = vrot.slane %v1264_v22, %v5684_v44 }
 0x2de   : > { %1340 = vperm.xlu1 %5217, %v1200_v25   ;;  %v1280_v59 = vcombine.high %v1278_v39, %v1278_v39 }
 0x2df   : > { %1335 = vperm.xlu0 %5216, %v1199_v27  }
 0x2e2   : > { %1350 = vperm.xlu1 %5217, %v1202_v28  }
 0x2e3   : > { %1345 = vperm.xlu0 %5216, %v1201_v29   ;;  %v1261_v29 = vcombine.high %v1245_v19, %v1245_v19 }
 0x2e5   : > { %v1420_v51 = vrot.slane %v1261_v29, %v5696_v2 }
 0x2e6   : > { %1360 = vperm.xlu1 %5217, %v1204_v30   ;;  %v1263_v30 = vcombine.high %v1259_v20, %v1259_v20 }
 0x2e7   : > { %1355 = vperm.xlu0 %5216, %v1203_v31  }
 0x2ea   : > { %1370 = vperm.xlu1 %5217, %v1206_v32  }
 0x2eb   : > { %1365 = vperm.xlu0 %5216, %v1205_v34   ;;  %v1412_v34 = vrot.slane %v1245_v19, %v5696_v2 }
 0x2ee   : > { %1380 = vperm.xlu1 %5217, %v1208_v35   ;;  %v1416_v35 = vrot.slane %v1259_v20, %v5696_v2 }
 0x2ef   : > { %1375 = vperm.xlu0 %5216, %v1207_v36  }
 0x2f2   : > { %1390 = vperm.xlu1 %5217, %v1210_v37   ;;  %v1287_v37 = vrot.slane %v1271_v12, %v5684_v44 }
 0x2f3   : > { %1385 = vperm.xlu0 %5216, %v1209_v38   ;;  %v1301_v38 = vrot.slane %v1279_v21, %v5684_v44 }
 0x2f5   : > { %v1311_v8 = vcombine.high %v1301_v38, %v1301_v38 }
 0x34a   : > { %v918_v50 = vpop.xlane.xlu0 %917 }
 0x34b   : > { %v927_v52 = vadd.f32 %v4640_v49, %v918_v50 }
 0x34d   : > { %v961_v55 = vmul.f32 1.442695, %v927_v52  ;;  %v1424_v52 = vrot.slane %v1263_v30, %v5696_v2 }
 0x34e   : > { %v950_v57 = vpop.xlane.xlu0 %949  ;;  %v921_v58 = vpop.xlane.xlu1 %920 }
 0x34f   : > { %5304 = vpow2.f32 %v961_v55  ;;  %v959_v60 = vadd.f32 %v4642_v54, %v950_v57  ;;  %v928_v61 = vadd.f32 %v4640_v49, %v921_v58  ;;  %v1428_v58 = vrot.slane %v1287_v37, %v5696_v2 }
 0x351   : > { %v1024_v63 = vmul.f32 1.442695, %v959_v60  ;;  %v963_v0 = vmul.f32 1.442695, %v928_v61 }
 0x352   : > { %v953_v5 = vpop.xlane.xlu0 %952  ;;  %v1316_v6 = vpop.permute.xlu1 %1315 }
 0x353   : > { %5306 = vpow2.f32 %v1024_v63  ;;  %v960_v7 = vadd.f32 %v4642_v54, %v953_v5  ;;  %v1473_v24 = vmul.f32 %v1396_v14, %v1316_v6 }
 0x354   : > { %5308 = vpow2.f32 %v963_v0 }
 0x355   : > { %v1026_v13 = vmul.f32 1.442695, %v960_v7  ;;  %v1309_v7 = vcombine.high %v1287_v37, %v1287_v37 }
 0x356   : > { %v1326_v16 = vpop.permute.xlu1 %1325 }
 0x357   : > { %5310 = vpow2.f32 %v1026_v13  ;;  %v1475_v25 = vmul.f32 %v1404_v15, %v1326_v16 }
 0x359   : > { %v5305_v23 = vpop.eup %5304 }
 0x35a   : > { %v1321_v26 = vpop.permute.xlu0 %1320  ;;  %v1331_v27 = vpop.permute.xlu1 %1330  ;;  %v965_v28 = vmul.f32 %v5305_v23, %v5551_v9 }
 0x35b   : > { %v1474_v31 = vmul.f32 %v1400_v17, %v1321_v26  ;;  %v1476_v32 = vmul.f32 %v1408_v18, %v1331_v27  ;;  %v1294_v17 = vrot.slane %v1278_v39, %v5684_v44  ;;  %v1308_v18 = vrot.slane %v1280_v59, %v5684_v44 }
 0x35c   : > { %v994_v36 = vsel %vm993_vm7, %v965_v28, 0.0  ;;  %969 = vperm.xlu0 %5216, %v965_v28  }
 0x35d   : > { %v5307_v40 = vpop.eup %5306  ;;  %v1885_v41 = vpack.c.bf16 %v1474_v31, %v1473_v24  ;;  %v1886_v42 = vpack.c.bf16 %v1476_v32, %v1475_v25  ;;  %v995_v43 = vrot.slane %v994_v36, 4  ;;  %v1436_v25 = vrot.slane %v1309_v7, %v5696_v2 }
 0x35e   : > { %v5309_v46 = vpop.eup %5308  ;;  %v1336_v47 = vpop.permute.xlu0 %1335  ;;  %v1028_v50 = vmul.f32 %v5307_v40, %v5551_v9  ;;  %v1432_v9 = vrot.slane %v1301_v38, %v5696_v2  ;;  %v1440_v32 = vrot.slane %v1311_v8, %v5696_v2  ;;  %v1448_v38 = vrot.slane %v1308_v18, %v5696_v2 }
 0x35f   : > { %v1341_v49 = vpop.permute.xlu1 %1340  ;;  %v996_v53 = vadd.f32 %v995_v43, %v994_v36  ;;  %v1477_v54 = vmul.f32 %v1412_v34, %v1336_v47  ;;  %5001 = vmatprep.mubr.msk.bf16.mxu0 %vm836_vm4, %v1885_v41  ;;  %v966_v56 = vmul.f32 %v5309_v46, %v5553_v10  ;;  %v1444_v34 = vrot.slane %v1294_v17, %v5696_v2 }
 0x360   : > { %v1478_v55 = vmul.f32 %v1416_v35, %v1341_v49  ;;  %v1057_v57 = vsel %vm993_vm7, %v1028_v50, 0.0  ;;  %1032 = vperm.xlu0 %5216, %v1028_v50   ;;  %5002 = vmatmul.mubr.msk.bf16.vlgmr.msra.gmra.mrb[20].mxu0 %vm836_vm4, %v1886_v42  ;;  %v1310_v43 = vcombine.high %v1294_v17, %v1294_v17  ;;  %v1312_v46 = vcombine.high %v1308_v18, %v1308_v18  ;;  %v5754_v17 = vld [vmem:[%s6580_s11 + $0x7] ss:$0 sm:$0xff] }
 0x361   : > { %v5311_v60 = vpop.eup %5310  ;;  %v997_v61 = vrot.slane %v996_v53, 2  ;;  %v1058_v63 = vrot.slane %v1057_v57, 4  ;;  %974 = vperm.xlu1 %5217, %v966_v56   ;;  %v1001_v0 = vsel %vm993_vm7, %v966_v56, 0.0 }
 0x362   : > { %v1887_v62 = vpack.c.bf16 %v1478_v55, %v1477_v54  ;;  %v1002_v3 = vrot.slane %v1001_v0, 4  ;;  %v1346_v4 = vpop.permute.xlu0 %1345  ;;  %v1029_v6 = vmul.f32 %v5311_v60, %v5553_v10  ;;  %v1452_v59 = vrot.slane %v1310_v43, %v5696_v2 }
 0x363   : > { %v1351_v5 = vpop.permute.xlu1 %1350  ;;  %v998_v11 = vadd.f32 %v997_v61, %v996_v53  ;;  %v1059_v12 = vadd.f32 %v1058_v63, %v1057_v57  ;;  %v1479_v13 = vmul.f32 %v1420_v51, %v1346_v4  ;;  %v5245_v53 = vld [vmem:[%s6579_s10 + $0x50] sm:$0xff]   ;;  %v1456_v60 = vrot.slane %v1312_v46, %v5696_v2 }
 0x364   : > { %v1480_v14 = vmul.f32 %v1424_v52, %v1351_v5  ;;  %5005 = vmatprep.mubr.msk.bf16.mxu0 %vm836_vm4, %v1887_v62  ;;  %v1003_v15 = vadd.f32 %v1002_v3, %v1001_v0  ;;  %v1064_v16 = vsel %vm993_vm7, %v1029_v6, 0.0  ;;  %4942 = vmatpush3.bf16.msra.mxu1 %v5245_v53 }
 0x365   : > { %v999_v19 = vrot.slane %v998_v11, 1  ;;  %v1060_v20 = vrot.slane %v1059_v12, 2  ;;  %v1065_v22 = vrot.slane %v1064_v16, 4  ;;  %1037 = vperm.xlu1 %5217, %v1029_v6   ;;  %4943 = vmatprep.subr.bf16.mxu1 %v5424_v1 }
 0x366   : > { %v1888_v21 = vpack.c.bf16 %v1480_v14, %v1479_v13  ;;  %v1004_v10 = vrot.slane %v1003_v15, 2  ;;  %v1356_v23 = vpop.permute.xlu0 %1355  ;;  %v4963_v14 = vpop.f32.mrb[4].mxu0 }
 0x367   : > { %v1361_v24 = vpop.permute.xlu1 %1360  ;;  %v1000_v26 = vadd.f32 %v999_v19, %v998_v11  ;;  %v1061_v27 = vadd.f32 %v1060_v20, %v1059_v12  ;;  %v1066_v28 = vadd.f32 %v1065_v22, %v1064_v16  ;;  %v1481_v29 = vmul.f32 %v1428_v58, %v1356_v23  ;;  %v5246_v11 = vld [vmem:[%s6579_s10 + $0x58] sm:$0xff]   ;;  %v1624_v18 = vpop.f32.mrb[5].mxu0 }
 0x368   : > { %v1005_v30 = vadd.f32 %v1004_v10, %v1003_v15  ;;  %v1482_v31 = vmul.f32 %v1432_v9, %v1361_v24  ;;  %5006 = vmatmul.mubr.msk.bf16.gmra.mrb[24].mxu0 %vm836_vm4, %v1888_v21  ;;  %4944 = vmatpush3.bf16.msra.mxu1 %v5246_v11  ;;  %v5247_v15 = vld [vmem:[%s6579_s10 + $0x60] sm:$0xff]   ;;  %v1633_v19 = vadd.f32 %v4963_v14, %v5754_v17  ;;  %v4964_v21 = vpop.f32.mrb[6].mxu0 }
 0x369   : > { %v1008_v35 = vadd.f32 1e-10, %v1000_v26  ;;  %v1062_v36 = vrot.slane %v1061_v27, 1  ;;  %v1067_v37 = vrot.slane %v1066_v28, 2  ;;  %4945 = vmatprep.subr.bf16.mxu1 %v5424_v1  ;;  %v1625_v20 = vadd.f32 %v5754_v17, %v1624_v18  ;;  %v1627_v22 = vpop.f32.mrb[7].mxu0  ;;  %v5248_v26 = vld [vmem:[%s6579_s10 + $0x68] sm:$0xff]  }
 0x36a   : > { %v1006_v39 = vrot.slane %v1005_v30, 1  ;;  %v1889_v40 = vpack.c.bf16 %v1482_v31, %v1481_v29  ;;  %v1366_v41 = vpop.permute.xlu0 %1365  ;;  %vm1689_vm8 = vcmp.gt.f32.partialorder %v1633_v19, 0.0  ;;  %v1705_v10 = vmul.f32 0.2, %v1633_v19  ;;  %v4967_v31 = vpop.f32.mrb[8].mxu0 }
 0x36b   : > { %v1371_v42 = vpop.permute.xlu1 %1370  ;;  %5312 = vrcp.f32 %v1008_v35  ;;  %v1063_v47 = vadd.f32 %v1062_v36, %v1061_v27  ;;  %v1068_v49 = vadd.f32 %v1067_v37, %v1066_v28  ;;  %v1483_v50 = vmul.f32 %v1436_v25, %v1366_v41  ;;  %v1640_v37 = vpop.f32.mrb[9].mxu0 }
 0x36c   : > { %v1007_v51 = vadd.f32 %v1006_v39, %v1005_v30  ;;  %v1484_v52 = vmul.f32 %v1440_v32, %v1371_v42  ;;  %5009 = vmatprep.mubr.msk.bf16.mxu0 %vm836_vm4, %v1889_v40  ;;  %4946 = vmatpush3.bf16.msra.mxu1 %v5247_v15  ;;  %vm1687_vm9 = vcmp.gt.f32.partialorder %v1625_v20, 0.0  ;;  %v1703_v23 = vmul.f32 0.2, %v1625_v20  ;;  %v5771_v32 = vld [vmem:[%s6579_s10 + $0x90] sm:$0xff]   ;;  %v4968_v41 = vpop.f32.mrb[10].mxu0 }
 0x36d   : > { %v1071_v54 = vadd.f32 1e-10, %v1063_v47  ;;  %v1069_v55 = vrot.slane %v1068_v49, 1  ;;  %4947 = vmatprep.subr.bf16.mxu1 %v5424_v1  ;;  %v1636_v24 = vadd.f32 %v4964_v21, %v5754_v17  ;;  %v1628_v25 = vadd.f32 %v5754_v17, %v1627_v22  ;;  %v1643_v46 = vpop.f32.mrb[11].mxu0 }
 0x36e   : > { %v1009_v56 = vadd.f32 1e-10, %v1007_v51  ;;  %v1890_v57 = vpack.c.bf16 %v1484_v52, %v1483_v50  ;;  %v1376_v58 = vpop.permute.xlu0 %1375  ;;  %v5764_v27 = vsel %vm1689_vm8, %v1633_v19, %v1705_v10  ;;  %v5766_v28 = vsel %vm1687_vm9, %v1625_v20, %v1703_v23 }
 0x36f   : > { %v1381_v9 = vpop.permute.xlu1 %1380  ;;  %5314 = vrcp.f32 %v1071_v54  ;;  %v1070_v61 = vadd.f32 %v1069_v55, %v1068_v49  ;;  %v1485_v62 = vmul.f32 %v1444_v34, %v1376_v58  ;;  %vm1690_vm10 = vcmp.gt.f32.partialorder %v1636_v24, 0.0  ;;  %v4971_v54 = vpop.f32.mrb[12].mxu0 }
 0x370   : > { %v1486_v63 = vmul.f32 %v1448_v38, %v1381_v9  ;;  %5316 = vrcp.f32 %v1009_v56  ;;  %5010 = vmatmul.mubr.msk.bf16.gmra.mrb[28].mxu0 %vm836_vm4, %v1890_v57  ;;  %v1706_v29 = vmul.f32 0.2, %v1636_v24  ;;  %vm1688_vm11 = vcmp.gt.f32.partialorder %v1628_v25, 0.0  ;;  %4948 = vmatpush3.bf16.msra.mxu1 %v5248_v26  ;;  %v1656_v57 = vpop.f32.mrb[13].mxu0 }
 0x371   : > { %v1072_v0 = vadd.f32 1e-10, %v1070_v61  ;;  %v1704_v30 = vmul.f32 0.2, %v1628_v25  ;;  %v1649_v36 = vadd.f32 %v4967_v31, %v5754_v17  ;;  %4977 = vmatprep.subr.bf16.mxu1 %v5771_v32  ;;  %v1641_v40 = vadd.f32 %v5754_v17, %v1640_v37 }
 0x372   : > { %v1891_v3 = vpack.c.bf16 %v1486_v63, %v1485_v62  ;;  %v1386_v4 = vpop.permute.xlu0 %1385  ;;  %v5773_v34 = vsel %vm1690_vm10, %v1636_v24, %v1706_v29  ;;  %v1652_v43 = vadd.f32 %v4968_v41, %v5754_v17  ;;  %v1644_v49 = vadd.f32 %v5754_v17, %v1643_v46  ;;  %v4972_v62 = vpop.f32.mrb[14].mxu0 }
 0x373   : > { %v1391_v5 = vpop.permute.xlu1 %1390  ;;  %5318 = vrcp.f32 %v1072_v0  ;;  %v1487_v6 = vmul.f32 %v1452_v59, %v1386_v4  ;;  %v5775_v35 = vsel %vm1688_vm11, %v1628_v25, %v1704_v30  ;;  %v1736_v38 = vpack.c.bf16 %v5773_v34, %v5764_v27 }
 0x374   : > { %v1488_v7 = vmul.f32 %v1456_v60, %v1391_v5  ;;  %5013 = vmatprep.mubr.msk.bf16.mxu0 %vm836_vm4, %v1891_v3  ;;  %v1735_v39 = vpack.c.bf16 %v5775_v35, %v5766_v28  ;;  %vm1693_vm12 = vcmp.gt.f32.partialorder %v1649_v36, 0.0  ;;  %v1709_v42 = vmul.f32 0.2, %v1649_v36  ;;  %v1659_v3 = vpop.f32.mrb[15].mxu0 }
 0x375   : > { %v5313_v2 = vpop.eup %5312  ;;  %vm1691_vm13 = vcmp.gt.f32.partialorder %v1641_v40, 0.0  ;;  %v1707_v47 = vmul.f32 0.2, %v1641_v40  ;;  %vm1694_vm14 = vcmp.gt.f32.partialorder %v1652_v43, 0.0  ;;  %v1710_v51 = vmul.f32 0.2, %v1652_v43 }
 0x376   : > { %v1892_v8 = vpack.c.bf16 %v1488_v7, %v1487_v6  ;;  %1014 = vperm.xlu0 %5216, %v5313_v2   ;;  %v5786_v50 = vsel %vm1693_vm12, %v1649_v36, %v1709_v42  ;;  %vm1692_vm15 = vcmp.gt.f32.partialorder %v1644_v49, 0.0  ;;  %v1708_v53 = vmul.f32 0.2, %v1644_v49  ;;  %v4975_v14 = vpop.f32.mrb[16].mxu0 }
 0x377   : > { %v5788_v52 = vsel %vm1691_vm13, %v1641_v40, %v1707_v47  ;;  %v5790_v55 = vsel %vm1694_vm14, %v1652_v43, %v1710_v51  ;;  %v1665_v56 = vadd.f32 %v4971_v54, %v5754_v17  ;;  %v1657_v59 = vadd.f32 %v5754_v17, %v1656_v57 }
 0x378   : > { %5014 = vmatmul.mubr.msk.bf16.gmra.mrb[32].mxu0 %vm836_vm4, %v1892_v8  ;;  %v1738_v58 = vpack.c.bf16 %v5790_v55, %v5786_v50  ;;  %v5795_v9 = vsel %vm1692_vm15, %v1644_v49, %v1708_v53  ;;  %v1668_v0 = vadd.f32 %v4972_v62, %v5754_v17  ;;  %v1660_v4 = vadd.f32 %v5754_v17, %v1659_v3 }
 0x379   : > { %v5315_v12 = vpop.eup %5314  ;;  %5061 = vmatprep.mubr.msk.bf16.mxu0 %vm5425_vm0, %v5424_v1  ;;  %v1737_v60 = vpack.c.bf16 %v5795_v9, %v5788_v52  ;;  %vm1697_vm2 = vcmp.gt.f32.partialorder %v1665_v56, 0.0  ;;  %v1713_v61 = vmul.f32 0.2, %v1665_v56  ;;  %vm1695_vm3 = vcmp.gt.f32.partialorder %v1657_v59, 0.0 }
 0x37a   : > { %v5317_v13 = vpop.eup %5316  ;;  %1077 = vperm.xlu0 %5216, %v5315_v12   ;;  %v1711_v63 = vmul.f32 0.2, %v1657_v59  ;;  %vm1698_vm5 = vcmp.gt.f32.partialorder %v1668_v0, 0.0  ;;  %v1714_v6 = vmul.f32 0.2, %v1668_v0  ;;  %vm1696_vm6 = vcmp.gt.f32.partialorder %v1660_v4, 0.0 }
 0x37b   : > { %1019 = vperm.xlu1 %5217, %v5317_v13   ;;  %v5802_v5 = vsel %vm1697_vm2, %v1665_v56, %v1713_v61  ;;  %v1712_v2 = vmul.f32 0.2, %v1660_v4  ;;  %v1681_v15 = vadd.f32 %v4975_v14, %v5754_v17  ;;  %vm1042_vm12 = vcmask 523520  }
 0x37c   : > { %v5804_v7 = vsel %vm1695_vm3, %v1657_v59, %v1711_v63  ;;  %v5806_v8 = vsel %vm1698_vm5, %v1668_v0, %v1714_v6  ;;  %vm1089_vm13 = vcmask 1041409  }
 0x37d   : > { %v5319_v16 = vpop.eup %5318  ;;  %v1740_v11 = vpack.c.bf16 %v5806_v8, %v5802_v5  ;;  %v5810_v12 = vsel %vm1696_vm6, %v1660_v4, %v1712_v2  ;;  %vm1701_vm8 = vcmp.gt.f32.partialorder %v1681_v15, 0.0  ;;  %v1717_v20 = vmul.f32 0.2, %v1681_v15 }
 0x37e   : > { %v1739_v13 = vpack.c.bf16 %v5810_v12, %v5804_v7 }
 0x37f   : > { %1082 = vperm.xlu1 %5217, %v5319_v16   ;;  %v1672_v16 = vpop.f32.mrb[17].mxu0  ;;  %v5818_v24 = vsel %vm1701_vm8, %v1681_v15, %v1717_v20 }
 0x380   : > { %v1673_v18 = vadd.f32 %v5754_v17, %v1672_v16  ;;  %v4976_v19 = vpop.f32.mrb[18].mxu0 }
 0x381   : > { %v1684_v21 = vadd.f32 %v4976_v19, %v5754_v17  ;;  %v1675_v22 = vpop.f32.mrb[19].mxu0 }
 0x382   : > { %vm1699_vm9 = vcmp.gt.f32.partialorder %v1673_v18, 0.0  ;;  %v1715_v10 = vmul.f32 0.2, %v1673_v18  ;;  %v1676_v23 = vadd.f32 %v5754_v17, %v1675_v22 }
 0x383   : > { %vm1702_vm10 = vcmp.gt.f32.partialorder %v1684_v21, 0.0  ;;  %v1718_v25 = vmul.f32 0.2, %v1684_v21 }
 0x384   : > { %v5820_v26 = vsel %vm1699_vm9, %v1673_v18, %v1715_v10  ;;  %vm1700_vm11 = vcmp.gt.f32.partialorder %v1676_v23, 0.0  ;;  %v1716_v29 = vmul.f32 0.2, %v1676_v23 }
 0x385   : > { %v5822_v30 = vsel %vm1702_vm10, %v1684_v21, %v1718_v25 }
 0x386   : > { %v1742_v31 = vpack.c.bf16 %v5822_v30, %v5818_v24  ;;  %v5826_v36 = vsel %vm1700_vm11, %v1676_v23, %v1716_v29 }
 0x387   : > { %v1741_v37 = vpack.c.bf16 %v5826_v36, %v5820_v26 }
 0x3db   : > { %v970_v40 = vpop.permute.xlu0 %969 }
 0x3dc   : > { %v977_v43 = vmul.f32 %v970_v40, %v5609_v45 }
 0x3de   : > { %v979_v53 = vsel %vm836_vm4, %v977_v43, 0.0 }
 0x3df   : > { %v1033_v17 = vpop.permute.xlu0 %1032  ;;  %v980_v59 = vrot.slane %v979_v53, 4 }
 0x3e0   : > { %v975_v41 = vpop.permute.xlu1 %974  ;;  %v1040_v46 = vmul.f32 %v1033_v17, %v5609_v45 }
 0x3e1   : > { %v978_v42 = vmul.f32 %v975_v41, %v5612_v48  ;;  %v981_v0 = vadd.f32 %v980_v59, %v979_v53 }
 0x3e2   : > { %v1043_v54 = vsel %vm1042_vm12, %v1040_v46, 0.0 }
 0x3e3   : > { %v986_v47 = vsel %vm836_vm4, %v978_v42, 0.0  ;;  %v1044_v61 = vrot.slane %v1043_v54, 4  ;;  %v982_v45 = vrot.slane %v981_v0, 2 }
 0x3e4   : > { %v1038_v49 = vpop.permute.xlu1 %1037  ;;  %v987_v56 = vrot.slane %v986_v47, 4 }
 0x3e5   : > { %v1041_v51 = vmul.f32 %v1038_v49, %v5612_v48  ;;  %v1045_v3 = vadd.f32 %v1044_v61, %v1043_v54  ;;  %v983_v16 = vadd.f32 %v982_v45, %v981_v0 }
 0x3e6   : > { %v988_v63 = vadd.f32 %v987_v56, %v986_v47 }
 0x3e7   : > { %v1050_v57 = vsel %vm1042_vm12, %v1041_v51, 0.0  ;;  %v1046_v2 = vrot.slane %v1045_v3, 2  ;;  %v984_v21 = vrot.slane %v983_v16, 1 }
 0x3e8   : > { %v1051_v62 = vrot.slane %v1050_v57, 4  ;;  %v989_v6 = vrot.slane %v988_v63, 2 }
 0x3e9   : > { %v1047_v18 = vadd.f32 %v1046_v2, %v1045_v3  ;;  %v985_v40 = vadd.f32 %v984_v21, %v983_v16 }
 0x3ea   : > { %v1052_v4 = vadd.f32 %v1051_v62, %v1050_v57  ;;  %v990_v15 = vadd.f32 %v989_v6, %v988_v63  ;;  %v5250_v57 = vld [vmem:[%s6579_s10 + $0x98] sm:$0xff]  }
 0x3eb   : > { %v1048_v22 = vrot.slane %v1047_v18, 1 }
 0x3ec   : > { %v1053_v14 = vrot.slane %v1052_v4, 2  ;;  %v991_v20 = vrot.slane %v990_v15, 1 }
 0x3ed   : > { %v1049_v17 = vadd.f32 %v1048_v22, %v1047_v18 }
 0x3ee   : > { %v1054_v48 = vadd.f32 %v1053_v14, %v1052_v4  ;;  %v992_v25 = vadd.f32 %v991_v20, %v990_v15  ;;  %v5912_v4 = vld [vmem:[%s6580_s11 + $0x8] ss:$0 sm:$0xff] }
 0x3f0   : > { %v1055_v10 = vrot.slane %v1054_v48, 1 }
 0x3f2   : > { %v1056_v42 = vadd.f32 %v1055_v10, %v1054_v48 }
 0x3f5   : > { %v1015_v19 = vpop.permute.xlu0 %1014 }
 0x3f6   : > { %v1022_v46 = vmul.f32 %v1015_v19, %v985_v40 }
 0x3f9   : > { %v1078_v29 = vpop.permute.xlu0 %1077 }
 0x3fa   : > { %v1020_v23 = vpop.permute.xlu1 %1019  ;;  %v1085_v47 = vmul.f32 %v1078_v29, %v1049_v17 }
 0x3fb   : > { %v1023_v41 = vmul.f32 %v1020_v23, %v992_v25 }
 0x3fd   : > { %v1090_v51 = vsel %vm1089_vm13, %v1023_v41, %v1022_v46 }
 0x3fe   : > { %v1083_v43 = vpop.permute.xlu1 %1082 }
 0x3ff   : > { %v1086_v49 = vmul.f32 %v1083_v43, %v1056_v42 }
 0x401   : > { %v1094_v53 = vsel %vm1089_vm13, %v1086_v49, %v1085_v47 }
 0x402   : > { %v1096_v54 = vsel %vm836_vm4, %v1090_v51, %v1094_v53 }
 0x403   : > { %v1097_v56 = vpack.c.bf16 %v1096_v54, %v1096_v54 }
 0x405   : > { %4950 = vmatmul.mubr.msk.bf16.vlgmr.msra.gmra.mrb[8].mxu1 %vm686_vm1, %v1097_v56 }
 0x406   : > { %4978 = vmatpush3.bf16.msra.mxu1 %v5771_v32  ;;  %4981 = vmatprep.mubr.msk.bf16.mxu1 %vm836_vm4, %v1735_v39 }
 0x407   : > { %4979 = vmatprep.subr.bf16.mxu1 %v5250_v57 }
 0x40a   : > { %4980 = vmatpush3.bf16.msra.mxu1 %v5250_v57 }
 0x40b   : > { %5017 = vmatprep.subr.bf16.mxu1 %v5424_v1 }
 0x40d   : > { %4982 = vmatmul.mubr.msk.bf16.vlgmr.msra.gmra.mrb[12].mxu1 %vm836_vm4, %v1736_v38 }
 0x40e   : > { %4985 = vmatprep.mubr.msk.bf16.mxu1 %vm836_vm4, %v1737_v60 }
 0x415   : > { %4986 = vmatmul.mubr.msk.bf16.gmra.mrb[16].mxu1 %vm836_vm4, %v1738_v58 }
 0x416   : > { %4989 = vmatprep.mubr.msk.bf16.mxu1 %vm836_vm4, %v1739_v13 }
 0x41d   : > { %4990 = vmatmul.mubr.msk.bf16.gmra.mrb[20].mxu1 %vm836_vm4, %v1740_v11  ;;  %v4691_v11 = vld [vmem:[%s6580_s11 + $0xa] ss:$0 sm:$0xff] }
 0x41e   : > { %4993 = vmatprep.mubr.msk.bf16.mxu1 %vm836_vm4, %v1741_v37 }
 0x425   : > { %4994 = vmatmul.mubr.msk.bf16.gmra.mrb[24].mxu1 %vm836_vm4, %v1742_v31 }
 0x426   : > { %5021 = vmatprep.mubr.msk.bf16.mxu1 %vm5425_vm0, %v5424_v1 }
 0x433   : > { %v5003_v27 = vpop.f32.mrb[20].mxu0 }
 0x434   : > { %v1967_v28 = vpop.f32.mrb[21].mxu0 }
 0x435   : > { %v5004_v32 = vpop.f32.mrb[22].mxu0  ;;  %2046 = vrot.lane.b32.xlu0 %v1967_v28, %s5429_s29 }
 0x436   : > { %v1970_v34 = vpop.f32.mrb[23].mxu0 }
 0x437   : > { %2048 = vrot.lane.b32.xlu1 %v1970_v34, %s5429_s29 }
 0x43b   : > { %v5007_v35 = vpop.f32.mrb[24].mxu0 }
 0x43c   : > { %v1983_v38 = vpop.f32.mrb[25].mxu0 }
 0x43d   : > { %v5008_v39 = vpop.f32.mrb[26].mxu0 }
 0x43e   : > { %v1986_v50 = vpop.f32.mrb[27].mxu0 }
 0x443   : > { %v5011_v52 = vpop.f32.mrb[28].mxu0 }
 0x444   : > { %v1999_v55 = vpop.f32.mrb[29].mxu0 }
 0x445   : > { %2062 = vrot.lane.b32.xlu0 %v1999_v55, %s5429_s29  ;;  %v5012_v58 = vpop.f32.mrb[30].mxu0 }
 0x446   : > { %v2002_v9 = vpop.f32.mrb[31].mxu0 }
 0x447   : > { %2064 = vrot.lane.b32.xlu1 %v2002_v9, %s5429_s29 }
 0x449   : > { %2050 = vrot.lane.b32.xlu0 %v5003_v27, %s5429_s29 }
 0x44b   : > { %2066 = vrot.lane.b32.xlu1 %v5011_v52, %s5429_s29  ;;  %v5015_v60 = vpop.f32.mrb[32].mxu0 }
 0x44c   : > { %v2015_v5 = vpop.f32.mrb[33].mxu0 }
 0x44d   : > { %2052 = vrot.lane.b32.xlu0 %v5004_v32, %s5429_s29  ;;  %v5016_v7 = vpop.f32.mrb[34].mxu0 }
 0x44e   : > { %v2018_v8 = vpop.f32.mrb[35].mxu0 }
 0x44f   : > { %2068 = vrot.lane.b32.xlu1 %v5012_v58, %s5429_s29 }
 0x451   : > { %2054 = vrot.lane.b32.xlu0 %v1983_v38, %s5429_s29 }
 0x453   : > { %2070 = vrot.lane.b32.xlu1 %v2015_v5, %s5429_s29 }
 0x455   : > { %2056 = vrot.lane.b32.xlu0 %v1986_v50, %s5429_s29 }
 0x457   : > { %2072 = vrot.lane.b32.xlu1 %v2018_v8, %s5429_s29 }
 0x459   : > { %2058 = vrot.lane.b32.xlu0 %v5007_v35, %s5429_s29 }
 0x45b   : > { %2074 = vrot.lane.b32.xlu1 %v5015_v60, %s5429_s29 }
 0x45d   : > { %2164 = vrot.lane.b32.xlu0 %v4691_v11, %s5429_s29 }
 0x45f   : > { %2060 = vrot.lane.b32.xlu1 %v5008_v39, %s5429_s29 }
 0x461   : > { %2076 = vrot.lane.b32.xlu0 %v5016_v7, %s5429_s29 }
 0x4a7   : > { %v2047_v12 = vpop.permute.xlu0 %2046 }
 0x4a9   : > { %v2049_v26 = vpop.permute.xlu1 %2048 }
 0x4b7   : > { %v5899_v13 = vpop.permute.xlu0 %2062 }
 0x4b9   : > { %v5901_v31 = vpop.permute.xlu1 %2064 }
 0x4bb   : > { %v2051_v24 = vpop.permute.xlu0 %2050 }
 0x4bd   : > { %v5903_v37 = vpop.permute.xlu1 %2066 }
 0x4bf   : > { %v2053_v30 = vpop.permute.xlu0 %2052 }
 0x4c1   : > { %v5907_v3 = vpop.permute.xlu1 %2068 }
 0x4c3   : > { %v2055_v36 = vpop.permute.xlu0 %2054 }
 0x4c5   : > { %v5924_v20 = vpop.permute.xlu1 %2070 }
 0x4c7   : > { %v2057_v63 = vpop.permute.xlu0 %2056 }
 0x4c9   : > { %v5935_v51 = vpop.permute.xlu1 %2072 }
 0x4cb   : > { %v2059_v45 = vpop.permute.xlu0 %2058 }
 0x4cd   : > { %v2075_v50 = vpop.permute.xlu1 %2074 }
 0x4cf   : > { %v5932_v40 = vpop.permute.xlu0 %2164 }
 0x4d8   : > { %v5905_v59 = vpop.f32.mrb[8].mxu1 }
 0x4d9   : > { %v4951_v61 = vpop.f32.mrb[9].mxu1 }
 0x4da   : > { %v1175_v62 = vpop.f32.mrb[10].mxu1 }
 0x4db   : > { %v4952_v0 = vpop.f32.mrb[11].mxu1 }
 0x4e0   : > { %v4983_v6 = vpop.f32.mrb[12].mxu1 }
 0x4e1   : > { %v5915_v2 = vadd.f32 %v4983_v6, %v5912_v4  ;;  %v1822_v14 = vpop.f32.mrb[13].mxu1 }
 0x4e2   : > { %v5918_v15 = vadd.f32 %v5912_v4, %v1822_v14  ;;  %v4984_v16 = vpop.f32.mrb[14].mxu1  ;;  %v2061_v14 = vpop.permute.xlu1 %2060 }
 0x4e3   : > { %v2096_v18 = vadd.f32 %v2051_v24, %v5915_v2  ;;  %v5922_v48 = vadd.f32 %v4984_v16, %v5912_v4  ;;  %v1825_v19 = vpop.f32.mrb[15].mxu1 }
 0x4e4   : > { %v2094_v21 = vadd.f32 %v2047_v12, %v5918_v15  ;;  %v5928_v22 = vadd.f32 %v5912_v4, %v1825_v19 }
 0x4e5   : > { %vm2112_vm14 = vcmp.gt.f32.partialorder %v2096_v18, 0.0  ;;  %v2128_v10 = vmul.f32 0.2, %v2096_v18  ;;  %v2097_v23 = vadd.f32 %v2053_v30, %v5922_v48 }
 0x4e6   : > { %vm2110_vm15 = vcmp.gt.f32.partialorder %v2094_v21, 0.0  ;;  %v2126_v25 = vmul.f32 0.2, %v2094_v21  ;;  %v2095_v29 = vadd.f32 %v2049_v26, %v5928_v22 }
 0x4e7   : > { %v2144_v17 = vsel %vm2112_vm14, %v2096_v18, %v2128_v10  ;;  %v2129_v46 = vmul.f32 0.2, %v2097_v23  ;;  %vm2113_vm3 = vcmp.gt.f32.partialorder %v2097_v23, 0.0 }
 0x4e8   : > { %vm2111_vm2 = vcmp.gt.f32.partialorder %v2095_v29, 0.0  ;;  %v2127_v41 = vmul.f32 0.2, %v2095_v29  ;;  %v4987_v42 = vpop.f32.mrb[16].mxu1  ;;  %v2169_v43 = vmul.f32 %v5932_v40, %v2144_v17  ;;  %v2142_v49 = vsel %vm2110_vm15, %v2094_v21, %v2126_v25 }
 0x4e9   : > { %v1838_v47 = vpop.f32.mrb[17].mxu1  ;;  %v2167_v34 = vmul.f32 %v5932_v40, %v2142_v49  ;;  %v2145_v35 = vsel %vm2113_vm3, %v2097_v23, %v2129_v46  ;;  %v5951_v52 = vadd.f32 %v4987_v42, %v5912_v4 }
 0x4ea   : > { %v5938_v53 = vadd.f32 %v5912_v4, %v1838_v47  ;;  %2203 = vrot.lane.b32.xlu1 %v2169_v43, %s5428_s23  ;;  %v4988_v54 = vpop.f32.mrb[18].mxu1  ;;  %v2143_v56 = vsel %vm2111_vm2, %v2095_v29, %v2127_v41  ;;  %v2170_v58 = vmul.f32 %v5932_v40, %v2145_v35 }
 0x4eb   : > { %v1841_v57 = vpop.f32.mrb[19].mxu1  ;;  %v2168_v27 = vmul.f32 %v5932_v40, %v2143_v56  ;;  %v5962_v12 = vadd.f32 %v4988_v54, %v5912_v4 }
 0x4ec   : > { %v2098_v28 = vadd.f32 %v2055_v36, %v5938_v53  ;;  %v5944_v32 = vadd.f32 %v5912_v4, %v1841_v57  ;;  %v2100_v36 = vadd.f32 %v2059_v45, %v5951_v52 }
 0x4ed   : > { %2201 = vrot.lane.b32.xlu0 %v2168_v27, %s5428_s23 }
 0x4ee   : > { %vm2114_vm5 = vcmp.gt.f32.partialorder %v2098_v28, 0.0  ;;  %v2130_v38 = vmul.f32 0.2, %v2098_v28  ;;  %v2099_v39 = vadd.f32 %v2057_v63, %v5944_v32  ;;  %2199 = vrot.lane.b32.xlu1 %v2167_v34, %s5428_s23  ;;  %vm2116_vm11 = vcmp.gt.f32.partialorder %v2100_v36, 0.0 }
 0x4ef   : > { %v2132_v21 = vmul.f32 0.2, %v2100_v36 }
 0x4f0   : > { %v4991_v55 = vpop.f32.mrb[20].mxu1  ;;  %v2131_v9 = vmul.f32 0.2, %v2099_v39  ;;  %v2146_v7 = vsel %vm2114_vm5, %v2098_v28, %v2130_v38  ;;  %vm2115_vm6 = vcmp.gt.f32.partialorder %v2099_v39, 0.0 }
 0x4f1   : > { %v5955_v60 = vadd.f32 %v4991_v55, %v5912_v4  ;;  %v1854_v5 = vpop.f32.mrb[21].mxu1  ;;  %v2171_v63 = vmul.f32 %v5932_v40, %v2146_v7  ;;  %v2148_v57 = vsel %vm2116_vm11, %v2100_v36, %v2132_v21  ;;  %vm2878_vm11 = vcmask 1046534  }
 0x4f2   : > { %v5958_v8 = vadd.f32 %v5912_v4, %v1854_v5  ;;  %v4992_v11 = vpop.f32.mrb[22].mxu1  ;;  %2205 = vrot.lane.b32.xlu1 %v2170_v58, %s5428_s23  ;;  %v2077_v5 = vpop.permute.xlu0 %2076 }
 0x4f3   : > { %v2104_v24 = vadd.f32 %v5903_v37, %v5955_v60  ;;  %v5967_v26 = vadd.f32 %v4992_v11, %v5912_v4  ;;  %v1857_v30 = vpop.f32.mrb[23].mxu1  ;;  %v2147_v37 = vsel %vm2115_vm6, %v2099_v39, %v2131_v9  ;;  %v2173_v39 = vmul.f32 %v5932_v40, %v2148_v57 }
 0x4f4   : > { %v2102_v61 = vadd.f32 %v5899_v13, %v5958_v8  ;;  %v5973_v62 = vadd.f32 %v5912_v4, %v1857_v30  ;;  %v2101_v13 = vadd.f32 %v2061_v14, %v5962_v12  ;;  %vm2870_vm6 = vcmask 1042434  }
 0x4f5   : > { %vm2120_vm8 = vcmp.gt.f32.partialorder %v2104_v24, 0.0  ;;  %v2136_v0 = vmul.f32 0.2, %v2104_v24  ;;  %v2105_v6 = vadd.f32 %v5907_v3, %v5967_v26  ;;  %v2172_v3 = vmul.f32 %v5932_v40, %v2147_v37 }
 0x4f6   : > { %vm2118_vm9 = vcmp.gt.f32.partialorder %v2102_v61, 0.0  ;;  %v2134_v16 = vmul.f32 0.2, %v2102_v61  ;;  %v2103_v45 = vadd.f32 %v5901_v31, %v5973_v62  ;;  %2207 = vrot.lane.b32.xlu1 %v2171_v63, %s5428_s23  ;;  %vm2117_vm14 = vcmp.gt.f32.partialorder %v2101_v13, 0.0 }
 0x4f7   : > { %vm2121_vm10 = vcmp.gt.f32.partialorder %v2105_v6, 0.0  ;;  %v2137_v18 = vmul.f32 0.2, %v2105_v6  ;;  %v2152_v19 = vsel %vm2120_vm8, %v2104_v24, %v2136_v0  ;;  %v2133_v49 = vmul.f32 0.2, %v2101_v13 }
 0x4f8   : > { %v4995_v10 = vpop.f32.mrb[24].mxu1  ;;  %v2177_v23 = vmul.f32 %v5932_v40, %v2152_v19  ;;  %v2135_v25 = vmul.f32 0.2, %v2103_v45  ;;  %v2150_v41 = vsel %vm2118_vm9, %v2102_v61, %v2134_v16  ;;  %vm2119_vm12 = vcmp.gt.f32.partialorder %v2103_v45, 0.0 }
 0x4f9   : > { %v5985_v29 = vadd.f32 %v4995_v10, %v5912_v4  ;;  %v1870_v17 = vpop.f32.mrb[25].mxu1  ;;  %v2153_v31 = vsel %vm2121_vm10, %v2105_v6, %v2137_v18  ;;  %v2175_v56 = vmul.f32 %v5932_v40, %v2150_v41  ;;  %vm2872_vm8 = vcmask 1043459  }
 0x4fa   : > { %v5989_v42 = vadd.f32 %v5912_v4, %v1870_v17  ;;  %v4996_v43 = vpop.f32.mrb[26].mxu1  ;;  %2219 = vrot.lane.b32.xlu0 %v2177_v23, %s5428_s23  ;;  %2209 = vrot.lane.b32.xlu1 %v2172_v3, %s5428_s23  ;;  %v2178_v54 = vmul.f32 %v5932_v40, %v2153_v31  ;;  %v2151_v35 = vsel %vm2119_vm12, %v2103_v45, %v2135_v25  ;;  %vm2874_vm9 = vcmask 1044484  }
 0x4fb   : > { %v2108_v46 = vadd.f32 %v2075_v50, %v5985_v29  ;;  %v1873_v47 = vpop.f32.mrb[27].mxu1  ;;  %v2176_v38 = vmul.f32 %v5932_v40, %v2151_v35  ;;  %v2149_v50 = vsel %vm2117_vm14, %v2101_v13, %v2133_v49  ;;  %v6008_v58 = vadd.f32 %v4996_v43, %v5912_v4 }
 0x4fc   : > { %v2106_v28 = vadd.f32 %v5924_v20, %v5989_v42  ;;  %v6000_v34 = vadd.f32 %v5912_v4, %v1873_v47  ;;  %v2174_v11 = vmul.f32 %v5932_v40, %v2149_v50  ;;  %vm2876_vm10 = vcmask 1045509  }
 0x4fd   : > { %v2140_v27 = vmul.f32 0.2, %v2108_v46  ;;  %vm2124_vm15 = vcmp.gt.f32.partialorder %v2108_v46, 0.0  ;;  %v2109_v24 = vadd.f32 %v2077_v5, %v6008_v58  ;;  %v6044_v5 = vld [vmem:[%s6580_s11 + $0xb] ss:$0 sm:$0xff]  ;;  %vm2880_vm12 = vcmask 1047559  }
 0x4fe   : > { %2221 = vrot.lane.b32.xlu0 %v2178_v54, %s5428_s23  ;;  %2215 = vrot.lane.b32.xlu1 %v2175_v56, %s5428_s23  ;;  %v2138_v55 = vmul.f32 0.2, %v2106_v28  ;;  %v2107_v20 = vadd.f32 %v5935_v51, %v6000_v34  ;;  %vm2122_vm2 = vcmp.gt.f32.partialorder %v2106_v28, 0.0 }
 0x4ff   : > { %v2156_v9 = vsel %vm2124_vm15, %v2108_v46, %v2140_v27  ;;  %v2141_v51 = vmul.f32 0.2, %v2109_v24  ;;  %vm2125_vm5 = vcmp.gt.f32.partialorder %v2109_v24, 0.0 }
 0x500   : > { %v2181_v7 = vmul.f32 %v5932_v40, %v2156_v9  ;;  %v2139_v30 = vmul.f32 0.2, %v2107_v20  ;;  %v2154_v36 = vsel %vm2122_vm2, %v2106_v28, %v2138_v55  ;;  %vm2123_vm3 = vcmp.gt.f32.partialorder %v2107_v20, 0.0 }
 0x501   : > { %v2179_v4 = vmul.f32 %v5932_v40, %v2154_v36  ;;  %v2157_v0 = vsel %vm2125_vm5, %v2109_v24, %v2141_v51  ;;  %vm3301_vm2 = vcmask 785408  }
 0x502   : > { %2217 = vrot.lane.b32.xlu0 %v2176_v38, %s5428_s23  ;;  %2211 = vrot.lane.b32.xlu1 %v2173_v39, %s5428_s23  ;;  %v2155_v61 = vsel %vm2123_vm3, %v2107_v20, %v2139_v30  ;;  %v2182_v6 = vmul.f32 %v5932_v40, %v2157_v0 }
 0x503   : > { %v2180_v63 = vmul.f32 %v5932_v40, %v2155_v61 }
 0x506   : > { %2227 = vrot.lane.b32.xlu0 %v2181_v7, %s5428_s23  ;;  %2213 = vrot.lane.b32.xlu1 %v2174_v11, %s5428_s23 }
 0x50a   : > { %2223 = vrot.lane.b32.xlu0 %v2179_v4, %s5428_s23 }
 0x50e   : > { %2225 = vrot.lane.b32.xlu0 %v2180_v63, %s5428_s23 }
 0x512   : > { %2229 = vrot.lane.b32.xlu0 %v2182_v6, %s5428_s23 }
 0x55c   : > { %v2204_v37 = vpop.permute.xlu1 %2203 }
 0x55d   : > { %v2253_v14 = vsel %vm836_vm4, %v2204_v37, 0.0 }
 0x55e   : > { %2254 = vadd.xlane.f32.xlu0 %v2253_v14 }
 0x55f   : > { %v2202_v19 = vpop.permute.xlu0 %2201 }
 0x560   : > { %v2200_v16 = vpop.permute.xlu1 %2199  ;;  %v2250_v10 = vsel %vm836_vm4, %v2202_v19, 0.0 }
 0x561   : > { %v2247_v45 = vsel %vm836_vm4, %v2200_v16, 0.0 }
 0x562   : > { %2248 = vadd.xlane.f32.xlu1 %v2247_v45 }
 0x564   : > { %v2206_v13 = vpop.permute.xlu1 %2205 }
 0x565   : > { %v2256_v18 = vsel %vm836_vm4, %v2206_v13, 0.0  ;;  %v5400_v13 = vld [vmem:[%s5655_s30 + $0x10] sm:$0xff] }
 0x566   : > { %2257 = vadd.xlane.f32.xlu0 %v2256_v18 }
 0x568   : > { %v2208_v21 = vpop.permute.xlu1 %2207 }
 0x569   : > { %v2259_v25 = vsel %vm836_vm4, %v2208_v21, 0.0 }
 0x56a   : > { %2251 = vadd.xlane.f32.xlu0 %v2250_v10 }
 0x56c   : > { %v2220_v40 = vpop.permute.xlu0 %2219  ;;  %v2210_v23 = vpop.permute.xlu1 %2209 }
 0x56d   : > { %v2277_v3 = vsel %vm836_vm4, %v2220_v40, 0.0  ;;  %v2262_v43 = vsel %vm836_vm4, %v2210_v23, 0.0 }
 0x56e   : > { %2278 = vadd.xlane.f32.xlu1 %v2277_v3  ;;  %2260 = vadd.xlane.f32.xlu0 %v2259_v25 }
 0x570   : > { %v2222_v17 = vpop.permute.xlu0 %2221  ;;  %v2216_v31 = vpop.permute.xlu1 %2215 }
 0x571   : > { %v2280_v41 = vsel %vm836_vm4, %v2222_v17, 0.0  ;;  %v2271_v54 = vsel %vm836_vm4, %v2216_v31, 0.0  ;;  %v5401_v31 = vld [vmem:[%s5655_s30] sm:$0xff] }
 0x572   : > { %2281 = vadd.xlane.f32.xlu1 %v2280_v41  ;;  %2263 = vadd.xlane.f32.xlu0 %v2262_v43 }
 0x574   : > { %v2218_v46 = vpop.permute.xlu0 %2217  ;;  %v2212_v47 = vpop.permute.xlu1 %2211 }
 0x575   : > { %v2274_v49 = vsel %vm836_vm4, %v2218_v46, 0.0  ;;  %v2265_v27 = vsel %vm836_vm4, %v2212_v47, 0.0 }
 0x576   : > { %2275 = vadd.xlane.f32.xlu1 %v2274_v49  ;;  %2272 = vadd.xlane.f32.xlu0 %v2271_v54 }
 0x578   : > { %v2228_v56 = vpop.permute.xlu0 %2227  ;;  %v2214_v28 = vpop.permute.xlu1 %2213 }
 0x579   : > { %v2289_v57 = vsel %vm836_vm4, %v2228_v56, 0.0  ;;  %v2268_v39 = vsel %vm836_vm4, %v2214_v28, 0.0 }
 0x57a   : > { %2290 = vadd.xlane.f32.xlu1 %v2289_v57  ;;  %2266 = vadd.xlane.f32.xlu0 %v2265_v27 }
 0x57c   : > { %v2224_v35 = vpop.permute.xlu0 %2223 }
 0x57d   : > { %v2283_v38 = vsel %vm836_vm4, %v2224_v35, 0.0  ;;  %v5402_v35 = vld [vmem:[%s5655_s30 + $0x18] sm:$0xff] }
 0x57e   : > { %2284 = vadd.xlane.f32.xlu1 %v2283_v38  ;;  %2269 = vadd.xlane.f32.xlu0 %v2268_v39 }
 0x580   : > { %v2226_v50 = vpop.permute.xlu0 %2225 }
 0x581   : > { %v2286_v55 = vsel %vm836_vm4, %v2226_v50, 0.0 }
 0x582   : > { %2287 = vadd.xlane.f32.xlu1 %v2286_v55 }
 0x584   : > { %v2230_v20 = vpop.permute.xlu0 %2229 }
 0x585   : > { %v2292_v9 = vsel %vm836_vm4, %v2230_v20, 0.0 }
 0x586   : > { %2293 = vadd.xlane.f32.xlu1 %v2292_v9 }
 0x5eb   : > { %v2255_v7 = vpop.xlane.xlu0 %2254 }
 0x5ec   : > { %v2302_v11 = vadd.f32 %v6044_v5, %v2255_v7 }
 0x5ee   : > { %v2320_v24 = vmul.f32 1.442695, %v2302_v11 }
 0x5ef   : > { %v2249_v30 = vpop.xlane.xlu1 %2248 }
 0x5f0   : > { %5320 = vpow2.f32 %v2320_v24  ;;  %v2300_v36 = vadd.f32 %v6044_v5, %v2249_v30  ;;  %v5403_v30 = vld [vmem:[%s5655_s30 + $0x8] sm:$0xff] }
 0x5f2   : > { %v2316_v4 = vmul.f32 1.442695, %v2300_v36 }
 0x5f3   : > { %v2258_v51 = vpop.xlane.xlu0 %2257 }
 0x5f4   : > { %5322 = vpow2.f32 %v2316_v4  ;;  %v2303_v61 = vadd.f32 %v6044_v5, %v2258_v51 }
 0x5f6   : > { %v2322_v63 = vmul.f32 1.442695, %v2303_v61 }
 0x5f7   : > { %v2252_v0 = vpop.xlane.xlu0 %2251 }
 0x5f8   : > { %5324 = vpow2.f32 %v2322_v63  ;;  %v2301_v6 = vadd.f32 %v6044_v5, %v2252_v0 }
 0x5fa   : > { %v5321_v37 = vpop.eup %5320  ;;  %v2318_v14 = vmul.f32 1.442695, %v2301_v6 }
 0x5fb   : > { %v2261_v16 = vpop.xlane.xlu0 %2260  ;;  %v2279_v45 = vpop.xlane.xlu1 %2278  ;;  %v2350_v18 = vmul.f32 %v5400_v13, %v5321_v37 }
 0x5fc   : > { %5326 = vpow2.f32 %v2318_v14  ;;  %v2304_v19 = vadd.f32 %v6044_v5, %v2261_v16  ;;  %v2310_v21 = vadd.f32 %v6044_v5, %v2279_v45 }
 0x5fd   : > { %v2586_v10 = vsel %vm993_vm7, %v2350_v18, 0.0  ;;  %2376 = vperm.xlu1 %5217, %v2350_v18  }
 0x5fe   : > { %v5323_v40 = vpop.eup %5322  ;;  %v2324_v23 = vmul.f32 1.442695, %v2304_v19  ;;  %v2336_v3 = vmul.f32 1.442695, %v2310_v21  ;;  %v2587_v43 = vrot.slane %v2586_v10, 4 }
 0x5ff   : > { %v2264_v25 = vpop.xlane.xlu0 %2263  ;;  %v2282_v17 = vpop.xlane.xlu1 %2281  ;;  %v2348_v41 = vmul.f32 %v5401_v31, %v5323_v40 }
 0x600   : > { %5328 = vpow2.f32 %v2324_v23  ;;  %v2305_v46 = vadd.f32 %v6044_v5, %v2264_v25  ;;  %v2311_v47 = vadd.f32 %v6044_v5, %v2282_v17  ;;  %v2588_v39 = vadd.f32 %v2587_v43, %v2586_v10  ;;  %v5404_v10 = vld [vmem:[%s5655_s30 + $0x20] sm:$0xff]  ;;  %v5405_v43 = vld [vmem:[%s5655_s30 + $0x50] sm:$0xff] }
 0x601   : > { %5330 = vpow2.f32 %v2336_v3  ;;  %2366 = vperm.xlu0 %5216, %v2348_v41   ;;  %v2572_v49 = vsel %vm993_vm7, %v2348_v41, 0.0 }
 0x602   : > { %v5325_v54 = vpop.eup %5324  ;;  %v2326_v56 = vmul.f32 1.442695, %v2305_v46  ;;  %v2338_v57 = vmul.f32 1.442695, %v2311_v47  ;;  %v2573_v50 = vrot.slane %v2572_v49, 4  ;;  %v2589_v4 = vrot.slane %v2588_v39, 2 }
 0x603   : > { %v2273_v27 = vpop.xlane.xlu0 %2272  ;;  %v2276_v28 = vpop.xlane.xlu1 %2275  ;;  %v2351_v38 = vmul.f32 %v5402_v35, %v5325_v54 }
 0x604   : > { %5332 = vpow2.f32 %v2338_v57  ;;  %v2309_v55 = vadd.f32 %v6044_v5, %v2276_v28  ;;  %v2574_v51 = vadd.f32 %v2573_v50, %v2572_v49  ;;  %v2308_v61 = vadd.f32 %v6044_v5, %v2273_v27 }
 0x605   : > { %2381 = vperm.xlu1 %5217, %v2351_v38   ;;  %5334 = vpow2.f32 %v2326_v56  ;;  %v2593_v7 = vsel %vm993_vm7, %v2351_v38, 0.0  ;;  %v2590_v23 = vadd.f32 %v2589_v4, %v2588_v39 }
 0x606   : > { %v5327_v20 = vpop.eup %5326  ;;  %v2334_v9 = vmul.f32 1.442695, %v2309_v55  ;;  %v2594_v14 = vrot.slane %v2593_v7, 4  ;;  %v2575_v3 = vrot.slane %v2574_v51, 2  ;;  %v2332_v25 = vmul.f32 1.442695, %v2308_v61 }
 0x607   : > { %v2267_v11 = vpop.xlane.xlu0 %2266  ;;  %v2291_v24 = vpop.xlane.xlu1 %2290  ;;  %v2349_v36 = vmul.f32 %v5403_v30, %v5327_v20  ;;  %v2591_v39 = vrot.slane %v2590_v23, 1  ;;  %v5406_v20 = vld [vmem:[%s5655_s30 + $0x58] sm:$0xff] }
 0x608   : > { %5336 = vpow2.f32 %v2334_v9  ;;  %v2306_v63 = vadd.f32 %v6044_v5, %v2267_v11  ;;  %v2314_v0 = vadd.f32 %v6044_v5, %v2291_v24  ;;  %v2595_v47 = vadd.f32 %v2594_v14, %v2593_v7 }
 0x609   : > { %2371 = vperm.xlu1 %5217, %v2349_v36   ;;  %v2579_v6 = vsel %vm993_vm7, %v2349_v36, 0.0  ;;  %v2576_v55 = vadd.f32 %v2575_v3, %v2574_v51 }
 0x60a   : > { %v5329_v37 = vpop.eup %5328  ;;  %v2580_v16 = vrot.slane %v2579_v6, 4  ;;  %v2328_v13 = vmul.f32 1.442695, %v2306_v63  ;;  %v2344_v18 = vmul.f32 1.442695, %v2314_v0  ;;  %v2596_v11 = vrot.slane %v2595_v47, 2 }
 0x60b   : > { %v5331_v45 = vpop.eup %5330  ;;  %v2270_v19 = vpop.xlane.xlu0 %2269  ;;  %v6067_v40 = vmul.f32 %v5404_v10, %v5329_v37  ;;  %v5407_v0 = vld [vmem:[%s5655_s30 + $0x28] sm:$0xff] }
 0x60c   : > { %v2285_v21 = vpop.xlane.xlu1 %2284  ;;  %v2581_v17 = vadd.f32 %v2580_v16, %v2579_v6  ;;  %5338 = vpow2.f32 %v2328_v13  ;;  %v2307_v31 = vadd.f32 %v6044_v5, %v2270_v19  ;;  %v2358_v46 = vmul.f32 %v5405_v43, %v5331_v45 }
 0x60d   : > { %v2312_v41 = vadd.f32 %v6044_v5, %v2285_v21  ;;  %5340 = vpow2.f32 %v2344_v18  ;;  %v2600_v35 = vsel %vm993_vm7, %v6067_v40, 0.0  ;;  %v2592_v16 = vadd.f32 %v2591_v39, %v2590_v23  ;;  %v5408_v18 = vld [vmem:[%s5655_s30 + $0x48] sm:$0xff] }
 0x60e   : > { %v2582_v49 = vrot.slane %v2581_v17, 2  ;;  %v5333_v54 = vpop.eup %5332  ;;  %v2330_v56 = vmul.f32 1.442695, %v2307_v31  ;;  %2416 = vperm.xlu0 %5216, %v2358_v46   ;;  %v2642_v27 = vsel %vm993_vm7, %v2358_v46, 0.0  ;;  %5342 = vpow2.f32 %v2332_v25 }
 0x60f   : > { %v2340_v57 = vmul.f32 1.442695, %v2312_v41  ;;  %v5335_v38 = vpop.eup %5334  ;;  %v2643_v50 = vrot.slane %v2642_v27, 4  ;;  %v2359_v9 = vmul.f32 %v5406_v20, %v5333_v54  ;;  %v2601_v7 = vrot.slane %v2600_v35, 4 }
 0x610   : > { %v2288_v28 = vpop.xlane.xlu1 %2287  ;;  %5344 = vpow2.f32 %v2330_v56  ;;  %v2583_v36 = vadd.f32 %v2582_v49, %v2581_v17  ;;  %v6079_v6 = vmul.f32 %v5407_v0, %v5335_v38  ;;  %v2577_v45 = vrot.slane %v2576_v55, 1 }
 0x611   : > { %5346 = vpow2.f32 %v2340_v57  ;;  %v2644_v24 = vadd.f32 %v2643_v50, %v2642_v27  ;;  %v2313_v4 = vadd.f32 %v6044_v5, %v2288_v28  ;;  %v2649_v61 = vsel %vm993_vm7, %v2359_v9, 0.0  ;;  %v5409_v57 = vld [vmem:[%s5655_s30 + $0x30] sm:$0xff] }
 0x612   : > { %v5337_v30 = vpop.eup %5336  ;;  %2421 = vperm.xlu0 %5216, %v2359_v9   ;;  %v2650_v37 = vrot.slane %v2649_v61, 4  ;;  %v2602_v14 = vadd.f32 %v2601_v7, %v2600_v35  ;;  %v2597_v21 = vadd.f32 %v2596_v11, %v2595_v47  ;;  %v2607_v25 = vsel %vm993_vm7, %v6079_v6, 0.0  ;;  %v5410_v28 = vld [vmem:[%s5655_s30 + $0x70] sm:$0xff] }
 0x613   : > { %v2645_v51 = vrot.slane %v2644_v24, 2  ;;  %v2357_v19 = vmul.f32 %v5408_v18, %v5337_v30  ;;  %v2584_v31 = vrot.slane %v2583_v36, 1  ;;  %v2342_v41 = vmul.f32 1.442695, %v2313_v4  ;;  %v5413_v18 = vld [vmem:[%s5655_s30 + $0x40] sm:$0xff] }
 0x614   : > { %v2294_v63 = vpop.xlane.xlu1 %2293  ;;  %v2651_v3 = vadd.f32 %v2650_v37, %v2649_v61  ;;  %v2603_v54 = vrot.slane %v2602_v14, 2  ;;  %v2608_v56 = vrot.slane %v2607_v25, 4  ;;  %v2686_v47 = vadd.f32 1e-10, %v2592_v16  ;;  %v5411_v37 = vld [vmem:[%s5655_s30 + $0x60] sm:$0xff] }
 0x615   : > { %v2315_v13 = vadd.f32 %v6044_v5, %v2294_v63  ;;  %v2646_v10 = vadd.f32 %v2645_v51, %v2644_v24  ;;  %v2635_v23 = vsel %vm993_vm7, %v2357_v19, 0.0  ;;  %v2578_v39 = vadd.f32 %v2577_v45, %v2576_v55  ;;  %v5412_v45 = vld [vmem:[%s5655_s30 + $0x38] sm:$0xff] }
 0x616   : > { %v5339_v17 = vpop.eup %5338  ;;  %2411 = vperm.xlu0 %5216, %v2357_v19   ;;  %v2652_v49 = vrot.slane %v2651_v3, 2  ;;  %v2636_v5 = vrot.slane %v2635_v23, 4  ;;  %v2598_v11 = vrot.slane %v2597_v21, 1  ;;  %v2585_v24 = vadd.f32 %v2584_v31, %v2583_v36 }
 0x617   : > { %v2346_v43 = vmul.f32 1.442695, %v2315_v13  ;;  %v5341_v46 = vpop.eup %5340  ;;  %v2354_v27 = vmul.f32 %v5409_v57, %v5339_v17  ;;  %v2647_v50 = vrot.slane %v2646_v10, 1  ;;  %v2604_v0 = vadd.f32 %v2603_v54, %v2602_v14 }
 0x618   : > { %v2362_v35 = vmul.f32 %v5410_v28, %v5341_v46  ;;  %v5343_v38 = vpop.eup %5342  ;;  %v2653_v20 = vadd.f32 %v2652_v49, %v2651_v3  ;;  %v2637_v9 = vadd.f32 %v2636_v5, %v2635_v23  ;;  %v2609_v55 = vadd.f32 %v2608_v56, %v2607_v25 }
 0x619   : > { %5348 = vpow2.f32 %v2346_v43  ;;  %2396 = vperm.xlu1 %5217, %v2354_v27   ;;  %v2614_v63 = vsel %vm993_vm7, %v2354_v27, 0.0  ;;  %v6093_v19 = vmul.f32 %v5413_v18, %v5343_v38  ;;  %v2648_v36 = vadd.f32 %v2647_v50, %v2646_v10 }
 0x61a   : > { %v5345_v7 = vpop.eup %5344  ;;  %5350 = vpow2.f32 %v2342_v41  ;;  %2436 = vperm.xlu0 %5216, %v2362_v35   ;;  %v2670_v30 = vsel %vm993_vm7, %v2362_v35, 0.0  ;;  %v2638_v61 = vrot.slane %v2637_v9, 2  ;;  %v2654_v3 = vrot.slane %v2653_v20, 1 }
 0x61b   : > { %v5347_v4 = vpop.eup %5346  ;;  %v2671_v51 = vrot.slane %v2670_v30, 4  ;;  %v2355_v13 = vmul.f32 %v5412_v45, %v5345_v7  ;;  %5352 = vrcp.f32 %v2686_v47  ;;  %v2685_v31 = vadd.f32 1e-10, %v2585_v24  ;;  %v5414_v7 = vld [vmem:[%s5655_s30 + $0x78] sm:$0xff] }
 0x61c   : > { %v2360_v16 = vmul.f32 %v5411_v37, %v5347_v4  ;;  %v2639_v17 = vadd.f32 %v2638_v61, %v2637_v9  ;;  %v2615_v41 = vrot.slane %v2614_v63, 4  ;;  %v2684_v25 = vadd.f32 1e-10, %v2578_v39 }
 0x61d   : > { %v2672_v43 = vadd.f32 %v2671_v51, %v2670_v30  ;;  %2386 = vperm.xlu1 %5217, %v6067_v40   ;;  %v2599_v23 = vadd.f32 %v2598_v11, %v2597_v21  ;;  %v2605_v46 = vrot.slane %v2604_v0, 1  ;;  %v2621_v54 = vsel %vm993_vm7, %v2355_v13, 0.0 }
 0x61e   : > { %2426 = vperm.xlu0 %5216, %v2360_v16   ;;  %v2656_v14 = vsel %vm993_vm7, %v2360_v16, 0.0  ;;  %v2610_v56 = vrot.slane %v2609_v55, 2  ;;  %v2628_v10 = vsel %vm993_vm7, %v6093_v19, 0.0  ;;  %v2694_v47 = vadd.f32 1e-10, %v2648_v36 }
 0x61f   : > { %v2657_v49 = vrot.slane %v2656_v14, 4  ;;  %v2673_v5 = vrot.slane %v2672_v43, 2  ;;  %v2655_v57 = vadd.f32 %v2654_v3, %v2653_v20  ;;  %v2640_v27 = vrot.slane %v2639_v17, 1 }
 0x620   : > { %5354 = vrcp.f32 %v2685_v31  ;;  %v2616_v35 = vadd.f32 %v2615_v41, %v2614_v63  ;;  %v2629_v21 = vrot.slane %v2628_v10, 4  ;;  %v2622_v50 = vrot.slane %v2621_v54, 4  ;;  %v5415_v31 = vld [vmem:[%s5655_s30 + $0x68] sm:$0xff]  ;;  %s589_s30 = scalar_lea.vmem %s6575_s6, %s5544_s28 }
 0x621   : > { %v2658_v28 = vadd.f32 %v2657_v49, %v2656_v14  ;;  %v2674_v38 = vadd.f32 %v2673_v5, %v2672_v43  ;;  %2401 = vperm.xlu1 %5217, %v2355_v13   ;;  %v2611_v9 = vadd.f32 %v2610_v56, %v2609_v55  ;;  %5356 = vrcp.f32 %v2684_v25 }
 0x622   : > { %v2687_v30 = vadd.f32 1e-10, %v2599_v23  ;;  %v2606_v4 = vadd.f32 %v2605_v46, %v2604_v0  ;;  %v2630_v61 = vadd.f32 %v2629_v21, %v2628_v10  ;;  %5358 = vrcp.f32 %v2694_v47 }
 0x623   : > { %v5349_v40 = vpop.eup %5348  ;;  %v2659_v39 = vrot.slane %v2658_v28, 2  ;;  %v2695_v20 = vadd.f32 1e-10, %v2655_v57  ;;  %v2641_v51 = vadd.f32 %v2640_v27, %v2639_v17  ;;  %v2617_v37 = vrot.slane %v2616_v35, 2 }
 0x624   : > { %v2363_v11 = vmul.f32 %v5414_v7, %v5349_v40  ;;  %v5351_v24 = vpop.eup %5350  ;;  %v2675_v16 = vrot.slane %v2674_v38, 1  ;;  %v2623_v18 = vadd.f32 %v2622_v50, %v2621_v54  ;;  %v2612_v36 = vrot.slane %v2611_v9, 1 }
 0x625   : > { %v2660_v45 = vadd.f32 %v2659_v39, %v2658_v28  ;;  %2391 = vperm.xlu1 %5217, %v6079_v6   ;;  %v5353_v13 = vpop.eup %5352  ;;  %v2631_v3 = vrot.slane %v2630_v61, 2  ;;  %v2361_v0 = vmul.f32 %v5415_v31, %v5351_v24  ;;  %5360 = vrcp.f32 %v2687_v30 }
 0x626   : > { %2441 = vperm.xlu0 %5216, %v2363_v11   ;;  %v2677_v63 = vsel %vm993_vm7, %v2363_v11, 0.0  ;;  %v2688_v41 = vadd.f32 1e-10, %v2606_v4  ;;  %5362 = vrcp.f32 %v2695_v20  ;;  %v2693_v17 = vadd.f32 1e-10, %v2641_v51 }
 0x627   : > { %v2678_v55 = vrot.slane %v2677_v63, 4  ;;  %v2632_v14 = vadd.f32 %v2631_v3, %v2630_v61  ;;  %v2663_v25 = vsel %vm993_vm7, %v2361_v0, 0.0  ;;  %v2676_v23 = vadd.f32 %v2675_v16, %v2674_v38  ;;  %v5251_v3 = vld [vmem:[%s6579_s10 + $0xb0] sm:$0xff]  }
 0x628   : > { %v2661_v46 = vrot.slane %v2660_v45, 1  ;;  %v2664_v6 = vrot.slane %v2663_v25, 4  ;;  %v2618_v5 = vadd.f32 %v2617_v37, %v2616_v35  ;;  %v2624_v54 = vrot.slane %v2623_v18, 2  ;;  %5018 = vmatpush3.bf16.msra.mxu1 %v5251_v3 }
 0x629   : > { %v2679_v43 = vadd.f32 %v2678_v55, %v2677_v63  ;;  %2406 = vperm.xlu1 %5217, %v6093_v19   ;;  %v2613_v56 = vadd.f32 %v2612_v36, %v2611_v9  ;;  %v2633_v10 = vrot.slane %v2632_v14, 1  ;;  %5364 = vrcp.f32 %v2688_v41  ;;  %5019 = vmatprep.subr.bf16.mxu1 %v5424_v1 }
 0x62a   : > { %2431 = vperm.xlu0 %5216, %v2361_v0   ;;  %v5355_v47 = vpop.eup %5354  ;;  %v2665_v57 = vadd.f32 %v2664_v6, %v2663_v25  ;;  %5366 = vrcp.f32 %v2693_v17  ;;  %v2698_v28 = vadd.f32 1e-10, %v2676_v23  ;;  %v2662_v40 = vadd.f32 %v2661_v46, %v2660_v45  ;;  %v5252_v6 = vld [vmem:[%s6579_s10 + $0xb8] sm:$0xff]  }
 0x62b   : > { %v2680_v49 = vrot.slane %v2679_v43, 2  ;;  %v5357_v27 = vpop.eup %5356  ;;  %v2619_v50 = vrot.slane %v2618_v5, 1  ;;  %v2625_v7 = vadd.f32 %v2624_v54, %v2623_v18  ;;  %v2689_v19 = vadd.f32 1e-10, %v2613_v56 }
 0x62c   : > { %v2666_v39 = vrot.slane %v2665_v57, 2  ;;  %v5359_v38 = vpop.eup %5358  ;;  %v2634_v11 = vadd.f32 %v2633_v10, %v2632_v14  ;;  %5368 = vrcp.f32 %v2698_v28  ;;  %v2696_v24 = vadd.f32 1e-10, %v2662_v40  ;;  %5020 = vmatpush3.bf16.msra.mxu1 %v5252_v6 }
 0x62d   : > { %v2681_v21 = vadd.f32 %v2680_v49, %v2679_v43  ;;  %2728 = vperm.xlu1 %5217, %v5353_v13   ;;  %v2620_v20 = vadd.f32 %v2619_v50, %v2618_v5  ;;  %v2626_v51 = vrot.slane %v2625_v7, 1  ;;  %5370 = vrcp.f32 %v2689_v19  ;;  %5025 = vmatprep.subr.bf16.mxu1 %v5424_v1 }
 0x62e   : > { %2723 = vperm.xlu0 %5216, %v5355_v47   ;;  %v2667_v35 = vadd.f32 %v2666_v39, %v2665_v57  ;;  %v2692_v63 = vadd.f32 1e-10, %v2634_v11  ;;  %5372 = vrcp.f32 %v2696_v24 }
 0x62f   : > { %v5361_v9 = vpop.eup %5360  ;;  %v2682_v30 = vrot.slane %v2681_v21, 1  ;;  %v2690_v18 = vadd.f32 1e-10, %v2620_v20  ;;  %v2627_v36 = vadd.f32 %v2626_v51, %v2625_v7 }
 0x630   : > { %v2668_v4 = vrot.slane %v2667_v35, 1  ;;  %v5363_v61 = vpop.eup %5362  ;;  %5374 = vrcp.f32 %v2692_v63 }
 0x631   : > { %2718 = vperm.xlu1 %5217, %v5357_v27   ;;  %v2683_v45 = vadd.f32 %v2682_v30, %v2681_v21  ;;  %v2691_v0 = vadd.f32 1e-10, %v2627_v36 }
 0x632   : > { %2768 = vperm.xlu0 %5216, %v5359_v38   ;;  %v2669_v37 = vadd.f32 %v2668_v4, %v2667_v35 }
 0x633   : > { %v5365_v16 = vpop.eup %5364  ;;  %v2699_v31 = vadd.f32 1e-10, %v2683_v45 }
 0x634   : > { %v2697_v55 = vadd.f32 1e-10, %v2669_v37  ;;  %v5367_v13 = vpop.eup %5366 }
 0x635   : > { %2733 = vperm.xlu1 %5217, %v5361_v9  }
 0x636   : > { %2773 = vperm.xlu0 %5216, %v5363_v61   ;;  %5376 = vrcp.f32 %v2697_v55  ;;  %v5369_v41 = vpop.eup %5368 }
 0x637   : > { %5378 = vrcp.f32 %v2690_v18  ;;  %v5371_v43 = vpop.eup %5370 }
 0x638   : > { %5380 = vrcp.f32 %v2699_v31  ;;  %v5373_v17 = vpop.eup %5372 }
 0x639   : > { %2738 = vperm.xlu1 %5217, %v5365_v16   ;;  %5382 = vrcp.f32 %v2691_v0 }
 0x63a   : > { %2763 = vperm.xlu0 %5216, %v5367_v13   ;;  %v5375_v14 = vpop.eup %5374 }
 0x63d   : > { %2743 = vperm.xlu1 %5217, %v5371_v43  }
 0x63e   : > { %2788 = vperm.xlu0 %5216, %v5369_v41  }
 0x640   : > { %v5377_v25 = vpop.eup %5376 }
 0x641   : > { %2758 = vperm.xlu1 %5217, %v5375_v14   ;;  %v5379_v23 = vpop.eup %5378 }
 0x642   : > { %2778 = vperm.xlu0 %5216, %v5373_v17   ;;  %v5381_v46 = vpop.eup %5380 }
 0x643   : > { %v5383_v49 = vpop.eup %5382 }
 0x645   : > { %2748 = vperm.xlu1 %5217, %v5379_v23  }
 0x646   : > { %2783 = vperm.xlu0 %5216, %v5377_v25  }
 0x649   : > { %2753 = vperm.xlu1 %5217, %v5383_v49  }
 0x64a   : > { %2793 = vperm.xlu0 %5216, %v5381_v46  }
 0x67c   : > { %v2377_v54 = vpop.permute.xlu1 %2376 }
 0x67d   : > { %v2446_v57 = vmul.f32 %v2377_v54, %v5915_v2 }
 0x67f   : > { %v2474_v40 = vsel %vm836_vm4, %v2446_v57, 0.0 }
 0x680   : > { %v2367_v5 = vpop.permute.xlu0 %2366  ;;  %v2475_v50 = vrot.slane %v2474_v40, 4 }
 0x681   : > { %v2444_v38 = vmul.f32 %v2367_v5, %v5918_v15 }
 0x682   : > { %v2476_v24 = vadd.f32 %v2475_v50, %v2474_v40 }
 0x683   : > { %v2460_v9 = vsel %vm836_vm4, %v2444_v38, 0.0 }
 0x684   : > { %v2382_v10 = vpop.permute.xlu1 %2381  ;;  %v2461_v20 = vrot.slane %v2460_v9, 4  ;;  %v2477_v37 = vrot.slane %v2476_v24, 2 }
 0x685   : > { %v2447_v19 = vmul.f32 %v2382_v10, %v5922_v48 }
 0x686   : > { %v2462_v36 = vadd.f32 %v2461_v20, %v2460_v9  ;;  %v2478_v49 = vadd.f32 %v2477_v37, %v2476_v24 }
 0x687   : > { %v2481_v15 = vsel %vm836_vm4, %v2447_v19, 0.0 }
 0x688   : > { %v2372_v27 = vpop.permute.xlu1 %2371  ;;  %v2482_v55 = vrot.slane %v2481_v15, 4 }
 0x689   : > { %v2445_v7 = vmul.f32 %v2372_v27, %v5928_v22  ;;  %v2463_v27 = vrot.slane %v2462_v36, 2 }
 0x68a   : > { %v2483_v14 = vadd.f32 %v2482_v55, %v2481_v15 }
 0x68b   : > { %v2467_v30 = vsel %vm836_vm4, %v2445_v7, 0.0  ;;  %v2464_v15 = vadd.f32 %v2463_v27, %v2462_v36 }
 0x68c   : > { %v2468_v16 = vrot.slane %v2467_v30, 4 }
 0x68d   : > { %v2417_v56 = vpop.permute.xlu0 %2416 }
 0x68e   : > { %v2454_v11 = vmul.f32 %v2417_v56, %v5955_v60 }
 0x690   : > { %v2530_v22 = vsel %vm836_vm4, %v2454_v11, 0.0 }
 0x691   : > { %v2422_v47 = vpop.permute.xlu0 %2421 }
 0x692   : > { %v2455_v4 = vmul.f32 %v2422_v47, %v5967_v26  ;;  %v2531_v26 = vrot.slane %v2530_v22, 4 }
 0x694   : > { %v2532_v25 = vadd.f32 %v2531_v26, %v2530_v22 }
 0x695   : > { %v2412_v28 = vpop.permute.xlu0 %2411 }
 0x696   : > { %v2453_v61 = vmul.f32 %v2412_v28, %v5973_v62  ;;  %v2537_v62 = vsel %vm836_vm4, %v2455_v4, 0.0 }
 0x697   : > { %v2538_v41 = vrot.slane %v2537_v62, 4 }
 0x698   : > { %v2397_v39 = vpop.permute.xlu1 %2396  ;;  %v2523_v13 = vsel %vm836_vm4, %v2453_v61, 0.0 }
 0x699   : > { %v2437_v21 = vpop.permute.xlu0 %2436  ;;  %v2450_v60 = vmul.f32 %v2397_v39, %v5951_v52  ;;  %v2524_v43 = vrot.slane %v2523_v13, 4  ;;  %v2539_v40 = vadd.f32 %v2538_v41, %v2537_v62 }
 0x69a   : > { %v2458_v48 = vmul.f32 %v2437_v21, %v5985_v29 }
 0x69b   : > { %v2502_v31 = vsel %vm836_vm4, %v2450_v60, 0.0  ;;  %v2525_v21 = vadd.f32 %v2524_v43, %v2523_v13  ;;  %v2540_v4 = vrot.slane %v2539_v40, 2 }
 0x69c   : > { %v2387_v35 = vpop.permute.xlu1 %2386  ;;  %v2558_v3 = vsel %vm836_vm4, %v2458_v48, 0.0  ;;  %v2503_v6 = vrot.slane %v2502_v31, 4 }
 0x69d   : > { %v2427_v2 = vpop.permute.xlu0 %2426  ;;  %v2448_v45 = vmul.f32 %v2387_v35, %v5938_v53  ;;  %v2469_v53 = vadd.f32 %v2468_v16, %v2467_v30  ;;  %v2559_v23 = vrot.slane %v2558_v3, 4  ;;  %v2526_v61 = vrot.slane %v2525_v21, 2 }
 0x69e   : > { %v2456_v63 = vmul.f32 %v2427_v2, %v5989_v42  ;;  %v2504_v11 = vadd.f32 %v2503_v6, %v2502_v31  ;;  %v2465_v31 = vrot.slane %v2464_v15, 1 }
 0x69f   : > { %v2488_v17 = vsel %vm836_vm4, %v2448_v45, 0.0  ;;  %v2470_v28 = vrot.slane %v2469_v53, 2  ;;  %v2560_v39 = vadd.f32 %v2559_v23, %v2558_v3 }
 0x6a0   : > { %v2402_v51 = vpop.permute.xlu1 %2401  ;;  %v2544_v52 = vsel %vm836_vm4, %v2456_v63, 0.0  ;;  %v2505_v37 = vrot.slane %v2504_v11, 2 }
 0x6a1   : > { %v2451_v42 = vmul.f32 %v2402_v51, %v5962_v12  ;;  %v2545_v5 = vrot.slane %v2544_v52, 4  ;;  %v2489_v12 = vrot.slane %v2488_v17, 4  ;;  %v2561_v22 = vrot.slane %v2560_v39, 2 }
 0x6a2   : > { %v2471_v60 = vadd.f32 %v2470_v28, %v2469_v53 }
 0x6a3   : > { %v2546_v2 = vadd.f32 %v2545_v5, %v2544_v52  ;;  %v2541_v52 = vadd.f32 %v2540_v4, %v2539_v40  ;;  %v2506_v5 = vadd.f32 %v2505_v37, %v2504_v11 }
 0x6a4   : > { %v2392_v29 = vpop.permute.xlu1 %2391  ;;  %v2472_v41 = vrot.slane %v2471_v60, 1 }
 0x6a5   : > { %v2442_v18 = vpop.permute.xlu0 %2441  ;;  %v2449_v0 = vmul.f32 %v2392_v29, %v5944_v32  ;;  %v2509_v32 = vsel %vm836_vm4, %v2451_v42, 0.0  ;;  %v2547_v62 = vrot.slane %v2546_v2, 2  ;;  %v2527_v42 = vadd.f32 %v2526_v61, %v2525_v21 }
 0x6a6   : > { %v2459_v47 = vmul.f32 %v2442_v18, %v6008_v58  ;;  %v2510_v35 = vrot.slane %v2509_v32, 4  ;;  %v2533_v58 = vrot.slane %v2532_v25, 2  ;;  %v2479_v18 = vrot.slane %v2478_v49, 1 }
 0x6a7   : > { %v2495_v54 = vsel %vm836_vm4, %v2449_v0, 0.0 }
 0x6a8   : > { %v2407_v10 = vpop.permute.xlu1 %2406  ;;  %v2496_v38 = vrot.slane %v2495_v54, 4  ;;  %v2565_v30 = vsel %vm836_vm4, %v2459_v47, 0.0  ;;  %v2511_v16 = vadd.f32 %v2510_v35, %v2509_v32  ;;  %v2534_v3 = vadd.f32 %v2533_v58, %v2532_v25 }
 0x6a9   : > { %v2432_v46 = vpop.permute.xlu0 %2431  ;;  %v2452_v57 = vmul.f32 %v2407_v10, %v5958_v8  ;;  %v2490_v8 = vadd.f32 %v2489_v12, %v2488_v17  ;;  %v2566_v45 = vrot.slane %v2565_v30, 4  ;;  %v2562_v17 = vadd.f32 %v2561_v22, %v2560_v39 }
 0x6aa   : > { %v2457_v56 = vmul.f32 %v2432_v46, %v6000_v34  ;;  %v2484_v34 = vrot.slane %v2483_v14, 2  ;;  %v2497_v48 = vadd.f32 %v2496_v38, %v2495_v54  ;;  %v2512_v53 = vrot.slane %v2511_v16, 2 }
 0x6ab   : > { %v2516_v7 = vsel %vm836_vm4, %v2452_v57, 0.0  ;;  %v2491_v13 = vrot.slane %v2490_v8, 2  ;;  %v2567_v23 = vadd.f32 %v2566_v45, %v2565_v30  ;;  %v2480_v54 = vadd.f32 %v2479_v18, %v2478_v49 }
 0x6ac   : > { %v2551_v50 = vsel %vm836_vm4, %v2457_v56, 0.0  ;;  %v2517_v9 = vrot.slane %v2516_v7, 4  ;;  %v6145_v24 = vpop.permute.xlu1 %2728  ;;  %v2485_v26 = vadd.f32 %v2484_v34, %v2483_v14  ;;  %v2498_v0 = vrot.slane %v2497_v48, 2 }
 0x6ad   : > { %v2724_v19 = vpop.permute.xlu0 %2723  ;;  %v2552_v20 = vrot.slane %v2551_v50, 4  ;;  %v2535_v14 = vrot.slane %v2534_v3, 1  ;;  %v2492_v56 = vadd.f32 %v2491_v13, %v2490_v8  ;;  %v2548_v10 = vadd.f32 %v2547_v62, %v2546_v2 }
 0x6ae   : > { %v2518_v51 = vadd.f32 %v2517_v9, %v2516_v7  ;;  %v2486_v46 = vrot.slane %v2485_v26, 1  ;;  %v2466_v25 = vadd.f32 %v2465_v31, %v2464_v15  ;;  %v2542_v32 = vrot.slane %v2541_v52, 1 }
 0x6af   : > { %v2553_v29 = vadd.f32 %v2552_v20, %v2551_v50  ;;  %v2528_v47 = vrot.slane %v2527_v42, 1  ;;  %v2473_v57 = vadd.f32 %v2472_v41, %v2471_v60  ;;  %v2563_v28 = vrot.slane %v2562_v17, 1 }
 0x6b0   : > { %v2719_v55 = vpop.permute.xlu1 %2718  ;;  %v2519_v36 = vrot.slane %v2518_v51, 2  ;;  %v2499_v40 = vadd.f32 %v2498_v0, %v2497_v48  ;;  %v2568_v38 = vrot.slane %v2567_v23, 2  ;;  %v2487_v39 = vadd.f32 %v2486_v46, %v2485_v26 }
 0x6b1   : > { %v2769_v63 = vpop.permute.xlu0 %2768  ;;  %v2554_v12 = vrot.slane %v2553_v29, 2  ;;  %v2507_v7 = vrot.slane %v2506_v5, 1  ;;  %v2513_v34 = vadd.f32 %v2512_v53, %v2511_v16  ;;  %v2797_v35 = vmul.f32 %v2724_v19, %v2473_v57 }
 0x6b2   : > { %v2520_v21 = vadd.f32 %v2519_v36, %v2518_v51  ;;  %v2536_v11 = vadd.f32 %v2535_v14, %v2534_v3  ;;  %v2493_v49 = vrot.slane %v2492_v56, 1  ;;  %v2549_v9 = vrot.slane %v2548_v10, 1 }
 0x6b3   : > { %v2796_v58 = vmul.f32 %v2719_v55, %v2466_v25  ;;  %v2543_v2 = vadd.f32 %v2542_v32, %v2541_v52  ;;  %v2529_v8 = vadd.f32 %v2528_v47, %v2527_v42  ;;  %v2555_v30 = vadd.f32 %v2554_v12, %v2553_v29 }
 0x6b4   : > { %v2734_v6 = vpop.permute.xlu1 %2733  ;;  %v2798_v4 = vmul.f32 %v6145_v24, %v2480_v54  ;;  %v2564_v61 = vadd.f32 %v2563_v28, %v2562_v17  ;;  %v2500_v15 = vrot.slane %v2499_v40, 1  ;;  %v2521_v22 = vrot.slane %v2520_v21, 1 }
 0x6b5   : > { %v2774_v43 = vpop.permute.xlu0 %2773  ;;  %v2806_v48 = vmul.f32 %v2769_v63, %v2536_v11  ;;  %v2508_v60 = vadd.f32 %v2507_v7, %v2506_v5  ;;  %v2569_v37 = vadd.f32 %v2568_v38, %v2567_v23  ;;  %v2514_v45 = vrot.slane %v2513_v34, 1 }
 0x6b6   : > { %v2813_v16 = vpack.c.bf16 %v2797_v35, %v2797_v35  ;;  %v2494_v26 = vadd.f32 %v2493_v49, %v2492_v56  ;;  %v2550_v62 = vadd.f32 %v2549_v9, %v2548_v10  ;;  %v2812_v13 = vpack.c.bf16 %v2796_v58, %v2796_v58 }
 0x6b7   : > { %v2807_v55 = vmul.f32 %v2774_v43, %v2543_v2  ;;  %v2799_v18 = vmul.f32 %v2734_v6, %v2487_v39  ;;  %v2556_v3 = vrot.slane %v2555_v30, 1  ;;  %v2814_v29 = vpack.c.bf16 %v2798_v4, %v2798_v4 }
 0x6b8   : > { %v2739_v50 = vpop.permute.xlu1 %2738  ;;  %v2501_v31 = vadd.f32 %v2500_v15, %v2499_v40  ;;  %v2522_v42 = vadd.f32 %v2521_v22, %v2520_v21  ;;  %v2822_v0 = vpack.c.bf16 %v2806_v48, %v2806_v48  ;;  %v2570_v41 = vrot.slane %v2569_v37, 1 }
 0x6b9   : > { %v2764_v27 = vpop.permute.xlu0 %2763  ;;  %v2800_v24 = vmul.f32 %v2739_v50, %v2494_v26  ;;  %v2515_v17 = vadd.f32 %v2514_v45, %v2513_v34  ;;  %v2854_v53 = vunpack.c.l.b16 %v2813_v16  ;;  %v2853_v43 = vunpack.c.l.b16 %v2812_v13 }
 0x6ba   : > { %v2805_v19 = vmul.f32 %v2764_v27, %v2529_v8  ;;  %v2823_v6 = vpack.c.bf16 %v2807_v55, %v2807_v55  ;;  %v2815_v54 = vpack.c.bf16 %v2799_v18, %v2799_v18  ;;  %v2557_v14 = vadd.f32 %v2556_v3, %v2555_v30 }
 0x6bb   : > { %v2855_v56 = vunpack.c.l.b16 %v2814_v29  ;;  %v2816_v10 = vpack.c.bf16 %v2800_v24, %v2800_v24  ;;  %v2863_v47 = vunpack.c.l.b16 %v2822_v0  ;;  %v2571_v40 = vadd.f32 %v2570_v41, %v2569_v37  ;;  %v4693_v41 = vld [vmem:[%s6580_s11 + $0x9] ss:$0 sm:$0xff] }
 0x6bc   : > { %v2744_v51 = vpop.permute.xlu1 %2743  ;;  %v2821_v23 = vpack.c.bf16 %v2805_v19, %v2805_v19  ;;  %v2869_v7 = vsel %vm1089_vm13, %v2854_v53, %v2853_v43  ;;  %v2864_v34 = vunpack.c.l.b16 %v2823_v6  ;;  %v2856_v35 = vunpack.c.l.b16 %v2815_v54 }
 0x6bd   : > { %v2789_v20 = vpop.permute.xlu0 %2788  ;;  %v2801_v46 = vmul.f32 %v2744_v51, %v2501_v31  ;;  %v2857_v49 = vunpack.c.l.b16 %v2816_v10  ;;  %v5256_v10 = vld [vmem:[%s6579_s10 + $0xd8] sm:$0xff]  }
 0x6be   : > { %v2810_v12 = vmul.f32 %v2789_v20, %v2564_v61  ;;  %v2862_v21 = vunpack.c.l.b16 %v2821_v23 }
 0x6bf   : > { %v2817_v38 = vpack.c.bf16 %v2801_v46, %v2801_v46 }
 0x6c0   : > { %v2759_v36 = vpop.permute.xlu1 %2758  ;;  %v2826_v9 = vpack.c.bf16 %v2810_v12, %v2810_v12  ;;  %v4697_v12 = vld [vmem:[%s6580_s11 + $0xc] ss:$0 sm:$0xff] }
 0x6c1   : > { %v2779_v52 = vpop.permute.xlu0 %2778  ;;  %v2804_v5 = vmul.f32 %v2759_v36, %v2522_v42  ;;  %v2858_v22 = vunpack.c.l.b16 %v2817_v38  ;;  %v5254_v36 = vld [vmem:[%s6579_s10 + $0xc8] sm:$0xff]  }
 0x6c2   : > { %v2808_v63 = vmul.f32 %v2779_v52, %v2550_v62  ;;  %v2867_v26 = vunpack.c.l.b16 %v2826_v9 }
 0x6c3   : > { %v2820_v25 = vpack.c.bf16 %v2804_v5, %v2804_v5 }
 0x6c4   : > { %v2824_v57 = vpack.c.bf16 %v2808_v63, %v2808_v63  ;;  %v2749_v28 = vpop.permute.xlu1 %2748  ;;  %v5253_v63 = vld [vmem:[%s6579_s10 + $0xc0] sm:$0xff]  }
 0x6c5   : > { %v2784_v32 = vpop.permute.xlu0 %2783  ;;  %v2861_v39 = vunpack.c.l.b16 %v2820_v25  ;;  %v2802_v50 = vmul.f32 %v2749_v28, %v2508_v60  ;;  %v2871_v60 = vsel %vm2870_vm6, %v2855_v56, %v2869_v7 }
 0x6c6   : > { %v2809_v27 = vmul.f32 %v2784_v32, %v2557_v14  ;;  %v2865_v30 = vunpack.c.l.b16 %v2824_v57  ;;  %v2873_v19 = vsel %vm2872_vm8, %v2856_v35, %v2871_v60  ;;  %v5255_v14 = vld [vmem:[%s6579_s10 + $0xd0] sm:$0xff]  }
 0x6c7   : > { %v2882_v58 = vsel %vm1089_vm13, %v2862_v21, %v2861_v39  ;;  %v2818_v2 = vpack.c.bf16 %v2802_v50, %v2802_v50  ;;  %v2875_v55 = vsel %vm2874_vm9, %v2857_v49, %v2873_v19  ;;  %v4704_v21 = vld [vmem:[%s6580_s11 + $0xe] ss:$0 sm:$0xff] }
 0x6c8   : > { %v2825_v11 = vpack.c.bf16 %v2809_v27, %v2809_v27  ;;  %v2883_v4 = vsel %vm2870_vm6, %v2863_v47, %v2882_v58  ;;  %v2754_v15 = vpop.permute.xlu1 %2753  ;;  %v2877_v3 = vsel %vm2876_vm10, %v2858_v22, %v2875_v55 }
 0x6c9   : > { %v2794_v8 = vpop.permute.xlu0 %2793  ;;  %v2884_v48 = vsel %vm2872_vm8, %v2864_v34, %v2883_v4  ;;  %v2803_v51 = vmul.f32 %v2754_v15, %v2515_v17  ;;  %v2859_v45 = vunpack.c.l.b16 %v2818_v2  ;;  %v3099_v4 = vld [vmem:[%s589_s30] sm:$0xff] }
 0x6ca   : > { %v2866_v61 = vunpack.c.l.b16 %v2825_v11  ;;  %v2811_v20 = vmul.f32 %v2794_v8, %v2571_v40  ;;  %v2885_v37 = vsel %vm2874_vm9, %v2865_v30, %v2884_v48  ;;  %v4705_v11 = vld [vmem:[%s6580_s11 + $0xf] ss:$0 sm:$0xff] }
 0x6cb   : > { %v2819_v13 = vpack.c.bf16 %v2803_v51, %v2803_v51  ;;  %v2879_v31 = vsel %vm2878_vm11, %v2859_v45, %v2877_v3 }
 0x6cc   : > { %v2827_v16 = vpack.c.bf16 %v2811_v20, %v2811_v20  ;;  %v2886_v62 = vsel %vm2876_vm10, %v2866_v61, %v2885_v37  ;;  %v3100_v20 = vld [vmem:[%s589_s30 + $0x8] sm:$0xff] }
 0x6cd   : > { %v2887_v29 = vsel %vm2878_vm11, %v2867_v26, %v2886_v62  ;;  %v2860_v24 = vunpack.c.l.b16 %v2819_v13 }
 0x6ce   : > { %v2868_v18 = vunpack.c.l.b16 %v2827_v16 }
 0x6cf   : > { %v2881_v42 = vsel %vm2880_vm12, %v2860_v24, %v2879_v31 }
 0x6d0   : > { %v2888_v52 = vsel %vm2880_vm12, %v2868_v18, %v2887_v29 }
 0x6d1   : > { %v2889_v0 = vpack.c.b16 %v2888_v52, %v2881_v42  ;;  %v4643_v42 = vld [vmem:[%s6580_s11 + $0x2] ss:$0 sm:$0xff] }
 0x6d3   : > { %5022 = vmatmul.mubr.msk.bf16.vlgmr.msra.gmra.mrb[28].mxu1 %vm836_vm4, %v2889_v0  ;;  %v1173_v0 = vadd.f32 %v4643_v42, %v5905_v59  ;;  %v5257_v59 = vld [vmem:[%s6579_s10 + $0xe0] sm:$0xff]  }
 0x6d4   : > { %5029 = vmatprep.mubr.msk.bf16.mxu1 %vm5425_vm0, %v5424_v1  ;;  %5026 = vmatpush3.bf16.msra.mxu1 %v5253_v63 }
 0x6d5   : > { %5027 = vmatprep.subr.bf16.mxu1 %v5424_v1 }
 0x6d8   : > { %5028 = vmatpush3.bf16.msra.mxu1 %v5254_v36 }
 0x6d9   : > { %5033 = vmatprep.subr.bf16.mxu1 %v5424_v1 }
 0x7a6   : > { %v2939_v17 = vpop.f32.mrb[28].mxu1 }
 0x7a7   : > { %v6177_v53 = vadd.f32 %v4693_v41, %v2939_v17  ;;  %v5023_v23 = vpop.f32.mrb[29].mxu1  ;;  %v6234_v17 = vld [vmem:[%s6229_s20] sm:$0xff] }
 0x7a8   : > { %v2942_v46 = vpop.f32.mrb[30].mxu1  ;;  %v5258_v23 = vld [vmem:[%s6579_s10 + $0xe8] sm:$0xff]  }
 0x7a9   : > { %v6179_v5 = vadd.f32 %v4693_v41, %v2942_v46  ;;  %v5024_v43 = vpop.f32.mrb[31].mxu1  ;;  %v2946_v6 = vmax.f32 %v6177_v53, 0.0  ;;  %v6223_v41 = vmax.f32 %v1173_v0, 0.0 }
 0x7ab   : > { %v2947_v54 = vmax.f32 %v6179_v5, 0.0 }
 0x7ad   : > { %v2948_v56 = vpack.c.bf16 %v2947_v54, %v2946_v6 }
 0x7af   : > { %5030 = vmatmul.mubr.msk.bf16.vlgmr.msra.gmra.mrb[32].mxu1 %vm836_vm4, %v2948_v56 }
 0x7b0   : > { %5034 = vmatpush3.bf16.msra.mxu1 %v5255_v14  ;;  %5037 = vmatprep.mubr.msk.bf16.mxu1 %vm5425_vm0, %v5424_v1 }
 0x7b1   : > { %5035 = vmatprep.subr.bf16.mxu1 %v5424_v1 }
 0x7b4   : > { %5036 = vmatpush3.bf16.msra.mxu1 %v5256_v10 }
 0x7b5   : > { %5041 = vmatprep.subr.bf16.mxu1 %v5424_v1 }
 0x7bb   : > { %5038 = vmatmul.mubr.msk.bf16.vlgmr.msra.gmra.mrb[32].mxu1 %vm836_vm4, %v5589_v33 }
 0x7bc   : > { %5045 = vmatprep.mubr.msk.bf16.mxu1 %vm5425_vm0, %v5424_v1  ;;  %5042 = vmatpush3.bf16.msra.mxu1 %v5257_v59 }
 0x7bd   : > { %5043 = vmatprep.subr.bf16.mxu1 %v5424_v1 }
 0x7c0   : > { %5044 = vmatpush3.bf16.msra.mxu1 %v5258_v23 }
 0x7c1   : > { %5065 = vmatprep.subr.bf16.mxu1 %v5424_v1 }
 0x88e   : > { %v3064_v25 = vpop.f32.mrb[32].mxu1 }
 0x88f   : > { %v5189_v32 = vadd.f32 %v4697_v12, %v3064_v25  ;;  %v5039_v47 = vpop.f32.mrb[33].mxu1 }
 0x890   : > { %v3067_v57 = vpop.f32.mrb[34].mxu1 }
 0x891   : > { %vm3073_vm14 = vcmp.gt.f32.partialorder %v5189_v32, 0.0  ;;  %v3075_v27 = vmul.f32 0.2, %v5189_v32  ;;  %v5190_v28 = vadd.f32 %v4697_v12, %v3067_v57  ;;  %v5040_v40 = vpop.f32.mrb[35].mxu1 }
 0x893   : > { %vm3074_vm15 = vcmp.gt.f32.partialorder %v5190_v28, 0.0  ;;  %v3076_v33 = vmul.f32 0.2, %v5190_v28  ;;  %v3077_v38 = vsel %vm3073_vm14, %v5189_v32, %v3075_v27 }
 0x894   : > { %v3084_v39 = vmul.f32 %v4704_v21, %v3077_v38 }
 0x895   : > { %v3078_v50 = vsel %vm3074_vm15, %v5190_v28, %v3076_v33 }
 0x896   : > { %v3086_v7 = vsel %vm836_vm4, %v3084_v39, 0.0  ;;  %v3085_v34 = vmul.f32 %v4704_v21, %v3078_v50 }
 0x897   : > { %3087 = vadd.xlane.f32.xlu1 %v3086_v7 }
 0x898   : > { %v3089_v35 = vsel %vm836_vm4, %v3085_v34, 0.0 }
 0x899   : > { %3090 = vadd.xlane.f32.xlu0 %v3089_v35 }
 0x924   : > { %v3088_v49 = vpop.xlane.xlu1 %3087 }
 0x925   : > { %v3097_v9 = vadd.f32 %v4705_v11, %v3088_v49 }
 0x926   : > { %v3091_v58 = vpop.xlane.xlu0 %3090 }
 0x927   : > { %v3101_v2 = vmul.f32 1.442695, %v3097_v9  ;;  %v3098_v8 = vadd.f32 %v4705_v11, %v3091_v58  ;;  %v5259_v58 = vld [vmem:[%s6579_s10 + $0x150] sm:$0xff]  }
 0x928   : > { %5050 = vmatpush3.bf16.msra.mxu0 %v5259_v58 }
 0x929   : > { %5384 = vpow2.f32 %v3101_v2  ;;  %v3103_v30 = vmul.f32 1.442695, %v3098_v8  ;;  %v5260_v2 = vld [vmem:[%s6579_s10 + $0x158] sm:$0xff]   ;;  %5051 = vmatprep.subr.bf16.mxu0 %v5424_v1  ;;  %v5261_v8 = vld [vmem:[%s6579_s10 + $0x160] sm:$0xff]  }
 0x92b   : > { %5386 = vpow2.f32 %v3103_v30  ;;  %v5262_v30 = vld [vmem:[%s6579_s10 + $0x168] sm:$0xff]  }
 0x92c   : > { %5052 = vmatpush3.bf16.msra.mxu0 %v5260_v2 }
 0x92d   : > { %5053 = vmatprep.subr.bf16.mxu0 %v5424_v1 }
 0x930   : > { %5054 = vmatpush3.bf16.msra.mxu0 %v5261_v8 }
 0x931   : > { %5055 = vmatprep.subr.bf16.mxu0 %v5424_v1 }
 0x933   : > { %v5385_v61 = vpop.eup %5384 }
 0x934   : > { %v3105_v15 = vmul.f32 %v5385_v61, %v3099_v4  ;;  %5056 = vmatpush3.bf16.msra.mxu0 %v5262_v30  ;;  %v5263_v4 = vld [vmem:[%s6579_s10 + $0x170] sm:$0xff]   ;;  %v5264_v61 = vld [vmem:[%s6579_s10 + $0x178] sm:$0xff]  }
 0x935   : > { %v5387_v22 = vpop.eup %5386  ;;  %5057 = vmatprep.subr.bf16.mxu0 %v5424_v1 }
 0x936   : > { %v3133_v48 = vsel %vm993_vm7, %v3105_v15, 0.0  ;;  %3109 = vperm.xlu0 %5216, %v3105_v15   ;;  %v3106_v51 = vmul.f32 %v5387_v22, %v3100_v20  ;;  %v4706_v20 = vld [vmem:[%s6580_s11 + $0xd] ss:$0 sm:$0xff] }
 0x937   : > { %v3134_v60 = vrot.slane %v3133_v48, 4 }
 0x938   : > { %3114 = vperm.xlu1 %5217, %v3106_v51   ;;  %v3140_v37 = vsel %vm993_vm7, %v3106_v51, 0.0  ;;  %5058 = vmatpush3.bf16.msra.mxu0 %v5263_v4  ;;  %v5278_v4 = vld [vmem:[%s6579_s10 + $0x120] sm:$0xff]  }
 0x939   : > { %v3135_v45 = vadd.f32 %v3134_v60, %v3133_v48  ;;  %v3141_v16 = vrot.slane %v3140_v37, 4  ;;  %5059 = vmatprep.subr.bf16.mxu0 %v5424_v1 }
 0x93b   : > { %v3136_v19 = vrot.slane %v3135_v45, 2  ;;  %v3142_v26 = vadd.f32 %v3141_v16, %v3140_v37  ;;  %v5265_v16 = vld [vmem:[%s6579_s10 + $0x180] sm:$0xff]  }
 0x93c   : > { %5060 = vmatpush3.bf16.msra.mxu0 %v5264_v61 }
 0x93d   : > { %v3137_v62 = vadd.f32 %v3136_v19, %v3135_v45  ;;  %v3143_v13 = vrot.slane %v3142_v26, 2  ;;  %5077 = vmatprep.subr.bf16.mxu0 %v5424_v1  ;;  %v6284_v45 = vld [vmem:[%s6229_s20 + $0x8] sm:$0xff] }
 0x93e   : > { %v5266_v19 = vld [vmem:[%s6579_s10 + $0x188] sm:$0xff]  }
 0x93f   : > { %v3138_v55 = vrot.slane %v3137_v62, 1  ;;  %v3144_v18 = vadd.f32 %v3143_v13, %v3142_v26 }
 0x941   : > { %v3139_v3 = vadd.f32 %v3138_v55, %v3137_v62  ;;  %v3145_v29 = vrot.slane %v3144_v18, 1 }
 0x943   : > { %v3147_v24 = vadd.f32 1e-10, %v3139_v3  ;;  %v3146_v31 = vadd.f32 %v3145_v29, %v3144_v18  ;;  %v5267_v29 = vld [vmem:[%s6579_s10 + $0x190] sm:$0xff]  }
 0x945   : > { %5388 = vrcp.f32 %v3147_v24  ;;  %v3148_v52 = vadd.f32 1e-10, %v3146_v31  ;;  %v5268_v24 = vld [vmem:[%s6579_s10 + $0x198] sm:$0xff]   ;;  %v5269_v31 = vld [vmem:[%s6579_s10 + $0x1a0] sm:$0xff]  }
 0x947   : > { %5390 = vrcp.f32 %v3148_v52  ;;  %v4710_v52 = vld [vmem:[%s6580_s11 + $0x16] ss:$0 sm:$0xff] }
 0x94f   : > { %v5389_v63 = vpop.eup %5388 }
 0x950   : > { %3153 = vperm.xlu1 %5217, %v5389_v63  }
 0x951   : > { %v5391_v36 = vpop.eup %5390 }
 0x952   : > { %3158 = vperm.xlu0 %5216, %v5391_v36  }
 0x954   : > { %3238 = vrot.lane.b32.xlu1 %v6223_v41, %s5429_s29 }
 0x958   : > { %3501 = vperm.xlu1 %5217, %v6234_v17  }
 0x9b5   : > { %v3110_v46 = vpop.permute.xlu0 %3109 }
 0x9b6   : > { %v3117_v43 = vmul.f32 %v3110_v46, %v2946_v6 }
 0x9b7   : > { %v3115_v14 = vpop.permute.xlu1 %3114 }
 0x9b8   : > { %v3119_v56 = vsel %vm836_vm4, %v3117_v43, 0.0  ;;  %v3118_v10 = vmul.f32 %v3115_v14, %v2947_v54  ;;  %v5270_v43 = vld [vmem:[%s6579_s10 + $0x1a8] sm:$0xff]   ;;  %v4718_v14 = vld [vmem:[%s6580_s11 + $0x17] ss:$0 sm:$0xff] }
 0x9b9   : > { %v3120_v12 = vrot.slane %v3119_v56, 4 }
 0x9ba   : > { %v3126_v25 = vsel %vm836_vm4, %v3118_v10, 0.0 }
 0x9bb   : > { %v3127_v32 = vrot.slane %v3126_v25, 4  ;;  %v3121_v47 = vadd.f32 %v3120_v12, %v3119_v56 }
 0x9bd   : > { %v3128_v57 = vadd.f32 %v3127_v32, %v3126_v25  ;;  %v3122_v27 = vrot.slane %v3121_v47, 2 }
 0x9bf   : > { %v3129_v28 = vrot.slane %v3128_v57, 2  ;;  %v3123_v40 = vadd.f32 %v3122_v27, %v3121_v47 }
 0x9c1   : > { %v3130_v21 = vadd.f32 %v3129_v28, %v3128_v57  ;;  %v3124_v33 = vrot.slane %v3123_v40, 1  ;;  %v5271_v57 = vld [vmem:[%s6579_s10 + $0xf0] sm:$0xff]   ;;  %v5272_v28 = vld [vmem:[%s6579_s10 + $0xf8] sm:$0xff]  }
 0x9c3   : > { %v3131_v38 = vrot.slane %v3130_v21, 1  ;;  %v3125_v53 = vadd.f32 %v3124_v33, %v3123_v40  ;;  %v5273_v40 = vld [vmem:[%s6579_s10 + $0x100] sm:$0xff]  }
 0x9c4   : > { %v5275_v33 = vld [vmem:[%s5540_s25] sm:$0xff]   ;;  %s611_s25 = scalar_lea.vmem %s6581_s12, %s6583_s27 }
 0x9c5   : > { %v3132_v50 = vadd.f32 %v3131_v38, %v3130_v21  ;;  %v5274_v21 = vld [vmem:[%s6579_s10 + $0x108] sm:$0xff]   ;;  %v5276_v38 = vld [vmem:[%s6579_s10 + $0x110] sm:$0xff]  }
 0x9cf   : > { %v3154_v6 = vpop.permute.xlu1 %3153 }
 0x9d0   : > { %v3161_v39 = vmul.f32 %v3154_v6, %v3125_v53  ;;  %v5277_v53 = vld [vmem:[%s6579_s10 + $0x118] sm:$0xff]  }
 0x9d1   : > { %v3159_v7 = vpop.permute.xlu0 %3158 }
 0x9d2   : > { %v3163_v34 = vpack.c.bf16 %v3161_v39, %v3161_v39  ;;  %v3162_v5 = vmul.f32 %v3159_v7, %v3132_v50 }
 0x9d3   : > { %v6296_v62 = vpop.permute.xlu1 %3238 }
 0x9d4   : > { %v3164_v54 = vpack.c.bf16 %v3162_v5, %v3162_v5  ;;  %v3176_v35 = vunpack.c.l.b16 %v3163_v34  ;;  %v4730_v34 = vld [vmem:[%s6580_s11 + $0x10] ss:$0 sm:$0xff] }
 0x9d6   : > { %v3177_v11 = vunpack.c.l.b16 %v3164_v54 }
 0x9d8   : > { %v3178_v49 = vsel %vm1089_vm13, %v3177_v11, %v3176_v35 }
 0x9d9   : > { %v3179_v9 = vpack.c.b16 %v3178_v49, %v3178_v49 }
 0x9db   : > { %5046 = vmatmul.mubr.msk.bf16.vlgmr.msra.gmra.mrb[36].mxu1 %vm836_vm4, %v3179_v9 }
 0x9dc   : > { %5073 = vmatprep.mubr.msk.bf16.mxu1 %vm5425_vm0, %v5424_v1  ;;  %5066 = vmatpush3.bf16.msra.mxu1 %v5265_v16 }
 0x9dd   : > { %5067 = vmatprep.subr.bf16.mxu1 %v5424_v1 }
 0x9e0   : > { %5068 = vmatpush3.bf16.msra.mxu1 %v5266_v19 }
 0x9e1   : > { %5069 = vmatprep.subr.bf16.mxu1 %v5424_v1 }
 0x9e4   : > { %5070 = vmatpush3.bf16.msra.mxu1 %v5267_v29  ;;  %v4741_v29 = vld [vmem:[%s6580_s11 + $0x12] ss:$0 sm:$0xff] }
 0x9e5   : > { %5071 = vmatprep.subr.bf16.mxu1 %v5424_v1 }
 0x9e8   : > { %5072 = vmatpush3.bf16.msra.mxu1 %v5268_v24 }
 0x9e9   : > { %5097 = vmatprep.subr.bf16.mxu1 %v5424_v1 }
 0xaae   : > { %v3229_v15 = vpop.f32.mrb[36].mxu1 }
 0xaaf   : > { %v3230_v22 = vadd.f32 %v4706_v20, %v3229_v15  ;;  %v5047_v48 = vpop.f32.mrb[37].mxu1  ;;  %v5279_v20 = vld [vmem:[%s6579_s10 + $0x128] sm:$0xff]   ;;  %v5280_v15 = vld [vmem:[%s6579_s10 + $0x130] sm:$0xff]  }
 0xab0   : > { %v3232_v51 = vpop.f32.mrb[38].mxu1  ;;  %v4729_v48 = vld [vmem:[%s606_s18 + $0x1] ss:$0 sm:$0xff] }
 0xab1   : > { %v3235_v60 = vmax.f32 %v3230_v22, 0.0  ;;  %v5048_v37 = vpop.f32.mrb[39].mxu1  ;;  %v5281_v22 = vld [vmem:[%s6579_s10 + $0x138] sm:$0xff]  }
 0xab2   : > { %v3502_v37 = vpop.permute.xlu1 %3501 }
 0xab3   : > { %3242 = vrot.lane.b32.xlu0 %v3235_v60, %s5427_s19  ;;  %v3236_v26 = vmul.f32 %v3235_v60, %v6223_v41  ;;  %v4728_v60 = vld [vmem:[%s606_s18] ss:$0 sm:$0xff] }
 0xab4   : > { %v3521_v19 = vmul.f32 %v4728_v60, %v3502_v37 }
 0xab5   : > { %v3245_v55 = vsel %vm836_vm4, %v3236_v26, %v6296_v62 }
 0xab7   : > { %3506 = vperm.xlu0 %5216, %v6284_v45  }
 0xb25   : > { %v3243_v13 = vpop.permute.xlu0 %3242 }
 0xb26   : > { %v3246_v18 = vsel %vm686_vm1, %v3245_v55, %v3243_v13 }
 0xb27   : > { %v3247_v3 = vpack.c.bf16 %v3246_v18, %v3246_v18 }
 0xb29   : > { %5062 = vmatmul.mubr.msk.bf16.vlgmr.msra.gmra.mrb[36].mxu0 %vm3301_vm2, %v3247_v3 }
 0xb2a   : > { %5081 = vmatprep.mubr.msk.bf16.mxu0 %vm5425_vm0, %v5424_v1  ;;  %5078 = vmatpush3.bf16.msra.mxu0 %v5269_v31 }
 0xb2b   : > { %5079 = vmatprep.subr.bf16.mxu0 %v5424_v1 }
 0xb2e   : > { %5080 = vmatpush3.bf16.msra.mxu0 %v5270_v43 }
 0xb2f   : > { %5085 = vmatprep.subr.bf16.mxu0 %v5424_v1 }
 0xb36   : > { %v3507_v51 = vpop.permute.xlu0 %3506 }
 0xb37   : > { %v3522_v16 = vmul.f32 %v4729_v48, %v3507_v51 }
 0xb39   : > { %v3745_v26 = vpack.c.bf16 %v3522_v16, %v3521_v19 }
 0xbfc   : > { %v3339_v42 = vpop.f32.mrb[36].mxu0 }
 0xbfd   : > { %v3340_v0 = vadd.f32 %v4710_v52, %v3339_v42  ;;  %v5063_v63 = vpop.f32.mrb[37].mxu0 }
 0xbfe   : > { %v3342_v36 = vpop.f32.mrb[38].mxu0 }
 0xbff   : > { %v3345_v59 = vmax.f32 %v3340_v0, 0.0  ;;  %v5064_v23 = vpop.f32.mrb[39].mxu0 }
 0xc01   : > { %v3346_v46 = vpack.c.bf16 %v3345_v59, %v3345_v59  ;;  %v4748_v59 = vld [vmem:[%s6580_s11 + $0x14] ss:$0 sm:$0xff] }
 0xc03   : > { %5074 = vmatmul.mubr.msk.bf16.vlgmr.msra.gmra.mrb[40].mxu1 %vm686_vm1, %v3346_v46 }
 0xc04   : > { %5101 = vmatprep.mubr.msk.bf16.mxu1 %vm5425_vm0, %v5424_v1  ;;  %5098 = vmatpush3.bf16.msra.mxu1 %v5276_v38 }
 0xc05   : > { %5099 = vmatprep.subr.bf16.mxu1 %v5424_v1 }
 0xc08   : > { %5100 = vmatpush3.bf16.msra.mxu1 %v5277_v53 }
 0xc09   : > { %5105 = vmatprep.subr.bf16.mxu1 %v5424_v1 }
 0xcd6   : > { %v3421_v56 = vpop.f32.mrb[40].mxu1 }
 0xcd7   : > { %v3422_v10 = vadd.f32 %v4718_v14, %v3421_v56  ;;  %v5075_v12 = vpop.f32.mrb[41].mxu1 }
 0xcd8   : > { %v3424_v25 = vpop.f32.mrb[42].mxu1 }
 0xcd9   : > { %v3427_v32 = vmax.f32 %v3422_v10, 0.0  ;;  %v5076_v47 = vpop.f32.mrb[43].mxu1  ;;  %v4749_v25 = vld [vmem:[%s6580_s11 + $0x15] ss:$0 sm:$0xff] }
 0xcdb   : > { %v3428_v27 = vpack.c.bf16 %v3427_v32, %v3427_v32 }
 0xcdd   : > { %5082 = vmatmul.mubr.msk.bf16.vlgmr.msra.gmra.mrb[40].mxu0 %vm836_vm4, %v3428_v27 }
 0xcde   : > { %5086 = vmatpush3.bf16.msra.mxu0 %v5271_v57  ;;  %5093 = vmatprep.mubr.msk.bf16.mxu0 %vm5425_vm0, %v5424_v1 }
 0xcdf   : > { %5087 = vmatprep.subr.bf16.mxu0 %v5424_v1 }
 0xce2   : > { %5088 = vmatpush3.bf16.msra.mxu0 %v5272_v28 }
 0xce3   : > { %5089 = vmatprep.subr.bf16.mxu0 %v5424_v1 }
 0xce6   : > { %5090 = vmatpush3.bf16.msra.mxu0 %v5273_v40 }
 0xce7   : > { %5091 = vmatprep.subr.bf16.mxu0 %v5424_v1 }
 0xcea   : > { %5092 = vmatpush3.bf16.msra.mxu0 %v5274_v21 }
 0xceb   : > { %5121 = vmatprep.subr.bf16.mxu0 %v5424_v1 }
 0xced   : > { %5094 = vmatmul.mubr.msk.bf16.vlgmr.msra.gmra.mrb[44].mxu0 %vm686_vm1, %v5275_v33 }
 0xcee   : > { %5125 = vmatprep.mubr.msk.bf16.mxu0 %vm5425_vm0, %v5424_v1 }
 0xdb0   : > { %v6360_v6 = vpop.f32.mrb[40].mxu0 }
 0xdb1   : > { %v5083_v39 = vpop.f32.mrb[41].mxu0 }
 0xdb2   : > { %v3490_v50 = vpop.f32.mrb[42].mxu0 }
 0xdb3   : > { %v5084_v7 = vpop.f32.mrb[43].mxu0 }
 0xdc0   : > { %v3602_v5 = vpop.f32.mrb[44].mxu0 }
 0xdc1   : > { %v3603_v54 = vadd.f32 %v4730_v34, %v3602_v5  ;;  %v5095_v35 = vpop.f32.mrb[45].mxu0 }
 0xdc2   : > { %v3605_v11 = vpop.f32.mrb[46].mxu0 }
 0xdc3   : > { %v3611_v49 = vmul.f32 0.2, %v3603_v54  ;;  %v3606_v9 = vadd.f32 %v4730_v34, %v3605_v11  ;;  %v5096_v58 = vpop.f32.mrb[47].mxu0  ;;  %vm3609_vm3 = vcmp.gt.f32.partialorder %v3603_v54, 0.0 }
 0xdc5   : > { %vm3610_vm5 = vcmp.gt.f32.partialorder %v3606_v9, 0.0  ;;  %v3612_v2 = vmul.f32 0.2, %v3606_v9  ;;  %v3613_v8 = vsel %vm3609_vm3, %v3603_v54, %v3611_v49 }
 0xdc7   : > { %v3614_v30 = vsel %vm3610_vm5, %v3606_v9, %v3612_v2 }
 0xdc8   : > { %v3615_v61 = vpack.c.bf16 %v3614_v30, %v3613_v8 }
 0xdca   : > { %5102 = vmatmul.mubr.msk.bf16.vlgmr.msra.gmra.mrb[44].mxu1 %vm836_vm4, %v3615_v61 }
 0xdcb   : > { %5106 = vmatpush3.bf16.msra.mxu1 %v5278_v4  ;;  %5109 = vmatprep.mubr.msk.bf16.mxu1 %vm5425_vm0, %v5424_v1 }
 0xdcc   : > { %5107 = vmatprep.subr.bf16.mxu1 %v5424_v1 }
 0xdcf   : > { %5108 = vmatpush3.bf16.msra.mxu1 %v5279_v20  ;;  %v5282_v20 = vld [vmem:[%s6579_s10 + $0x140] sm:$0xff]  }
 0xdd0   : > { %5113 = vmatprep.subr.bf16.mxu1 %v5424_v1  ;;  %5122 = vmatpush3.bf16.msra.mxu0 %v5282_v20 }
 0xdd1   : > { %5123 = vmatprep.subr.bf16.mxu0 %v5424_v1 }
 0xdd2   : > { %5110 = vmatmul.mubr.msk.bf16.vlgmr.msra.gmra.mrb[48].mxu1 %vm836_vm4, %v5275_v33 }
 0xdd3   : > { %5114 = vmatpush3.bf16.msra.mxu1 %v5280_v15  ;;  %5117 = vmatprep.mubr.msk.bf16.mxu1 %vm5425_vm0, %v5424_v1  ;;  %v5283_v15 = vld [vmem:[%s6579_s10 + $0x148] sm:$0xff]  }
 0xdd4   : > { %5115 = vmatprep.subr.bf16.mxu1 %v5424_v1  ;;  %5124 = vmatpush3.bf16.msra.mxu0 %v5283_v15 }
 0xdd5   : > { %5129 = vmatprep.subr.bf16.mxu0 %v5424_v1 }
 0xdd7   : > { %5116 = vmatpush3.bf16.msra.mxu1 %v5281_v22  ;;  %v4737_v22 = vld [vmem:[%s6580_s11 + $0x11] ss:$0 sm:$0xff] }
 0xdd8   : > { %5145 = vmatprep.subr.bf16.mxu1 %v5424_v1 }
 0xdde   : > { %5118 = vmatmul.mubr.msk.bf16.vlgmr.msra.gmra.mrb[48].mxu1 %vm836_vm4, %v3745_v26 }
 0xddf   : > { %5153 = vmatprep.mubr.msk.bf16.mxu1 %vm5425_vm0, %v5424_v1 }
 0xe9d   : > { %v6394_v13 = vpop.f32.mrb[44].mxu1 }
 0xe9e   : > { %v5103_v55 = vpop.f32.mrb[45].mxu1 }
 0xe9f   : > { %v6396_v18 = vpop.f32.mrb[46].mxu1 }
 0xea0   : > { %v5104_v3 = vpop.f32.mrb[47].mxu1  ;;  %v3678_v51 = vadd.f32 %v4737_v22, %v6396_v18 }
 0xeb1   : > { %v3799_v24 = vpop.f32.mrb[48].mxu1 }
 0xeb2   : > { %v5191_v31 = vadd.f32 %v4741_v29, %v3799_v24  ;;  %v5119_v52 = vpop.f32.mrb[49].mxu1 }
 0xeb3   : > { %v3802_v42 = vpop.f32.mrb[50].mxu1 }
 0xeb4   : > { %vm3808_vm6 = vcmp.gt.f32.partialorder %v5191_v31, 0.0  ;;  %v3810_v0 = vmul.f32 0.2, %v5191_v31  ;;  %v5192_v63 = vadd.f32 %v4741_v29, %v3802_v42  ;;  %v5120_v36 = vpop.f32.mrb[51].mxu1 }
 0xeb6   : > { %vm3809_vm8 = vcmp.gt.f32.partialorder %v5192_v63, 0.0  ;;  %v3811_v23 = vmul.f32 0.2, %v5192_v63  ;;  %v3812_v46 = vsel %vm3808_vm6, %v5191_v31, %v3810_v0 }
 0xeb7   : > { %v3819_v43 = vmul.f32 %v4748_v59, %v3812_v46 }
 0xeb8   : > { %v3813_v14 = vsel %vm3809_vm8, %v5192_v63, %v3811_v23 }
 0xeb9   : > { %v3821_v56 = vsel %vm836_vm4, %v3819_v43, 0.0  ;;  %v3820_v10 = vmul.f32 %v4748_v59, %v3813_v14 }
 0xeba   : > { %3822 = vadd.xlane.f32.xlu1 %v3821_v56 }
 0xebb   : > { %v3824_v12 = vsel %vm836_vm4, %v3820_v10, 0.0 }
 0xebc   : > { %3825 = vadd.xlane.f32.xlu0 %v3824_v12 }
 0xf47   : > { %v3823_v32 = vpop.xlane.xlu1 %3822 }
 0xf48   : > { %v3832_v47 = vadd.f32 %v4749_v25, %v3823_v32 }
 0xf49   : > { %v3826_v57 = vpop.xlane.xlu0 %3825 }
 0xf4a   : > { %v3834_v27 = vmul.f32 1.442695, %v3832_v47  ;;  %v3833_v28 = vadd.f32 %v4749_v25, %v3826_v57  ;;  %v5284_v47 = vld [vmem:[%s6579_s10 + $0x1b0] sm:$0xff]   ;;  %v5285_v57 = vld [vmem:[%s6579_s10 + $0x1b8] sm:$0xff]  }
 0xf4c   : > { %5392 = vpow2.f32 %v3834_v27  ;;  %v3836_v40 = vmul.f32 1.442695, %v3833_v28  ;;  %v5286_v27 = vld [vmem:[%s6579_s10 + $0x1c0] sm:$0xff]   ;;  %v5287_v28 = vld [vmem:[%s6579_s10 + $0x1c8] sm:$0xff]  }
 0xf4e   : > { %5394 = vpow2.f32 %v3836_v40  ;;  %v5288_v40 = vld [vmem:[%s6579_s10 + $0x1d0] sm:$0xff]  }
 0xf56   : > { %v5393_v21 = vpop.eup %5392 }
 0xf57   : > { %v3838_v33 = vmul.f32 %v5393_v21, %v6234_v17  ;;  %v5289_v21 = vld [vmem:[%s6579_s10 + $0x1d8] sm:$0xff]  }
 0xf58   : > { %v5395_v38 = vpop.eup %5394 }
 0xf59   : > { %v3866_v53 = vsel %vm993_vm7, %v3838_v33, 0.0  ;;  %3842 = vperm.xlu0 %5216, %v3838_v33   ;;  %v3839_v39 = vmul.f32 %v5395_v38, %v6284_v45  ;;  %v5290_v33 = vld [vmem:[%s6579_s10 + $0x1e0] sm:$0xff]   ;;  %v4750_v38 = vld [vmem:[%s6580_s11 + $0x13] ss:$0 sm:$0xff] }
 0xf5a   : > { %v3867_v50 = vrot.slane %v3866_v53, 4  ;;  %5146 = vmatpush3.bf16.msra.mxu1 %v5290_v33 }
 0xf5b   : > { %3847 = vperm.xlu1 %5217, %v3839_v39   ;;  %v3873_v7 = vsel %vm993_vm7, %v3839_v39, 0.0  ;;  %5147 = vmatprep.subr.bf16.mxu1 %v5424_v1 }
 0xf5c   : > { %v3868_v34 = vadd.f32 %v3867_v50, %v3866_v53  ;;  %v3874_v5 = vrot.slane %v3873_v7, 4  ;;  %v5291_v53 = vld [vmem:[%s6579_s10 + $0x1e8] sm:$0xff]  }
 0xf5e   : > { %v3869_v54 = vrot.slane %v3868_v34, 2  ;;  %v3875_v35 = vadd.f32 %v3874_v5, %v3873_v7  ;;  %5148 = vmatpush3.bf16.msra.mxu1 %v5291_v53  ;;  %v4780_v53 = vld [vmem:[%s6580_s11 + $0x1d] ss:$0 sm:$0xff] }
 0xf5f   : > { %5149 = vmatprep.subr.bf16.mxu1 %v5424_v1 }
 0xf60   : > { %v3870_v11 = vadd.f32 %v3869_v54, %v3868_v34  ;;  %v3876_v49 = vrot.slane %v3875_v35, 2 }
 0xf62   : > { %v3871_v9 = vrot.slane %v3870_v11, 1  ;;  %v3877_v58 = vadd.f32 %v3876_v49, %v3875_v35 }
 0xf64   : > { %v3872_v2 = vadd.f32 %v3871_v9, %v3870_v11  ;;  %v3878_v17 = vrot.slane %v3877_v58, 1 }
 0xf66   : > { %v3880_v8 = vadd.f32 1e-10, %v3872_v2  ;;  %v3879_v30 = vadd.f32 %v3878_v17, %v3877_v58  ;;  %v5292_v17 = vld [vmem:[%s6579_s10 + $0x1f0] sm:$0xff]  }
 0xf67   : > { %5150 = vmatpush3.bf16.msra.mxu1 %v5292_v17 }
 0xf68   : > { %5396 = vrcp.f32 %v3880_v8  ;;  %v3881_v4 = vadd.f32 1e-10, %v3879_v30  ;;  %v5293_v8 = vld [vmem:[%s6579_s10 + $0x1f8] sm:$0xff]   ;;  %5151 = vmatprep.subr.bf16.mxu1 %v5424_v1 }
 0xf6a   : > { %5398 = vrcp.f32 %v3881_v4 }
 0xf6b   : > { %5152 = vmatpush3.bf16.msra.mxu1 %v5293_v8 }
 0xf6c   : > { %5157 = vmatprep.subr.bf16.mxu1 %v5424_v1 }
 0xf72   : > { %v5397_v45 = vpop.eup %5396 }
 0xf73   : > { %3886 = vperm.xlu1 %5217, %v5397_v45  }
 0xf74   : > { %v5399_v61 = vpop.eup %5398 }
 0xf75   : > { %3891 = vperm.xlu0 %5216, %v5399_v61  }
 0xf77   : > { %3969 = vrot.lane.b32.xlu1 %v6223_v41, %s5428_s23  ;;  %v3675_v41 = vadd.f32 %v4737_v22, %v6394_v13  ;;  %v5294_v22 = vld [vmem:[%s6579_s10 + $0x200] sm:$0xff]  }
 0xfd8   : > { %v3843_v48 = vpop.permute.xlu0 %3842 }
 0xfd9   : > { %v3850_v60 = vmul.f32 %v3843_v48, %v3675_v41  ;;  %v5295_v48 = vld [vmem:[%s6579_s10 + $0x208] sm:$0xff]  }
 0xfda   : > { %v3848_v37 = vpop.permute.xlu1 %3847 }
 0xfdb   : > { %v3852_v16 = vsel %vm836_vm4, %v3850_v60, 0.0  ;;  %v3851_v19 = vmul.f32 %v3848_v37, %v3678_v51  ;;  %v4762_v51 = vld [vmem:[%s6580_s11 + $0x1a] ss:$0 sm:$0xff] }
 0xfdc   : > { %v3853_v26 = vrot.slane %v3852_v16, 4 }
 0xfdd   : > { %v3859_v55 = vsel %vm836_vm4, %v3851_v19, 0.0 }
 0xfde   : > { %v3860_v3 = vrot.slane %v3859_v55, 4  ;;  %v3854_v29 = vadd.f32 %v3853_v26, %v3852_v16 }
 0xfe0   : > { %v3861_v24 = vadd.f32 %v3860_v3, %v3859_v55  ;;  %v3855_v31 = vrot.slane %v3854_v29, 2 }
 0xfe2   : > { %v3862_v52 = vrot.slane %v3861_v24, 2  ;;  %v3856_v42 = vadd.f32 %v3855_v31, %v3854_v29  ;;  %v5296_v29 = vld [vmem:[%s6579_s10 + $0x210] sm:$0xff]   ;;  %v5298_v31 = vld [vmem:[%s6579_s10 + $0x220] sm:$0xff]  }
 0xfe4   : > { %v3863_v0 = vadd.f32 %v3862_v52, %v3861_v24  ;;  %v3857_v63 = vrot.slane %v3856_v42, 1  ;;  %v5297_v24 = vld [vmem:[%s6579_s10 + $0x218] sm:$0xff]   ;;  %v5299_v52 = vld [vmem:[%s6579_s10 + $0x228] sm:$0xff]  }
 0xfe6   : > { %v3864_v13 = vrot.slane %v3863_v0, 1  ;;  %v3858_v36 = vadd.f32 %v3857_v63, %v3856_v42  ;;  %v5300_v42 = vld [vmem:[%s6579_s10 + $0x230] sm:$0xff]   ;;  %v5302_v63 = vld [vmem:[%s6579_s10 + $0x240] sm:$0xff]  }
 0xfe8   : > { %v3865_v23 = vadd.f32 %v3864_v13, %v3863_v0  ;;  %v5301_v0 = vld [vmem:[%s6579_s10 + $0x238] sm:$0xff]  }
 0xfe9   : > { %v4724_v13 = vld [vmem:[%s6580_s11 + $0x18] ss:$0 sm:$0xff] }
 0xff2   : > { %v3887_v59 = vpop.permute.xlu1 %3886 }
 0xff3   : > { %v3894_v18 = vmul.f32 %v3887_v59, %v3858_v36  ;;  %v4768_v36 = vld [vmem:[%s6580_s11 + $0x1b] ss:$0 sm:$0xff] }
 0xff4   : > { %v3892_v46 = vpop.permute.xlu0 %3891 }
 0xff5   : > { %v3896_v43 = vpack.c.bf16 %v3894_v18, %v3894_v18  ;;  %v3895_v14 = vmul.f32 %v3892_v46, %v3865_v23  ;;  %v3488_v18 = vadd.f32 %v4724_v13, %v6360_v6  ;;  %v4772_v6 = vld [vmem:[%s6580_s11 + $0x1c] ss:$0 sm:$0xff] }
 0xff6   : > { %v3970_v35 = vpop.permute.xlu1 %3969 }
 0xff7   : > { %v3897_v56 = vpack.c.bf16 %v3895_v14, %v3895_v14  ;;  %v3909_v10 = vunpack.c.l.b16 %v3896_v43 }
 0xff9   : > { %v3910_v12 = vunpack.c.l.b16 %v3897_v56 }
 0xffb   : > { %v3911_v25 = vsel %vm1089_vm13, %v3910_v12, %v3909_v10 }
 0xffc   : > { %v3912_v32 = vpack.c.b16 %v3911_v25, %v3911_v25 }
 0xffe   : > { %5126 = vmatmul.mubr.msk.bf16.vlgmr.msra.gmra.mrb[48].mxu0 %vm836_vm4, %v3912_v32 }
 0xfff   : > { %5141 = vmatprep.mubr.msk.bf16.mxu0 %vm5425_vm0, %v5424_v1  ;;  %5130 = vmatpush3.bf16.msra.mxu0 %v5284_v47 }
0x1000   : > { %5131 = vmatprep.subr.bf16.mxu0 %v5424_v1 }
0x1003   : > { %5132 = vmatpush3.bf16.msra.mxu0 %v5285_v57 }
0x1004   : > { %5133 = vmatprep.subr.bf16.mxu0 %v5424_v1 }
0x1007   : > { %5134 = vmatpush3.bf16.msra.mxu0 %v5286_v27 }
0x1008   : > { %5135 = vmatprep.subr.bf16.mxu0 %v5424_v1 }
0x100b   : > { %5136 = vmatpush3.bf16.msra.mxu0 %v5287_v28 }
0x100c   : > { %5137 = vmatprep.subr.bf16.mxu0 %v5424_v1 }
0x100f   : > { %5138 = vmatpush3.bf16.msra.mxu0 %v5288_v40 }
0x1010   : > { %5139 = vmatprep.subr.bf16.mxu0 %v5424_v1 }
0x1013   : > { %5140 = vmatpush3.bf16.msra.mxu0 %v5289_v21 }
0x1014   : > { %5165 = vmatprep.subr.bf16.mxu0 %v5424_v1 }
0x10d1   : > { %v3962_v39 = vpop.f32.mrb[48].mxu0 }
0x10d2   : > { %v3963_v50 = vadd.f32 %v4750_v38, %v3962_v39  ;;  %v5127_v7 = vpop.f32.mrb[49].mxu0 }
0x10d3   : > { %v3965_v34 = vpop.f32.mrb[50].mxu0 }
0x10d4   : > { %v3968_v5 = vmax.f32 %v3963_v50, 0.0  ;;  %v5128_v54 = vpop.f32.mrb[51].mxu0  ;;  %v4784_v34 = vld [vmem:[%s6580_s11 + $0x1e] ss:$0 sm:$0xff] }
0x10d6   : > { %3974 = vrot.lane.b32.xlu0 %v3968_v5, %s5429_s29  ;;  %v3972_v11 = vmul.f32 %v3970_v35, %v3968_v5 }
0x1148   : > { %v3975_v49 = vpop.permute.xlu0 %3974 }
0x1149   : > { %v3977_v9 = vsel %vm836_vm4, %v3972_v11, %v3975_v49 }
0x114a   : > { %v3978_v58 = vsel %vm686_vm1, %v3977_v9, %v6296_v62  ;;  %v4754_v62 = vld [vmem:[%s6580_s11 + $0x19] ss:$0 sm:$0xff]  ;;  %v4785_v9 = vld [vmem:[%s6580_s11 + $0x1f] ss:$0 sm:$0xff] }
0x114b   : > { %v3979_v2 = vpack.c.bf16 %v3978_v58, %v3978_v58 }
0x114d   : > { %5142 = vmatmul.mubr.msk.bf16.vlgmr.msra.gmra.mrb[52].mxu0 %vm3301_vm2, %v3979_v2 }
0x114e   : > { %5177 = vmatprep.mubr.msk.bf16.mxu0 %vm5425_vm0, %v5424_v1  ;;  %5166 = vmatpush3.bf16.msra.mxu0 %v5296_v29 }
0x114f   : > { %5167 = vmatprep.subr.bf16.mxu0 %v5424_v1 }
0x1152   : > { %5168 = vmatpush3.bf16.msra.mxu0 %v5297_v24 }
0x1153   : > { %5169 = vmatprep.subr.bf16.mxu0 %v5424_v1 }
0x1156   : > { %5170 = vmatpush3.bf16.msra.mxu0 %v5298_v31 }
0x1157   : > { %5171 = vmatprep.subr.bf16.mxu0 %v5424_v1 }
0x115a   : > { %5172 = vmatpush3.bf16.msra.mxu0 %v5299_v52 }
0x115b   : > { %5173 = vmatprep.subr.bf16.mxu0 %v5424_v1 }
0x115e   : > { %5174 = vmatpush3.bf16.msra.mxu0 %v5300_v42 }
0x115f   : > { %5175 = vmatprep.subr.bf16.mxu0 %v5424_v1 }
0x1162   : > { %5176 = vmatpush3.bf16.msra.mxu0 %v5301_v0 }
0x1220   : > { %v4070_v30 = vpop.f32.mrb[52].mxu0 }
0x1221   : > { %v4071_v4 = vadd.f32 %v4754_v62, %v4070_v30  ;;  %v5143_v45 = vpop.f32.mrb[53].mxu0 }
0x1222   : > { %v4073_v61 = vpop.f32.mrb[54].mxu0 }
0x1223   : > { %v4076_v20 = vmax.f32 %v4071_v4, 0.0  ;;  %v5144_v15 = vpop.f32.mrb[55].mxu0 }
0x1225   : > { %v4077_v41 = vpack.c.bf16 %v4076_v20, %v4076_v20 }
0x1227   : > { %5154 = vmatmul.mubr.msk.bf16.vlgmr.msra.gmra.mrb[52].mxu1 %vm686_vm1, %v4077_v41 }
0x1228   : > { %5158 = vmatpush3.bf16.msra.mxu1 %v5294_v22  ;;  %5161 = vmatprep.mubr.msk.bf16.mxu1 %vm5425_vm0, %v5424_v1 }
0x1229   : > { %5159 = vmatprep.subr.bf16.mxu1 %v5424_v1 }
0x122c   : > { %5160 = vmatpush3.bf16.msra.mxu1 %v5295_v48 }
0x122d   : > { %5181 = vmatprep.subr.bf16.mxu1 %v5424_v1 }
0x12fa   : > { %v4152_v60 = vpop.f32.mrb[52].mxu1 }
0x12fb   : > { %v4153_v37 = vadd.f32 %v4762_v51, %v4152_v60  ;;  %v5155_v16 = vpop.f32.mrb[53].mxu1 }
0x12fc   : > { %v4155_v19 = vpop.f32.mrb[54].mxu1 }
0x12fd   : > { %v4158_v26 = vmax.f32 %v4153_v37, 0.0  ;;  %v5156_v55 = vpop.f32.mrb[55].mxu1 }
0x12ff   : > { %v4159_v3 = vpack.c.bf16 %v4158_v26, %v4158_v26 }
0x1301   : > { %5162 = vmatmul.mubr.msk.bf16.vlgmr.msra.gmra.mrb[56].mxu1 %vm836_vm4, %v4159_v3 }
0x1302   : > { %5185 = vmatprep.mubr.msk.bf16.mxu1 %vm5425_vm0, %v5424_v1  ;;  %5182 = vmatpush3.bf16.msra.mxu1 %v5302_v63  ;;  %vm4405_vm0 = vcmask 58368  }
0x1303   : > { %5183 = vmatprep.subr.bf16.mxu1 %v5424_v1  ;;  %v5303_v1 = vld [vmem:[%s6579_s10 + $0x248] sm:$0xff]  }
0x1306   : > { %5184 = vmatpush3.bf16.msra.mxu1 %v5303_v1 }
0x13d4   : > { %v4218_v59 = vpop.f32.mrb[56].mxu1 }
0x13d5   : > { %v4219_v23 = vadd.f32 %v4768_v36, %v4218_v59  ;;  %v5163_v46 = vpop.f32.mrb[57].mxu1 }
0x13d6   : > { %v4221_v43 = vpop.f32.mrb[58].mxu1 }
0x13d7   : > { %v4224_v14 = vmul.f32 %v4219_v23, %v3488_v18  ;;  %4226 = vrot.lane.b32.xlu1 %v4219_v23, %s5429_s29  ;;  %v5164_v56 = vpop.f32.mrb[59].mxu1 }
0x13d9   : > { %4230 = vrot.lane.b32.xlu0 %v4224_v14, %s5427_s19 }
0x1449   : > { %v4227_v10 = vpop.permute.xlu1 %4226 }
0x144a   : > { %v4233_v12 = vsel %vm836_vm4, %v3488_v18, %v4227_v10 }
0x144b   : > { %v4231_v25 = vpop.permute.xlu0 %4230 }
0x144c   : > { %v4234_v32 = vsel %vm686_vm1, %v4233_v12, %v4231_v25  ;;  %vm4440_vm1 = vcmask 0  }
0x144d   : > { %v4235_v47 = vpack.c.bf16 %v4234_v32, %v4234_v32 }
0x144f   : > { %5178 = vmatmul.mubr.msk.bf16.vlgmr.msra.gmra.mrb[56].mxu0 %vm3301_vm2, %v4235_v47 }
0x1522   : > { %v4326_v57 = vpop.f32.mrb[56].mxu0 }
0x1523   : > { %v4327_v27 = vadd.f32 %v4772_v6, %v4326_v57  ;;  %v5179_v28 = vpop.f32.mrb[57].mxu0 }
0x1524   : > { %v4329_v40 = vpop.f32.mrb[58].mxu0 }
0x1525   : > { %v4332_v21 = vmax.f32 %v4327_v27, 0.0  ;;  %v5180_v33 = vpop.f32.mrb[59].mxu0 }
0x1527   : > { %v4333_v38 = vpack.c.bf16 %v4332_v21, %v4332_v21 }
0x1529   : > { %5186 = vmatmul.mubr.msk.bf16.vlgmr.msra.gmra.mrb[60].mxu1 %vm836_vm4, %v4333_v38 }
0x15fc   : > { %v4392_v39 = vpop.f32.mrb[60].mxu1 }
0x15fd   : > { %v4393_v50 = vadd.f32 %v4780_v53, %v4392_v39  ;;  %v5187_v7 = vpop.f32.mrb[61].mxu1 }
0x15fe   : > { %v4395_v5 = vpop.f32.mrb[62].mxu1 }
0x15ff   : > { %v4398_v54 = vmax.f32 %v4393_v50, 0.0  ;;  %v5188_v35 = vpop.f32.mrb[63].mxu1 }
0x1601   : > { %v4404_v11 = vmul.f32 %v4784_v34, %v4398_v54 }
0x1603   : > { %v4406_v49 = vsel %vm4405_vm0, %v4404_v11, 0.0 }
0x1604   : > { %4407 = vadd.xlane.f32.xlu1 %v4406_v49 }
0x1691   : > { %v4408_v58 = vpop.xlane.xlu1 %4407 }
0x1692   : > { %v4414_v2 = vadd.f32 %v4785_v9, %v4408_v58 }
0x1694   : > { %v4422_v17 = vrot.slane %v4414_v2, %v5684_v44 }
0x1696   : > { %v4423_v8 = vcombine.high %v4422_v17, %v4422_v17  ;;  %v4430_v62 = vrot.slane %v4422_v17, %v5684_v44 }
0x1698   : > { %v4437_v30 = vrot.slane %v4423_v8, %v5684_v44  ;;  %4441 = vst.msk [vmem:[%s611_s25] sm:$0x1] %vm4440_vm1, %v4430_v62 }
0x169a   : > { %4442 = vst.msk [vmem:[%s611_s25 + $0x1] sm:$0x1] %vm4440_vm1, %v4437_v30 }
0x169b PF: > { %s22_s21 = sadd.s32 1, %s5422_s21  }
0x169c   : > { %p19_p4 = scmp.ge.s32.totalorder %s22_s21, 4  }
0x169e   :  { %21 = sbr.rel (!%p19_p4) target bundleno = 1 (0x1), region = 125 }

</bundles_post_ra>
